<compile_context>
chip_gen: v7x
topology: tpu7x:2x2x1
jax: 0.10.0
libtpu: 0.0.40
codegen_flags: <defaults>
</compile_context>

<pallas_src>
import functools

import jax
import jax.numpy as jnp
from jax.experimental import pallas as pl
from jax.experimental.pallas import tpu as pltpu

NEG_PAD = -1e30  # bias for padded class lanes: exp(NEG_PAD - max) underflows to 0


# ----------------------------------------------------------------------------
# Fused Pallas kernel: conv1 -> relu -> (dropout=id) -> conv2 -> log_softmax
# One grid step per graph in the batch.
# ----------------------------------------------------------------------------
def _gcn_fused_kernel(s_ref, x_ref,
                      w1c1_ref, b11_ref, w21_ref, b21_ref,
                      w1c2_ref, b12_ref, w22_ref, b22_ref,
                      o_ref, *, num_neighbors):
    K = num_neighbors
    S = s_ref[0]                            # [K*N, 2N]  augmented gather matrix
    x = x_ref[0]                            # [N, C]
    N = x.shape[0]

    def edgeconv(feat, w1_cat, b1, w2, b2):
        # EdgeConv message: h_e = relu(concat([x_i, x_j - x_i]) @ W1 + b1)
        #                       = relu(x_i @ (W1a - W1b) + x_j @ W1b + b1)
        # w1_cat = hstack([W1b, W1a - W1b])  -> one node matmul, lane-split.
        hid = b1.shape[1]
        proj = jnp.dot(feat, w1_cat, preferred_element_type=jnp.float32)   # [N, 2H]
        rhs = jnp.concatenate([proj[:, :hid],                               # x @ W1_nbr
                               proj[:, hid:] + b1], axis=0)                 # x @ W1_self + b1
        # Gather + self-term add fused into one MXU pass (contraction depth 2N).
        h = jnp.maximum(jnp.dot(S, rhs, preferred_element_type=jnp.float32), 0.0)  # [K*N, H]
        if hid <= 8:
            # Tiny contraction (layer 2): VPU broadcast-FMAs, skip the MXU round trip.
            m = h[:, 0:1] * w2[0:1, :]
            for j in range(1, hid):
                m = m + h[:, j:j + 1] * w2[j:j + 1, :]
        else:
            m = jnp.dot(h, w2, preferred_element_type=jnp.float32)          # [K*N, OUT]
        # aggr='max' over the K neighbor blocks (b2 hoisted out of the max).
        agg = m[:N]
        for k in range(1, K):
            agg = jnp.maximum(agg, m[k * N:(k + 1) * N])
        return agg + b2                                                      # [N, OUT]

    # conv1 + F.relu
    h1 = edgeconv(x, w1c1_ref[...], b11_ref[...], w21_ref[...], b21_ref[...])
    h1 = jnp.maximum(h1, 0.0)
    # F.dropout(training=False) -> identity at inference.
    # conv2 (output lanes padded to 128; pad lanes carry NEG_PAD bias)
    out = edgeconv(h1, w1c2_ref[...], b12_ref[...], w22_ref[...], b22_ref[...])
    # F.log_softmax(dim=1): pad lanes hold ~NEG_PAD, so they contribute exp(...)=0.
    mx = jnp.max(out, axis=-1, keepdims=True)
    lse = jnp.log(jnp.sum(jnp.exp(out - mx), axis=-1, keepdims=True)) + mx
    o_ref[0] = (out - lse).astype(o_ref.dtype)


# ----------------------------------------------------------------------------
# Wrapper
# ----------------------------------------------------------------------------
def _build_gather_matrix(nbr_idx, num_nodes):
    # nbr_idx: [B, N, K] int32 -> S: [B, K*N, 2N] f32
    B, N, K = nbr_idx.shape
    idx_km = jnp.transpose(nbr_idx, (0, 2, 1)).reshape(B, K * N)        # k-major
    gather = jax.nn.one_hot(idx_km, num_nodes, dtype=jnp.float32)       # [B, K*N, N]
    self_oh = jnp.tile(jnp.eye(num_nodes, dtype=jnp.float32), (K, 1))   # [K*N, N]
    self_oh = jnp.broadcast_to(self_oh[None], (B, K * N, num_nodes))
    return jnp.concatenate([gather, self_oh], axis=-1)                  # [B, K*N, 2N]


def gcn_forward(x, nbr_idx, params):
    B, N, C = x.shape
    K = nbr_idx.shape[-1]
    OUT_PAD = 128

    S = _build_gather_matrix(nbr_idx.astype(jnp.int32), N)              # [B, K*N, 2N]

    # Layer 1 params: Linear(2C, H) split into self/neighbor halves via the
    # identity  concat([xi, xj-xi]) @ W1 == xi @ (W1a - W1b) + xj @ W1b.
    c1_w1 = params["c1_w1"]
    H = c1_w1.shape[1]
    w1cat_1 = jnp.concatenate([c1_w1[C:], c1_w1[:C] - c1_w1[C:]], axis=1)   # [C, 2H]
    b1_1 = params["c1_b1"].reshape(1, H)
    w2_1 = params["c1_w2"]
    b2_1 = params["c1_b2"].reshape(1, H)

    # Layer 2 params: Linear(2H, OUT) split the same way; second linear padded
    # to 128 output lanes for a lane-dense store (pad bias = NEG_PAD so the
    # log_softmax over the real classes is unchanged).
    c2_w1 = params["c2_w1"]
    OUT = c2_w1.shape[1]
    w1cat_2 = jnp.concatenate([c2_w1[H:], c2_w1[:H] - c2_w1[H:]], axis=1)   # [H, 2*OUT]
    b1_2 = params["c2_b1"].reshape(1, OUT)
    w2_2p = jnp.zeros((OUT, OUT_PAD), jnp.float32).at[:, :OUT].set(params["c2_w2"])
    b2_2p = jnp.full((1, OUT_PAD), NEG_PAD, jnp.float32).at[0, :OUT].set(params["c2_b2"])

    inputs = (S, x.astype(jnp.float32),
              w1cat_1, b1_1, w2_1, b2_1,
              w1cat_2, b1_2, w2_2p, b2_2p)

    def weight_spec(shape):
        nd = len(shape)
        return pl.BlockSpec(shape, lambda b, _nd=nd: (0,) * _nd)

    in_specs = [
        pl.BlockSpec((1, K * N, 2 * N), lambda b: (b, 0, 0)),
        pl.BlockSpec((1, N, C), lambda b: (b, 0, 0)),
    ] + [weight_spec(a.shape) for a in inputs[2:]]

    kernel = functools.partial(_gcn_fused_kernel, num_neighbors=K)

    out_padded = pl.pallas_call(
        kernel,
        out_shape=jax.ShapeDtypeStruct((B, N, OUT_PAD), jnp.float32),
        grid_spec=pltpu.PrefetchScalarGridSpec(
            num_scalar_prefetch=0,
            grid=(B,),
            in_specs=in_specs,
            out_specs=pl.BlockSpec((1, N, OUT_PAD), lambda b: (b, 0, 0)),
        ),
        compiler_params=pltpu.CompilerParams(
            dimension_semantics=("parallel",)),
    )(*inputs)

    return out_padded[:, :, :OUT]


# ----------------------------------------------------------------------------
# Pure-JAX reference (for correctness check)
# ----------------------------------------------------------------------------
def edgeconv_ref(x, nbr_idx, w1, b1, w2, b2):
    K = nbr_idx.shape[1]
    xi = jnp.repeat(x[:, None, :], K, axis=1)           # [N, K, C]
    xj = x[nbr_idx]                                      # [N, K, C]
    feat = jnp.concatenate([xi, xj - xi], axis=-1)       # [N, K, 2C]
    h = jnp.maximum(feat @ w1 + b1, 0.0)
    h = h @ w2 + b2
    return jnp.max(h, axis=1)                            # aggr='max'


def gcn_ref_single(x, nbr_idx, params):
    h = jnp.maximum(edgeconv_ref(x, nbr_idx, params["c1_w1"], params["c1_b1"],
                                 params["c1_w2"], params["c1_b2"]), 0.0)
    out = edgeconv_ref(h, nbr_idx, params["c2_w1"], params["c2_b1"],
                       params["c2_w2"], params["c2_b2"])
    return jax.nn.log_softmax(out, axis=1)


# ----------------------------------------------------------------------------
# Main
# ----------------------------------------------------------------------------
if __name__ == "__main__":
    B = 2             # graphs per pallas_call (parallel grid axis)
    N = 64            # nodes per point cloud
    K = 6             # kNN graph, k=6 (as in T.KNNGraph(k=6))
    C_IN = 3          # dataset.num_node_features (ShapeNet xyz positions)
    HID = 16          # conv1 out_channels
    NUM_CLASSES = 4   # dataset.num_classes stand-in

    key = jax.random.PRNGKey(0)
    k_pts, k1, k2, k3, k4, k5, k6, k7, k8 = jax.random.split(key, 9)

    # Synthetic batched point clouds + kNN neighbor tables (edge_index stand-in).
    pts = jax.random.normal(k_pts, (B, N, C_IN), dtype=jnp.float32)
    d2 = jnp.sum((pts[:, :, None, :] - pts[:, None, :, :]) ** 2, axis=-1)
    d2 = d2 + jnp.eye(N) * 1e9                     # exclude self
    nbr_idx = jnp.argsort(d2, axis=-1)[:, :, :K]   # [B, N, K] sources per target

    def lin_init(kw, kb, fan_in, fan_out):
        bound = 1.0 / jnp.sqrt(fan_in)
        w = jax.random.uniform(kw, (fan_in, fan_out), jnp.float32, -bound, bound)
        b = jax.random.uniform(kb, (fan_out,), jnp.float32, -bound, bound)
        return w, b

    # EdgeConv(3, 16):  Linear(6, 16) -> ReLU -> Linear(16, 16)
    c1_w1, c1_b1 = lin_init(k1, k2, 2 * C_IN, HID)
    c1_w2, c1_b2 = lin_init(k3, k4, HID, HID)
    # EdgeConv(16, 4):  Linear(32, 4) -> ReLU -> Linear(4, 4)
    c2_w1, c2_b1 = lin_init(k5, k6, 2 * HID, NUM_CLASSES)
    c2_w2, c2_b2 = lin_init(k7, k8, NUM_CLASSES, NUM_CLASSES)

    params = dict(c1_w1=c1_w1, c1_b1=c1_b1, c1_w2=c1_w2, c1_b2=c1_b2,
                  c2_w1=c2_w1, c2_b1=c2_b1, c2_w2=c2_w2, c2_b2=c2_b2)

    out = gcn_forward(pts, nbr_idx, params)
    out = jax.block_until_ready(out)

    ref = jnp.stack([gcn_ref_single(pts[b], nbr_idx[b], params) for b in range(B)])
    ref = jax.block_until_ready(ref)

    assert out.shape == (B, N, NUM_CLASSES)
    assert jnp.allclose(out, ref, atol=1e-4, rtol=1e-4), (
        f"max abs err = {jnp.max(jnp.abs(out - ref))}")

    print("KERNEL_OK")
</pallas_src>

<mosaic_0001>
module attributes {stable_mosaic.version = 11 : i64} {
  func.func @_gcn_fused_kernel(%arg0: i32, %arg1: memref<1x384x128xf32, #tpu.memory_space<vmem>>, %arg2: memref<1x64x3xf32, #tpu.memory_space<vmem>>, %arg3: memref<3x32xf32, #tpu.memory_space<vmem>>, %arg4: memref<1x16xf32, #tpu.memory_space<vmem>>, %arg5: memref<16x16xf32, #tpu.memory_space<vmem>>, %arg6: memref<1x16xf32, #tpu.memory_space<vmem>>, %arg7: memref<16x8xf32, #tpu.memory_space<vmem>>, %arg8: memref<1x4xf32, #tpu.memory_space<vmem>>, %arg9: memref<4x128xf32, #tpu.memory_space<vmem>>, %arg10: memref<1x128xf32, #tpu.memory_space<vmem>>, %arg11: memref<1x64x128xf32, #tpu.memory_space<vmem>>) attributes {dimension_semantics = [#tpu.dimension_semantics<parallel>], iteration_bounds = array<i64: 2>, scalar_prefetch = 0 : i64, scratch_operands = 0 : i64, tpu.core_type = #tpu.core_type<tc>, window_params = [{transform_indices = @transform_0, window_bounds = array<i64: 1, 384, 128>}, {transform_indices = @transform_1, window_bounds = array<i64: 1, 64, 3>}, {pipeline_mode = #tpu.pipeline_mode<synchronous>, transform_indices = @transform_2, window_bounds = array<i64: 3, 32>}, {pipeline_mode = #tpu.pipeline_mode<synchronous>, transform_indices = @transform_3, window_bounds = array<i64: 1, 16>}, {pipeline_mode = #tpu.pipeline_mode<synchronous>, transform_indices = @transform_4, window_bounds = array<i64: 16, 16>}, {pipeline_mode = #tpu.pipeline_mode<synchronous>, transform_indices = @transform_5, window_bounds = array<i64: 1, 16>}, {pipeline_mode = #tpu.pipeline_mode<synchronous>, transform_indices = @transform_6, window_bounds = array<i64: 16, 8>}, {pipeline_mode = #tpu.pipeline_mode<synchronous>, transform_indices = @transform_7, window_bounds = array<i64: 1, 4>}, {pipeline_mode = #tpu.pipeline_mode<synchronous>, transform_indices = @transform_8, window_bounds = array<i64: 4, 128>}, {pipeline_mode = #tpu.pipeline_mode<synchronous>, transform_indices = @transform_9, window_bounds = array<i64: 1, 128>}, {transform_indices = @transform_10, window_bounds = array<i64: 1, 64, 128>}]} {
    %c0 = arith.constant 0 : index
    %c0_0 = arith.constant 0 : index
    %c0_1 = arith.constant 0 : index
    %0 = vector.load %arg1[%c0, %c0_0, %c0_1] : memref<1x384x128xf32, #tpu.memory_space<vmem>>, vector<1x384x128xf32>
    %1 = vector.shape_cast %0 : vector<1x384x128xf32> to vector<384x128xf32>
    %c0_2 = arith.constant 0 : index
    %c0_3 = arith.constant 0 : index
    %c0_4 = arith.constant 0 : index
    %2 = vector.load %arg2[%c0_2, %c0_3, %c0_4] : memref<1x64x3xf32, #tpu.memory_space<vmem>>, vector<1x64x3xf32>
    %3 = vector.shape_cast %2 : vector<1x64x3xf32> to vector<64x3xf32>
    %c0_5 = arith.constant 0 : index
    %c0_6 = arith.constant 0 : index
    %4 = vector.load %arg3[%c0_5, %c0_6] : memref<3x32xf32, #tpu.memory_space<vmem>>, vector<3x32xf32>
    %c0_7 = arith.constant 0 : index
    %c0_8 = arith.constant 0 : index
    %5 = vector.load %arg4[%c0_7, %c0_8] : memref<1x16xf32, #tpu.memory_space<vmem>>, vector<1x16xf32>
    %c0_9 = arith.constant 0 : index
    %c0_10 = arith.constant 0 : index
    %6 = vector.load %arg5[%c0_9, %c0_10] : memref<16x16xf32, #tpu.memory_space<vmem>>, vector<16x16xf32>
    %c0_11 = arith.constant 0 : index
    %c0_12 = arith.constant 0 : index
    %7 = vector.load %arg6[%c0_11, %c0_12] : memref<1x16xf32, #tpu.memory_space<vmem>>, vector<1x16xf32>
    %cst = arith.constant dense<0.000000e+00> : vector<64x32xf32>
    %8 = tpu.matmul %3, %4, %cst {dimension_numbers = #tpu.dot_dimension_numbers<[1], [0], [0], [1], [0, 0, 1, 1], [], []>} : vector<64x3xf32>, vector<3x32xf32>, vector<64x32xf32> -> vector<64x32xf32>
    %9 = vector.extract_strided_slice %8 {offsets = [0, 0], sizes = [64, 16], strides = [1, 1]} : vector<64x32xf32> to vector<64x16xf32>
    %10 = vector.extract_strided_slice %8 {offsets = [0, 16], sizes = [64, 16], strides = [1, 1]} : vector<64x32xf32> to vector<64x16xf32>
    %11 = vector.broadcast %5 : vector<1x16xf32> to vector<64x16xf32>
    %12 = arith.addf %10, %11 : vector<64x16xf32>
    %13 = tpu.concatenate %9, %12 in 0 : vector<64x16xf32>, vector<64x16xf32> -> vector<128x16xf32>
    %cst_13 = arith.constant dense<0.000000e+00> : vector<384x16xf32>
    %14 = tpu.matmul %1, %13, %cst_13 {dimension_numbers = #tpu.dot_dimension_numbers<[1], [0], [0], [1], [0, 0, 1, 1], [], []>} : vector<384x128xf32>, vector<128x16xf32>, vector<384x16xf32> -> vector<384x16xf32>
    %cst_14 = arith.constant 0.000000e+00 : f32
    %15 = vector.broadcast %cst_14 : f32 to vector<384x16xf32>
    %16 = arith.maximumf %14, %15 : vector<384x16xf32>
    %cst_15 = arith.constant dense<0.000000e+00> : vector<384x16xf32>
    %17 = tpu.matmul %16, %6, %cst_15 {dimension_numbers = #tpu.dot_dimension_numbers<[1], [0], [0], [1], [0, 0, 1, 1], [], []>} : vector<384x16xf32>, vector<16x16xf32>, vector<384x16xf32> -> vector<384x16xf32>
    %18 = vector.extract_strided_slice %17 {offsets = [0, 0], sizes = [64, 16], strides = [1, 1]} : vector<384x16xf32> to vector<64x16xf32>
    %19 = vector.extract_strided_slice %17 {offsets = [64, 0], sizes = [64, 16], strides = [1, 1]} : vector<384x16xf32> to vector<64x16xf32>
    %20 = arith.maximumf %18, %19 : vector<64x16xf32>
    %21 = vector.extract_strided_slice %17 {offsets = [128, 0], sizes = [64, 16], strides = [1, 1]} : vector<384x16xf32> to vector<64x16xf32>
    %22 = arith.maximumf %20, %21 : vector<64x16xf32>
    %23 = vector.extract_strided_slice %17 {offsets = [192, 0], sizes = [64, 16], strides = [1, 1]} : vector<384x16xf32> to vector<64x16xf32>
    %24 = arith.maximumf %22, %23 : vector<64x16xf32>
    %25 = vector.extract_strided_slice %17 {offsets = [256, 0], sizes = [64, 16], strides = [1, 1]} : vector<384x16xf32> to vector<64x16xf32>
    %26 = arith.maximumf %24, %25 : vector<64x16xf32>
    %27 = vector.extract_strided_slice %17 {offsets = [320, 0], sizes = [64, 16], strides = [1, 1]} : vector<384x16xf32> to vector<64x16xf32>
    %28 = arith.maximumf %26, %27 : vector<64x16xf32>
    %29 = vector.broadcast %7 : vector<1x16xf32> to vector<64x16xf32>
    %30 = arith.addf %28, %29 : vector<64x16xf32>
    %cst_16 = arith.constant 0.000000e+00 : f32
    %31 = vector.broadcast %cst_16 : f32 to vector<64x16xf32>
    %32 = arith.maximumf %30, %31 : vector<64x16xf32>
    %c0_17 = arith.constant 0 : index
    %c0_18 = arith.constant 0 : index
    %33 = vector.load %arg7[%c0_17, %c0_18] : memref<16x8xf32, #tpu.memory_space<vmem>>, vector<16x8xf32>
    %c0_19 = arith.constant 0 : index
    %c0_20 = arith.constant 0 : index
    %34 = vector.load %arg8[%c0_19, %c0_20] : memref<1x4xf32, #tpu.memory_space<vmem>>, vector<1x4xf32>
    %c0_21 = arith.constant 0 : index
    %c0_22 = arith.constant 0 : index
    %35 = vector.load %arg9[%c0_21, %c0_22] : memref<4x128xf32, #tpu.memory_space<vmem>>, vector<4x128xf32>
    %c0_23 = arith.constant 0 : index
    %c0_24 = arith.constant 0 : index
    %36 = vector.load %arg10[%c0_23, %c0_24] : memref<1x128xf32, #tpu.memory_space<vmem>>, vector<1x128xf32>
    %cst_25 = arith.constant dense<0.000000e+00> : vector<64x8xf32>
    %37 = tpu.matmul %32, %33, %cst_25 {dimension_numbers = #tpu.dot_dimension_numbers<[1], [0], [0], [1], [0, 0, 1, 1], [], []>} : vector<64x16xf32>, vector<16x8xf32>, vector<64x8xf32> -> vector<64x8xf32>
    %38 = vector.extract_strided_slice %37 {offsets = [0, 0], sizes = [64, 4], strides = [1, 1]} : vector<64x8xf32> to vector<64x4xf32>
    %39 = vector.extract_strided_slice %37 {offsets = [0, 4], sizes = [64, 4], strides = [1, 1]} : vector<64x8xf32> to vector<64x4xf32>
    %40 = vector.broadcast %34 : vector<1x4xf32> to vector<64x4xf32>
    %41 = arith.addf %39, %40 : vector<64x4xf32>
    %42 = tpu.concatenate %38, %41 in 0 : vector<64x4xf32>, vector<64x4xf32> -> vector<128x4xf32>
    %cst_26 = arith.constant dense<0.000000e+00> : vector<384x4xf32>
    %43 = tpu.matmul %1, %42, %cst_26 {dimension_numbers = #tpu.dot_dimension_numbers<[1], [0], [0], [1], [0, 0, 1, 1], [], []>} : vector<384x128xf32>, vector<128x4xf32>, vector<384x4xf32> -> vector<384x4xf32>
    %cst_27 = arith.constant 0.000000e+00 : f32
    %44 = vector.broadcast %cst_27 : f32 to vector<384x4xf32>
    %45 = arith.maximumf %43, %44 : vector<384x4xf32>
    %46 = vector.extract_strided_slice %45 {offsets = [0, 0], sizes = [384, 1], strides = [1, 1]} : vector<384x4xf32> to vector<384x1xf32>
    %47 = vector.extract_strided_slice %35 {offsets = [0, 0], sizes = [1, 128], strides = [1, 1]} : vector<4x128xf32> to vector<1x128xf32>
    %48 = vector.broadcast %46 : vector<384x1xf32> to vector<384x128xf32>
    %49 = vector.broadcast %47 : vector<1x128xf32> to vector<384x128xf32>
    %50 = arith.mulf %48, %49 : vector<384x128xf32>
    %51 = vector.extract_strided_slice %45 {offsets = [0, 1], sizes = [384, 1], strides = [1, 1]} : vector<384x4xf32> to vector<384x1xf32>
    %52 = vector.extract_strided_slice %35 {offsets = [1, 0], sizes = [1, 128], strides = [1, 1]} : vector<4x128xf32> to vector<1x128xf32>
    %53 = vector.broadcast %51 : vector<384x1xf32> to vector<384x128xf32>
    %54 = vector.broadcast %52 : vector<1x128xf32> to vector<384x128xf32>
    %55 = arith.mulf %53, %54 : vector<384x128xf32>
    %56 = arith.addf %50, %55 : vector<384x128xf32>
    %57 = vector.extract_strided_slice %45 {offsets = [0, 2], sizes = [384, 1], strides = [1, 1]} : vector<384x4xf32> to vector<384x1xf32>
    %58 = vector.extract_strided_slice %35 {offsets = [2, 0], sizes = [1, 128], strides = [1, 1]} : vector<4x128xf32> to vector<1x128xf32>
    %59 = vector.broadcast %57 : vector<384x1xf32> to vector<384x128xf32>
    %60 = vector.broadcast %58 : vector<1x128xf32> to vector<384x128xf32>
    %61 = arith.mulf %59, %60 : vector<384x128xf32>
    %62 = arith.addf %56, %61 : vector<384x128xf32>
    %63 = vector.extract_strided_slice %45 {offsets = [0, 3], sizes = [384, 1], strides = [1, 1]} : vector<384x4xf32> to vector<384x1xf32>
    %64 = vector.extract_strided_slice %35 {offsets = [3, 0], sizes = [1, 128], strides = [1, 1]} : vector<4x128xf32> to vector<1x128xf32>
    %65 = vector.broadcast %63 : vector<384x1xf32> to vector<384x128xf32>
    %66 = vector.broadcast %64 : vector<1x128xf32> to vector<384x128xf32>
    %67 = arith.mulf %65, %66 : vector<384x128xf32>
    %68 = arith.addf %62, %67 : vector<384x128xf32>
    %69 = vector.extract_strided_slice %68 {offsets = [0, 0], sizes = [64, 128], strides = [1, 1]} : vector<384x128xf32> to vector<64x128xf32>
    %70 = vector.extract_strided_slice %68 {offsets = [64, 0], sizes = [64, 128], strides = [1, 1]} : vector<384x128xf32> to vector<64x128xf32>
    %71 = arith.maximumf %69, %70 : vector<64x128xf32>
    %72 = vector.extract_strided_slice %68 {offsets = [128, 0], sizes = [64, 128], strides = [1, 1]} : vector<384x128xf32> to vector<64x128xf32>
    %73 = arith.maximumf %71, %72 : vector<64x128xf32>
    %74 = vector.extract_strided_slice %68 {offsets = [192, 0], sizes = [64, 128], strides = [1, 1]} : vector<384x128xf32> to vector<64x128xf32>
    %75 = arith.maximumf %73, %74 : vector<64x128xf32>
    %76 = vector.extract_strided_slice %68 {offsets = [256, 0], sizes = [64, 128], strides = [1, 1]} : vector<384x128xf32> to vector<64x128xf32>
    %77 = arith.maximumf %75, %76 : vector<64x128xf32>
    %78 = vector.extract_strided_slice %68 {offsets = [320, 0], sizes = [64, 128], strides = [1, 1]} : vector<384x128xf32> to vector<64x128xf32>
    %79 = arith.maximumf %77, %78 : vector<64x128xf32>
    %80 = vector.broadcast %36 : vector<1x128xf32> to vector<64x128xf32>
    %81 = arith.addf %79, %80 : vector<64x128xf32>
    %cst_28 = arith.constant dense<0xFF800000> : vector<64xf32>
    %82 = vector.multi_reduction <maximumf>, %81, %cst_28 [1] : vector<64x128xf32> to vector<64xf32>
    %83 = vector.shape_cast %82 : vector<64xf32> to vector<64x1xf32>
    %84 = vector.broadcast %83 : vector<64x1xf32> to vector<64x128xf32>
    %85 = arith.subf %81, %84 : vector<64x128xf32>
    %86 = math.exp %85 : vector<64x128xf32>
    %cst_29 = arith.constant dense<0.000000e+00> : vector<64xf32>
    %87 = vector.multi_reduction <add>, %86, %cst_29 [1] : vector<64x128xf32> to vector<64xf32>
    %88 = vector.shape_cast %87 : vector<64xf32> to vector<64x1xf32>
    %89 = math.log %88 : vector<64x1xf32>
    %90 = arith.addf %89, %83 : vector<64x1xf32>
    %91 = vector.broadcast %90 : vector<64x1xf32> to vector<64x128xf32>
    %92 = arith.subf %81, %91 : vector<64x128xf32>
    %c0_30 = arith.constant 0 : index
    %c0_31 = arith.constant 0 : index
    %c0_32 = arith.constant 0 : index
    %93 = vector.load %arg11[%c0_30, %c0_31, %c0_32] : memref<1x64x128xf32, #tpu.memory_space<vmem>>, vector<1x64x128xf32>
    %94 = vector.shape_cast %93 : vector<1x64x128xf32> to vector<64x128xf32>
    %95 = vector.shape_cast %92 : vector<64x128xf32> to vector<1x64x128xf32>
    tpu.vector_store %arg11[%c0_30, %c0_31, %c0_32], %95 {strides = array<i32>} : memref<1x64x128xf32, #tpu.memory_space<vmem>>, vector<1x64x128xf32>,
    return
  }
  func.func @transform_0(%arg0: i32) -> (i32, i32, i32) {
    %c0_i32 = arith.constant 0 : i32
    %c0_i32_0 = arith.constant 0 : i32
    %c0_i32_1 = arith.constant 0 : i32
    return %arg0, %c0_i32, %c0_i32_0 : i32, i32, i32
  }
  func.func @transform_1(%arg0: i32) -> (i32, i32, i32) {
    %c0_i32 = arith.constant 0 : i32
    %c0_i32_0 = arith.constant 0 : i32
    %c0_i32_1 = arith.constant 0 : i32
    return %arg0, %c0_i32, %c0_i32_0 : i32, i32, i32
  }
  func.func @transform_2(%arg0: i32) -> (i32, i32) {
    %c0_i32 = arith.constant 0 : i32
    %c0_i32_0 = arith.constant 0 : i32
    %c0_i32_1 = arith.constant 0 : i32
    return %c0_i32, %c0_i32_0 : i32, i32
  }
  func.func @transform_3(%arg0: i32) -> (i32, i32) {
    %c0_i32 = arith.constant 0 : i32
    %c0_i32_0 = arith.constant 0 : i32
    %c0_i32_1 = arith.constant 0 : i32
    return %c0_i32, %c0_i32_0 : i32, i32
  }
  func.func @transform_4(%arg0: i32) -> (i32, i32) {
    %c0_i32 = arith.constant 0 : i32
    %c0_i32_0 = arith.constant 0 : i32
    %c0_i32_1 = arith.constant 0 : i32
    return %c0_i32, %c0_i32_0 : i32, i32
  }
  func.func @transform_5(%arg0: i32) -> (i32, i32) {
    %c0_i32 = arith.constant 0 : i32
    %c0_i32_0 = arith.constant 0 : i32
    %c0_i32_1 = arith.constant 0 : i32
    return %c0_i32, %c0_i32_0 : i32, i32
  }
  func.func @transform_6(%arg0: i32) -> (i32, i32) {
    %c0_i32 = arith.constant 0 : i32
    %c0_i32_0 = arith.constant 0 : i32
    %c0_i32_1 = arith.constant 0 : i32
    return %c0_i32, %c0_i32_0 : i32, i32
  }
  func.func @transform_7(%arg0: i32) -> (i32, i32) {
    %c0_i32 = arith.constant 0 : i32
    %c0_i32_0 = arith.constant 0 : i32
    %c0_i32_1 = arith.constant 0 : i32
    return %c0_i32, %c0_i32_0 : i32, i32
  }
  func.func @transform_8(%arg0: i32) -> (i32, i32) {
    %c0_i32 = arith.constant 0 : i32
    %c0_i32_0 = arith.constant 0 : i32
    %c0_i32_1 = arith.constant 0 : i32
    return %c0_i32, %c0_i32_0 : i32, i32
  }
  func.func @transform_9(%arg0: i32) -> (i32, i32) {
    %c0_i32 = arith.constant 0 : i32
    %c0_i32_0 = arith.constant 0 : i32
    %c0_i32_1 = arith.constant 0 : i32
    return %c0_i32, %c0_i32_0 : i32, i32
  }
  func.func @transform_10(%arg0: i32) -> (i32, i32, i32) {
    %c0_i32 = arith.constant 0 : i32
    %c0_i32_0 = arith.constant 0 : i32
    %c0_i32_1 = arith.constant 0 : i32
    return %arg0, %c0_i32, %c0_i32_0 : i32, i32, i32
  }
}

</mosaic_0001>

<bundles_post_ra>
// kernel: tpu_custom_call.1
= control target key start
LH: loop header
LB: loop body
LE: loop exit
PB: predicated region body
PF: predicated region fallthrough
CT: control target
= control target key end

     0   :  { %15 = vsyncpa [#allocation3], 0  ;;  %s6170_s0 = inlined_call_operand.hbm [shape: f32[2,384,128], index: 0, kind: input, shape index: {}]   ;;  %s6171_s1 = inlined_call_operand.vmem [shape: f32[2,64,3], index: 1, kind: input, shape index: {}]   ;;  %s6172_s2 = inlined_call_operand.vmem [shape: f32[3,32], index: 2, kind: input, shape index: {}]   ;;  %s6173_s3 = inlined_call_operand.vmem [shape: f32[1,16], index: 3, kind: input, shape index: {}]   ;;  %s6174_s4 = inlined_call_operand.vmem [shape: f32[16,16], index: 4, kind: input, shape index: {}]   ;;  %s6175_s5 = inlined_call_operand.vmem [shape: f32[1,16], index: 5, kind: input, shape index: {}]   ;;  %s6176_s6 = inlined_call_operand.vmem [shape: f32[16,8], index: 6, kind: input, shape index: {}]   ;;  %s6177_s7 = inlined_call_operand.vmem [shape: f32[1,4], index: 7, kind: input, shape index: {}]   ;;  %s6178_s8 = inlined_call_operand.vmem [shape: f32[4,128], index: 8, kind: input, shape index: {}]   ;;  %s6179_s9 = inlined_call_operand.vmem [shape: f32[1,128], index: 9, kind: input, shape index: {}]   ;;  %s6180_s10 = inlined_call_operand.hbm [shape: f32[2,64,128], index: 10, kind: output, shape index: {}]  }
   0x1   :  { %17 = vsyncpa [#allocation3 + $0x1], 0 }
   0x2   :  { %18 = vsyncpa [#allocation4], 0 }
   0x3   :  { %20 = vsyncpa [#allocation4 + $0x1], 0  ;;  %s4632_s13 = smov 0   ;;  %s4634_s14 = smov 0  }
   0x4   :  { %s4636_s15 = smov 0   ;;  %s4638_s16 = smov 0  }
   0x5 LB: > { %6205 = sst [smem:[#allocation8_spill]] %s4557_s15  ;;  %s4653_s17 = sadd.s32 4294967295, %s4561_s16   ;;  %s4561_s16 = sphi %s4638_s16, %s6403_s16   ;;  %s4557_s15 = sphi %s4636_s15, %s6405_s15   ;;  %s4553_s14 = sphi %s4634_s14, %s6407_s14   ;;  %s4549_s13 = sphi %s4632_s13, %s6406_s13  }
   0x6   : > { %s3458_s18 = sadd.s32 4294967294, %s4561_s16   ;;  %s4657_s19 = sadd.s32 1, %s4561_s16  }
   0x7   : > { %6206 = sst [smem:[#allocation9_spill]] %s4657_s19  ;;  %s33_s20 = sadd.s32 1, %s4557_s15 }
   0x8   : > { %s30_s21 = ssub.s32 %s4561_s16, %s4657_s19  ;;  %p40_p0 = scmp.ne.s32.totalorder %s4557_s15, %s4553_s14 }
   0x9   : > { %p31_p1 = scmp.eq.s32.totalorder %s30_s21, 0  ;;  %p41_p2 = scmp.eq.s32.totalorder %s4561_s16, 0 }
   0xa   : > { %p46_p3 = scmp.ne.s32.totalorder %s4553_s14, %s4549_s13  ;;  %p47_p4 = scmp.eq.s32.totalorder %s4653_s17, 0 }
   0xb   : > { %s4669_s22 = scalar_select %p31_p1, %s4557_s15, %s33_s20  }
   0xc   : > { %p42_p5 = por %p41_p2, %p40_p0  ;;  %p4671_p6 = por %p47_p4, %p46_p3 }
   0xd   : > { %6207 = sst [smem:[#allocation10_spill]] %s4669_s22  ;;  %p264_p7 = scmp.eq.s32.totalorder %s4653_s17, 1 }
   0xe   : > { %p270_p8 = scmp.eq.s32.totalorder %s3458_s18, 1  ;;  %p4156_p10 = scmp.lt.s32.totalorder %s4561_s16, 2 }
   0xf   : > { %p4678_p11 = por %p264_p7, %p40_p0  ;;  %s314_s26 = sand.u32 1, %s4557_s15  }
  0x10   : > { %p4682_p12 = por %p270_p8, %p46_p3  ;;  %s4142_s27 = smul.u32 6144, %s4561_s16 }
  0x11   : > { %s6209_s24 = scalar_select %p4678_p11, 1, 0 }
  0x12   : > { %s6210_s25 = scalar_select %p4682_p12, 1, 0 }
  0x13   : > { %s4141_s28 = smul.u32 384, %s314_s26  ;;  %s4691_s11 = scalar_lea.hbm %s6170_s0, %s4142_s27 }
  0x14   : > { %p4693_p13 = pnand %p4156_p10, %p42_p5  ;;  %s4699_s21 = scalar_lea.sflag [#allocation3], %s314_s26 }
  0x15   : > { %s318_s18 = scalar_lea.vmem [#allocation2], %s4141_s28  ;;  %s4465_s22 = scalar_lea.hbm %s4691_s11, 6144 }
  0x16   : > { %s325_s20 = sshll.u32 %s318_s18, 4  ;;  %p4466_p0 = scmp.ne.s32.totalorder %s4691_s11, %s4465_s22  ;;  %s4697_s20 = int_to_ptr.vmem [resolvable:$true] %s325_s20 }
  0x17   : > { %p4467_p1 = pneg %p4693_p13  ;;  %s4470_s30 = scalar_lea.hbm %s6170_s0, 12288 }
  0x18   : > { %p4471_p4 = scmp.lt.u32.totalorder %s4691_s11, %s6170_s0  ;;  %p4472_p5 = scmp.lt.u32.totalorder %s4470_s30, %s4465_s22 }
  0x19   : > { %p4468_p2 = pnand %p4467_p1, %p4466_p0  ;;  %p4474_p8 = scmp.lt.u32.totalorder %s4465_s22, %s4691_s11 }
  0x1a   : > { %p4473_p7 = por %p4472_p5, %p4471_p4 }
  0x1b   : > { %p4469_p3 = pneg %p4468_p2 }
  0x1c   : > { %p4475_p10 = por %p4474_p8, %p4473_p7 }
  0x1e   : > { %p4476_p9 = pnand %p4475_p10, %p4469_p3 }
  0x20   : > { %4479 = shalt.err (!%p4476_p9)
}
  0x21   : > { %s4480_s26 = scalar_lea.vmem %s4697_s20, 6144  ;;  %s4563_s28 = smov [#allocation2]  }
  0x22   : > { %p4481_p0 = scmp.ne.s32.totalorder %s4697_s20, %s4480_s26  ;;  %s4485_s18 = sshll.u32 %s4563_s28, 4  ;;  %s4486_s18 = int_to_ptr.vmem [resolvable:$false] %s4485_s18 }
  0x23   : > { %s4487_s15 = scalar_lea.vmem %s4486_s18, 12288  ;;  %p4488_p11 = scmp.lt.s32.totalorder %s4697_s20, %s4486_s18 }
  0x24   : > { %p4483_p2 = pnand %p4481_p0, %p4467_p1  ;;  %p4489_p4 = scmp.lt.s32.totalorder %s4487_s15, %s4480_s26 }
  0x26   : > { %p4484_p12 = pneg %p4483_p2  ;;  %p4490_p5 = por %p4489_p4, %p4488_p11 }
  0x28   : > { %p4491_p7 = pnand %p4490_p5, %p4484_p12 }
  0x2a   : > { %4494 = shalt.err (!%p4491_p7)
}
  0x2b   : > { %s4564_s19 = smov 128   ;;  %s4565_s22 = smov 8  }
  0x2c   : > { %4151 = dma.hbm_to_vmem [thread:$0]  (!%p4693_p13), %s4691_s11, 6144, %s4697_s20, %s4699_s21, %s4564_s19, %s4564_s19, %s4565_s22  }
  0x2d   : > { %p3462_p9 = scmp.ge.s32.totalorder %s4561_s16, 1  ;;  %p341_p1 = scmp.lt.s32.totalorder %s4561_s16, 3 }
  0x2f   : > { %p342_p3 = pnand %p3462_p9, %p341_p1 }
  0x31   : > { %345 = sbr.rel (%p342_p3) target bundleno = 2459 (0x99b), region = 60 }
  0x38   : > { %s4730_s27 = sand.u32 1, %s4553_s14  }
  0x39   : > { %s4143_s29 = smul.u32 384, %s4730_s27  ;;  %s348_s30 = scalar_lea.sflag [#allocation3], %s4730_s27 }
  0x3b   : > { %s4734_s26 = scalar_lea.vmem [#allocation2], %s4143_s29 }
  0x3c   : > { %4540 = dma.done.wait (%p4671_p6), %s348_s30, 6144  }
  0x3d   : > { %4542 = vsyncadd (%p4671_p6), %s348_s30, 4294961152  ;;  %p393_p11 = scmp.lt.s32.totalorder %s4653_s17, 1  ;;  %vm484_vm0 = vcmask 1042432   ;;  %vm459_vm1 = vcmask 23552   ;;  %v454_v0 = vld [vmem:[%s6172_s2] sm:$0x7] }
  0x3e   : > { %3739 = vmatprep.subr.msk.mxu0 %vm484_vm0, %v454_v0  ;;  %v3475_v4 = vld [vmem:[%s6173_s3] ss:$0 sm:$0xff]  ;;  %s4566_s22 = smov 16   ;;  %s4567_s29 = smov 112   ;;  %v4768_v36 = vld [vmem:[%s4734_s26 + $0x90] sm:$0xff]  ;;  %v457_v51 = vld [vmem:[%s6174_s4 + $0x8] sm:$0xff] }
  0x3f   : > { %s394_s11 = scalar_select %p393_p11, %s4653_s17, 1  ;;  %3740 = vmatpush3.msk.msra.mxu0 %vm484_vm0, %v454_v0  ;;  %598 = vrot.lane.b32.xlu0 %v3475_v4, %s4566_s22  ;;  %v4762_v28 = vld [vmem:[%s4734_s26] sm:$0xff]  ;;  %v4778_v56 = vld [vmem:[%s4734_s26 + $0x8] sm:$0xff]  ;;  %v4781_v57 = vld [vmem:[%s4734_s26 + $0x98] sm:$0xff]  ;;  %vm994_vm2 = vcmask 130048  }
  0x40   : > { %3812 = vmatprep.mubr.f32.mxu1 %v4768_v36  ;;  %v456_v50 = vld [vmem:[%s6174_s4] sm:$0xff]  ;;  %v4784_v58 = vld [vmem:[%s4734_s26 + $0x10] sm:$0xff]  ;;  %v4793_v60 = vld [vmem:[%s4734_s26 + $0x18] sm:$0xff]  ;;  %s4568_s19 = smov 4   ;;  %s4569_s30 = smov 124  }
  0x41   : > { %s3540_s12 = sshll.u32 %s394_s11, 6  ;;  %v4085_v55 = vpack.c.bf16 %v457_v51, %v456_v50  ;;  %v4787_v59 = vld [vmem:[%s4734_s26 + $0xa0] sm:$0xff]  ;;  %v4797_v61 = vld [vmem:[%s4734_s26 + $0xa8] sm:$0xff]  ;;  %v4803_v63 = vld [vmem:[%s4734_s26 + $0xb0] sm:$0xff]  ;;  %s3463_s21 = sshll.u32 %s4730_s27, 6 }
  0x42   : > { %s397_s28 = scalar_lea.vmem %s6171_s1, %s3540_s12  ;;  %v4800_v62 = vld [vmem:[%s4734_s26 + $0x20] sm:$0xff]  ;;  %v4809_v0 = vld [vmem:[%s4734_s26 + $0x28] sm:$0xff]  ;;  %v4825_v4 = vld [vmem:[%s4734_s26 + $0x38] sm:$0xff]  ;;  %s3541_s18 = sshll.u32 %s4653_s17, 10 }
  0x43   : > { %v446_v1 = vld [vmem:[%s397_s28] sm:$0xff]  ;;  %v447_v2 = vld [vmem:[%s397_s28 + $0x8] sm:$0xff]  ;;  %v448_v3 = vld [vmem:[%s397_s28 + $0x10] sm:$0xff]  ;;  %s6122_s22 = scalar_lea.hbm %s6180_s10, %s3541_s18  ;;  %s3360_s17 = scalar_lea.sflag [#allocation4], %s4730_s27 }
  0x44   : > { %3741 = vmatprep.mubr.msk.f32.mxu0 %vm459_vm1, %v446_v1  ;;  %v449_v5 = vld [vmem:[%s397_s28 + $0x18] sm:$0xff]  ;;  %v450_v6 = vld [vmem:[%s397_s28 + $0x20] sm:$0xff]  ;;  %v451_v7 = vld [vmem:[%s397_s28 + $0x28] sm:$0xff]  ;;  %p6400_p12 = scmp.ne.s32.totalorder %s6209_s24, 0 }
  0x45   : > { %3742 = vmatmul.mubr.msk.f32.vlgmr.msra.gmra.mrb[0].mxu0 %vm459_vm1, %v447_v2  ;;  %v452_v8 = vld [vmem:[%s397_s28 + $0x30] sm:$0xff]  ;;  %v453_v9 = vld [vmem:[%s397_s28 + $0x38] sm:$0xff]  ;;  %s6100_s28 = scalar_lea.vmem [#allocation5], %s3463_s21 }
  0x46   : > { %3744 = vmatprep.mubr.msk.f32.mxu0 %vm459_vm1, %v448_v3  ;;  %v4813_v1 = vld [vmem:[%s4734_s26 + $0xb8] sm:$0xff]  ;;  %v4816_v2 = vld [vmem:[%s4734_s26 + $0x30] sm:$0xff]  ;;  %v4819_v3 = vld [vmem:[%s4734_s26 + $0xc0] sm:$0xff]  ;;  %s3373_s15 = sshll.u32 %s6100_s28, 4  ;;  %s6124_s15 = int_to_ptr.vmem [resolvable:$true] %s3373_s15 }
  0x49   : > { %3745 = vmatmul.mubr.msk.f32.gmra.mrb[2].mxu0 %vm459_vm1, %v449_v5  ;;  %v4829_v5 = vld [vmem:[%s4734_s26 + $0xc8] sm:$0xff] }
  0x4a   : > { %3747 = vmatprep.mubr.msk.f32.mxu0 %vm459_vm1, %v450_v6  ;;  %v4832_v6 = vld [vmem:[%s4734_s26 + $0x40] sm:$0xff] }
  0x4d   : > { %3748 = vmatmul.mubr.msk.f32.gmra.mrb[4].mxu0 %vm459_vm1, %v451_v7  ;;  %v4835_v7 = vld [vmem:[%s4734_s26 + $0xd0] sm:$0xff] }
  0x4e   : > { %3750 = vmatprep.mubr.msk.f32.mxu0 %vm459_vm1, %v452_v8  ;;  %v4841_v8 = vld [vmem:[%s4734_s26 + $0x48] sm:$0xff] }
  0x51   : > { %3751 = vmatmul.mubr.msk.f32.gmra.mrb[6].mxu0 %vm459_vm1, %v453_v9  ;;  %v4845_v9 = vld [vmem:[%s4734_s26 + $0xd8] sm:$0xff] }
  0x52   : > { %3785 = vmatprep.mubr.f32.mxu0 %v4762_v28 }
  0xb1   : > { %v599_v10 = vpop.permute.xlu0 %598 }
 0x118   : > { %v3743_v11 = vpop.f32.mrb[0].mxu0 }
 0x119   : > { %v602_v12 = vadd.f32 %v3743_v11, %v599_v10  ;;  %v554_v13 = vpop.f32.mrb[1].mxu0 }
 0x11a   : > { %v601_v14 = vadd.f32 %v599_v10, %v554_v13  ;;  %v4053_v15 = vpack.c.bf16 %v3743_v11, %v554_v13  ;;  %v4851_v11 = vld [vmem:[%s4734_s26 + $0xe0] sm:$0xff]  ;;  %v4861_v13 = vld [vmem:[%s4734_s26 + $0xe8] sm:$0xff] }
 0x11c   : > { %v4202_v16 = vpack.i.bf16 %v602_v12, %v601_v14  ;;  %v3746_v17 = vpop.f32.mrb[2].mxu0  ;;  %4054 = vmatprep.subr.bf16.mxu0 %v4053_v15  ;;  %4125 = vmatprep.subr.bf16.mxu1 %v4053_v15  ;;  %v4857_v12 = vld [vmem:[%s4734_s26 + $0x58] sm:$0xff]  ;;  %v4864_v14 = vld [vmem:[%s4734_s26 + $0x60] sm:$0xff] }
 0x11d   : > { %v604_v18 = vadd.f32 %v3746_v17, %v599_v10  ;;  %v564_v19 = vpop.f32.mrb[3].mxu0  ;;  %4056 = vmatpush3.bf16.msra.mxu0 %v4053_v15  ;;  %4133 = vmatpush3.bf16.msra.mxu1 %v4053_v15  ;;  %v4867_v15 = vld [vmem:[%s4734_s26 + $0xf0] sm:$0xff] }
 0x11e   : > { %v603_v20 = vadd.f32 %v599_v10, %v564_v19  ;;  %v4057_v21 = vpack.c.bf16 %v3746_v17, %v564_v19  ;;  %4203 = vrot.lane.b32.xlu0 %v4202_v16, %s4567_s29  ;;  %v4873_v16 = vld [vmem:[%s4734_s26 + $0x68] sm:$0xff]  ;;  %v4877_v17 = vld [vmem:[%s4734_s26 + $0xf8] sm:$0xff]  ;;  %v4883_v19 = vld [vmem:[%s4734_s26 + $0x100] sm:$0xff] }
 0x120   : > { %v3749_v22 = vpop.f32.mrb[4].mxu0  ;;  %4058 = vmatprep.subr.bf16.mxu0 %v4057_v21  ;;  %4126 = vmatprep.subr.bf16.mxu1 %v4057_v21  ;;  %v4207_v23 = vpack.i.bf16 %v604_v18, %v603_v20  ;;  %v4880_v18 = vld [vmem:[%s4734_s26 + $0x70] sm:$0xff]  ;;  %v4889_v20 = vld [vmem:[%s4734_s26 + $0x78] sm:$0xff] }
 0x121   : > { %v606_v24 = vadd.f32 %v3749_v22, %v599_v10  ;;  %v574_v25 = vpop.f32.mrb[5].mxu0  ;;  %4060 = vmatpush3.bf16.msra.mxu0 %v4057_v21  ;;  %4134 = vmatpush3.bf16.msra.mxu1 %v4057_v21  ;;  %v4893_v21 = vld [vmem:[%s4734_s26 + $0x108] sm:$0xff] }
 0x122   : > { %v605_v26 = vadd.f32 %v599_v10, %v574_v25  ;;  %v4061_v27 = vpack.c.bf16 %v3749_v22, %v574_v25  ;;  %4208 = vrot.lane.b32.xlu1 %v4207_v23, %s4567_s29  ;;  %v4896_v22 = vld [vmem:[%s4734_s26 + $0x80] sm:$0xff]  ;;  %v4899_v23 = vld [vmem:[%s4734_s26 + $0x110] sm:$0xff]  ;;  %v4909_v25 = vld [vmem:[%s4734_s26 + $0x118] sm:$0xff] }
 0x124   : > { %v4212_v29 = vpack.i.bf16 %v606_v24, %v605_v26  ;;  %v3752_v30 = vpop.f32.mrb[6].mxu0  ;;  %4062 = vmatprep.subr.bf16.mxu0 %v4061_v27  ;;  %4127 = vmatprep.subr.bf16.mxu1 %v4061_v27  ;;  %v4905_v24 = vld [vmem:[%s4734_s26 + $0x88] sm:$0xff]  ;;  %v4912_v26 = vld [vmem:[%s4734_s26 + $0x120] sm:$0xff] }
 0x125   : > { %v608_v31 = vadd.f32 %v3752_v30, %v599_v10  ;;  %v584_v32 = vpop.f32.mrb[7].mxu0  ;;  %4064 = vmatpush3.bf16.msra.mxu0 %v4061_v27  ;;  %4135 = vmatpush3.bf16.msra.mxu1 %v4061_v27  ;;  %6212 = vst [vmem:[#allocation11_spill] sm:$0xff] %v4912_v26  ;;  %v4918_v27 = vld [vmem:[%s4734_s26 + $0x128] sm:$0xff] }
 0x126   : > { %v607_v33 = vadd.f32 %v599_v10, %v584_v32  ;;  %v4065_v34 = vpack.c.bf16 %v3752_v30, %v584_v32  ;;  %4213 = vrot.lane.b32.xlu1 %v4212_v29, %s4567_s29  ;;  %v4848_v10 = vld [vmem:[%s4734_s26 + $0x50] sm:$0xff]  ;;  %6213 = vst [vmem:[#allocation12_spill] sm:$0xff] %v4918_v27  ;;  %v4926_v30 = vld [vmem:[%s4734_s26 + $0x138] sm:$0xff]  ;;  %v4934_v32 = vld [vmem:[%s4734_s26 + $0x148] sm:$0xff] }
 0x127   : > { %v4921_v29 = vld [vmem:[%s4734_s26 + $0x130] sm:$0xff]  ;;  %6215 = vst [vmem:[#allocation14_spill] sm:$0xff] %v4926_v30  ;;  %6217 = vst [vmem:[#allocation16_spill] sm:$0xff] %v4934_v32 }
 0x128   : > { %v4217_v35 = vpack.i.bf16 %v608_v31, %v607_v33  ;;  %4066 = vmatprep.subr.bf16.mxu0 %v4065_v34  ;;  %4128 = vmatprep.subr.bf16.mxu1 %v4065_v34  ;;  %6214 = vst [vmem:[#allocation13_spill] sm:$0xff] %v4921_v29  ;;  %v4929_v31 = vld [vmem:[%s4734_s26 + $0x140] sm:$0xff]  ;;  %v4937_v33 = vld [vmem:[%s4734_s26 + $0x150] sm:$0xff] }
 0x129   : > { %4068 = vmatpush3.bf16.msra.mxu0 %v4065_v34  ;;  %4136 = vmatpush3.bf16.msra.mxu1 %v4065_v34  ;;  %6216 = vst [vmem:[#allocation15_spill] sm:$0xff] %v4929_v31  ;;  %6218 = vst [vmem:[#allocation17_spill] sm:$0xff] %v4937_v33  ;;  %v4942_v34 = vld [vmem:[%s4734_s26 + $0x158] sm:$0xff] }
 0x12a   : > { %4218 = vrot.lane.b32.xlu0 %v4217_v35, %s4567_s29  ;;  %6219 = vst [vmem:[#allocation18_spill] sm:$0xff] %v4942_v34  ;;  %v4945_v35 = vld [vmem:[%s4734_s26 + $0x160] sm:$0xff]  ;;  %s4495_s29 = scalar_lea.vmem %s6124_s15, 1024 }
 0x12b   : > { %6220 = vst [vmem:[#allocation19_spill] sm:$0xff] %v4945_v35  ;;  %p4496_p6 = scmp.ne.s32.totalorder %s6124_s15, %s4495_s29 }
 0x12d   : > { %p4497_p13 = pnand %p4496_p6, %p6400_p12 }
 0x12f   : > { %p4498_p8 = pneg %p4497_p13 }
 0x190   : > { %v4204_v37 = vpop.permute.xlu0 %4203 }
 0x191   : > { %v4206_v38 = vunpack.i.h.bf16 %v4204_v37  ;;  %v4205_v39 = vunpack.i.l.bf16 %v4204_v37  ;;  %v4950_v37 = vld [vmem:[%s4734_s26 + $0x168] sm:$0xff] }
 0x192   : > { %6221 = vst [vmem:[#allocation20_spill] sm:$0xff] %v4950_v37 }
 0x193   : > { %v4069_v40 = vpack.c.bf16 %v4206_v38, %v4205_v39  ;;  %v4953_v38 = vld [vmem:[%s4734_s26 + $0x170] sm:$0xff]  ;;  %v4958_v39 = vld [vmem:[%s4734_s26 + $0x178] sm:$0xff] }
 0x194   : > { %v4209_v41 = vpop.permute.xlu1 %4208  ;;  %6222 = vst [vmem:[#allocation21_spill] sm:$0xff] %v4953_v38  ;;  %6223 = vst [vmem:[#allocation22_spill] sm:$0xff] %v4958_v39 }
 0x195   : > { %v4211_v42 = vunpack.i.h.bf16 %v4209_v41  ;;  %v4210_v43 = vunpack.i.l.bf16 %v4209_v41  ;;  %4070 = vmatprep.subr.bf16.mxu0 %v4069_v40  ;;  %4129 = vmatprep.subr.bf16.mxu1 %v4069_v40 }
 0x196   : > { %4072 = vmatpush3.bf16.msra.mxu0 %v4069_v40  ;;  %4137 = vmatpush3.bf16.msra.mxu1 %v4069_v40 }
 0x197   : > { %v4073_v44 = vpack.c.bf16 %v4211_v42, %v4210_v43 }
 0x198   : > { %v4214_v45 = vpop.permute.xlu1 %4213 }
 0x199   : > { %v4216_v46 = vunpack.i.h.bf16 %v4214_v45  ;;  %v4215_v47 = vunpack.i.l.bf16 %v4214_v45  ;;  %4074 = vmatprep.subr.bf16.mxu0 %v4073_v44  ;;  %4130 = vmatprep.subr.bf16.mxu1 %v4073_v44 }
 0x19a   : > { %4076 = vmatpush3.bf16.msra.mxu0 %v4073_v44  ;;  %4138 = vmatpush3.bf16.msra.mxu1 %v4073_v44 }
 0x19b   : > { %v4077_v48 = vpack.c.bf16 %v4216_v46, %v4215_v47 }
 0x19c   : > { %v4219_v49 = vpop.permute.xlu0 %4218 }
 0x19d   : > { %v4221_v52 = vunpack.i.h.bf16 %v4219_v49  ;;  %v4220_v53 = vunpack.i.l.bf16 %v4219_v49  ;;  %4078 = vmatprep.subr.bf16.mxu0 %v4077_v48  ;;  %4131 = vmatprep.subr.bf16.mxu1 %v4077_v48 }
 0x19e   : > { %4080 = vmatpush3.bf16.msra.mxu0 %v4077_v48  ;;  %4139 = vmatpush3.bf16.msra.mxu1 %v4077_v48 }
 0x19f   : > { %v4081_v54 = vpack.c.bf16 %v4221_v52, %v4220_v53 }
 0x1a1   : > { %4082 = vmatprep.subr.bf16.mxu0 %v4081_v54  ;;  %4132 = vmatprep.subr.bf16.mxu1 %v4081_v54 }
 0x1a2   : > { %4084 = vmatpush3.bf16.msra.mxu0 %v4081_v54  ;;  %4140 = vmatpush3.bf16.msra.mxu1 %v4081_v54 }
 0x1a3   : > { %4086 = vmatprep.subr.bf16.mxu0 %v4085_v55 }
 0x1a5   : > { %3786 = vmatmul.mubr.f32.vlgmr.msra.gmra.mrb[8].mxu0 %v4778_v56  ;;  %3813 = vmatmul.mubr.f32.vlgmr.msra.gmra.mrb[0].mxu1 %v4781_v57 }
 0x1a6   : > { %3788 = vmatprep.mubr.f32.mxu0 %v4784_v58  ;;  %3815 = vmatprep.mubr.f32.mxu1 %v4787_v59 }
 0x1a7   : > { %4088 = vmatpush3.bf16.msra.mxu0 %v4085_v55 }
 0x1a9   : > { %3789 = vmatmul.mubr.f32.gmra.mrb[10].mxu0 %v4793_v60  ;;  %3816 = vmatmul.mubr.f32.gmra.mrb[2].mxu1 %v4797_v61 }
 0x1aa   : > { %3791 = vmatprep.mubr.f32.mxu0 %v4800_v62  ;;  %3818 = vmatprep.mubr.f32.mxu1 %v4803_v63 }
 0x1ad   : > { %3792 = vmatmul.mubr.f32.gmra.mrb[12].mxu0 %v4809_v0  ;;  %3819 = vmatmul.mubr.f32.gmra.mrb[4].mxu1 %v4813_v1 }
 0x1ae   : > { %3794 = vmatprep.mubr.f32.mxu0 %v4816_v2  ;;  %3821 = vmatprep.mubr.f32.mxu1 %v4819_v3 }
 0x1b1   : > { %3795 = vmatmul.mubr.f32.gmra.mrb[14].mxu0 %v4825_v4  ;;  %3822 = vmatmul.mubr.f32.gmra.mrb[6].mxu1 %v4829_v5 }
 0x1b2   : > { %3797 = vmatprep.mubr.f32.mxu0 %v4832_v6  ;;  %3824 = vmatprep.mubr.f32.mxu1 %v4835_v7 }
 0x1b5   : > { %3798 = vmatmul.mubr.f32.gmra.mrb[16].mxu0 %v4841_v8  ;;  %3825 = vmatmul.mubr.f32.gmra.mrb[8].mxu1 %v4845_v9 }
 0x1b6   : > { %3800 = vmatprep.mubr.f32.mxu0 %v4848_v10  ;;  %3827 = vmatprep.mubr.f32.mxu1 %v4851_v11 }
 0x1b9   : > { %3801 = vmatmul.mubr.f32.gmra.mrb[18].mxu0 %v4857_v12  ;;  %3828 = vmatmul.mubr.f32.gmra.mrb[10].mxu1 %v4861_v13 }
 0x1ba   : > { %3803 = vmatprep.mubr.f32.mxu0 %v4864_v14  ;;  %3830 = vmatprep.mubr.f32.mxu1 %v4867_v15 }
 0x1bd   : > { %3804 = vmatmul.mubr.f32.gmra.mrb[20].mxu0 %v4873_v16  ;;  %3831 = vmatmul.mubr.f32.gmra.mrb[12].mxu1 %v4877_v17 }
 0x1be   : > { %3806 = vmatprep.mubr.f32.mxu0 %v4880_v18  ;;  %3833 = vmatprep.mubr.f32.mxu1 %v4883_v19 }
 0x1c1   : > { %3807 = vmatmul.mubr.f32.gmra.mrb[22].mxu0 %v4889_v20  ;;  %3834 = vmatmul.mubr.f32.gmra.mrb[14].mxu1 %v4893_v21 }
 0x1c2   : > { %3809 = vmatprep.mubr.f32.mxu0 %v4896_v22  ;;  %3836 = vmatprep.mubr.f32.mxu1 %v4899_v23 }
 0x1c5   : > { %3810 = vmatmul.mubr.f32.gmra.mrb[24].mxu0 %v4905_v24  ;;  %3837 = vmatmul.mubr.f32.gmra.mrb[16].mxu1 %v4909_v25 }
 0x1c6   : > { %3839 = vmatprep.mubr.f32.mxu1 %v4912_v26 }
 0x1c9   : > { %3840 = vmatmul.mubr.f32.gmra.mrb[18].mxu1 %v4918_v27 }
 0x1ca   : > { %3842 = vmatprep.mubr.f32.mxu1 %v4921_v29 }
 0x1cd   : > { %3843 = vmatmul.mubr.f32.gmra.mrb[20].mxu1 %v4926_v30 }
 0x1ce   : > { %3845 = vmatprep.mubr.f32.mxu1 %v4929_v31 }
 0x1d1   : > { %3846 = vmatmul.mubr.f32.gmra.mrb[22].mxu1 %v4934_v32 }
 0x1d2   : > { %3848 = vmatprep.mubr.f32.mxu1 %v4937_v33 }
 0x1d5   : > { %3849 = vmatmul.mubr.f32.gmra.mrb[24].mxu1 %v4942_v34 }
 0x1d6   : > { %3851 = vmatprep.mubr.f32.mxu1 %v4945_v35 }
 0x1d9   : > { %3852 = vmatmul.mubr.f32.gmra.mrb[26].mxu1 %v4950_v37 }
 0x1da   : > { %3854 = vmatprep.mubr.f32.mxu1 %v4953_v38 }
 0x1dd   : > { %3855 = vmatmul.mubr.f32.gmra.mrb[28].mxu1 %v4958_v39 }
 0x1de   : > { %3981 = vmatprep.mubr.f32.mxu1 %v4762_v28 }
 0x278   : > { %v3787_v40 = vpop.f32.mrb[8].mxu0  ;;  %v4962_v41 = vpop.f32.mrb[0].mxu1 }
 0x279   : > { %v707_v42 = vpop.f32.mrb[9].mxu0  ;;  %v4964_v43 = vpop.f32.mrb[1].mxu1  ;;  %v947_v45 = vmax.f32 %v3787_v40, 0.0 }
 0x27a   : > { %v946_v44 = vmax.f32 %v707_v42, 0.0 }
 0x27c   : > { %v3790_v46 = vpop.f32.mrb[10].mxu0  ;;  %3861 = vmatprep.mubr.msk.f32.mxu0 %vm994_vm2, %v946_v44  ;;  %v4967_v47 = vpop.f32.mrb[2].mxu1 }
 0x27d   : > { %v717_v48 = vpop.f32.mrb[11].mxu0  ;;  %3862 = vmatmul.mubr.msk.f32.vlgmr.msra.gmra.mrb[26].mxu0 %vm994_vm2, %v947_v45  ;;  %v4970_v49 = vpop.f32.mrb[3].mxu1  ;;  %v949_v50 = vmax.f32 %v3790_v46, 0.0 }
 0x27e   : > { %v948_v28 = vmax.f32 %v717_v48, 0.0 }
 0x280   : > { %v3793_v51 = vpop.f32.mrb[12].mxu0  ;;  %3864 = vmatprep.mubr.msk.f32.mxu0 %vm994_vm2, %v948_v28  ;;  %v4973_v52 = vpop.f32.mrb[4].mxu1 }
 0x281   : > { %v727_v53 = vpop.f32.mrb[13].mxu0  ;;  %3865 = vmatmul.mubr.msk.f32.gmra.mrb[28].mxu0 %vm994_vm2, %v949_v50  ;;  %v4976_v54 = vpop.f32.mrb[5].mxu1  ;;  %v951_v40 = vmax.f32 %v3793_v51, 0.0 }
 0x282   : > { %v950_v55 = vmax.f32 %v727_v53, 0.0 }
 0x284   : > { %v3796_v42 = vpop.f32.mrb[14].mxu0  ;;  %3867 = vmatprep.mubr.msk.f32.mxu0 %vm994_vm2, %v950_v55  ;;  %v4979_v44 = vpop.f32.mrb[6].mxu1 }
 0x285   : > { %v737_v45 = vpop.f32.mrb[15].mxu0  ;;  %3868 = vmatmul.mubr.msk.f32.gmra.mrb[30].mxu0 %vm994_vm2, %v951_v40  ;;  %v4982_v46 = vpop.f32.mrb[7].mxu1  ;;  %v953_v28 = vmax.f32 %v3796_v42, 0.0 }
 0x286   : > { %v952_v48 = vmax.f32 %v737_v45, 0.0 }
 0x288   : > { %v3799_v39 = vpop.f32.mrb[16].mxu0  ;;  %3870 = vmatprep.mubr.msk.f32.mxu0 %vm994_vm2, %v952_v48  ;;  %v4985_v50 = vpop.f32.mrb[8].mxu1 }
 0x289   : > { %v747_v38 = vpop.f32.mrb[17].mxu0  ;;  %3871 = vmatmul.mubr.msk.f32.gmra.mrb[32].mxu0 %vm994_vm2, %v953_v28  ;;  %v4988_v51 = vpop.f32.mrb[9].mxu1  ;;  %v955_v55 = vmax.f32 %v3799_v39, 0.0 }
 0x28a   : > { %v954_v53 = vmax.f32 %v747_v38, 0.0 }
 0x28c   : > { %v3802_v37 = vpop.f32.mrb[18].mxu0  ;;  %3873 = vmatprep.mubr.msk.f32.mxu0 %vm994_vm2, %v954_v53  ;;  %v4991_v40 = vpop.f32.mrb[10].mxu1 }
 0x28d   : > { %v757_v35 = vpop.f32.mrb[19].mxu0  ;;  %3874 = vmatmul.mubr.msk.f32.gmra.mrb[34].mxu0 %vm994_vm2, %v955_v55  ;;  %v4994_v42 = vpop.f32.mrb[11].mxu1  ;;  %v957_v48 = vmax.f32 %v3802_v37, 0.0 }
 0x28e   : > { %v956_v45 = vmax.f32 %v757_v35, 0.0 }
 0x290   : > { %v3805_v34 = vpop.f32.mrb[20].mxu0  ;;  %3876 = vmatprep.mubr.msk.f32.mxu0 %vm994_vm2, %v956_v45  ;;  %v4997_v28 = vpop.f32.mrb[12].mxu1 }
 0x291   : > { %v767_v33 = vpop.f32.mrb[21].mxu0  ;;  %3877 = vmatmul.mubr.msk.f32.gmra.mrb[36].mxu0 %vm994_vm2, %v957_v48  ;;  %v857_v38 = vpop.f32.mrb[13].mxu1  ;;  %v959_v53 = vmax.f32 %v3805_v34, 0.0  ;;  %v964_v34 = vmax.f32 %v4964_v43, 0.0 }
 0x292   : > { %v958_v39 = vmax.f32 %v767_v33, 0.0 }
 0x294   : > { %v3808_v32 = vpop.f32.mrb[22].mxu0  ;;  %3879 = vmatprep.mubr.msk.f32.mxu0 %vm994_vm2, %v958_v39  ;;  %v3835_v31 = vpop.f32.mrb[14].mxu1 }
 0x295   : > { %v777_v55 = vpop.f32.mrb[23].mxu0  ;;  %3880 = vmatmul.mubr.msk.f32.gmra.mrb[38].mxu0 %vm994_vm2, %v959_v53  ;;  %v867_v35 = vpop.f32.mrb[15].mxu1  ;;  %v961_v30 = vmax.f32 %v3808_v32, 0.0  ;;  %v966_v32 = vmax.f32 %v4970_v49, 0.0  ;;  %v970_v49 = vmax.f32 %v4982_v46, 0.0  ;;  %v974_v46 = vmax.f32 %v4994_v42, 0.0 }
 0x296   : > { %v960_v37 = vmax.f32 %v777_v55, 0.0  ;;  %v965_v55 = vmax.f32 %v4962_v41, 0.0  ;;  %v969_v41 = vmax.f32 %v4973_v52, 0.0  ;;  %v973_v52 = vmax.f32 %v4985_v50, 0.0 }
 0x297   : > { %v979_v42 = vmax.f32 %v3835_v31, 0.0 }
 0x298   : > { %v3811_v29 = vpop.f32.mrb[24].mxu0  ;;  %3882 = vmatprep.mubr.msk.f32.mxu0 %vm994_vm2, %v960_v37  ;;  %v3838_v45 = vpop.f32.mrb[16].mxu1 }
 0x299   : > { %v787_v27 = vpop.f32.mrb[25].mxu0  ;;  %3883 = vmatmul.mubr.msk.f32.gmra.mrb[40].mxu0 %vm994_vm2, %v961_v30  ;;  %v877_v48 = vpop.f32.mrb[17].mxu1  ;;  %v963_v26 = vmax.f32 %v3811_v29, 0.0  ;;  %v967_v29 = vmax.f32 %v4967_v47, 0.0  ;;  %v971_v47 = vmax.f32 %v4979_v44, 0.0  ;;  %v978_v44 = vmax.f32 %v867_v35, 0.0 }
 0x29a   : > { %v962_v33 = vmax.f32 %v787_v27, 0.0  ;;  %v968_v27 = vmax.f32 %v4976_v54, 0.0  ;;  %v972_v54 = vmax.f32 %v4988_v51, 0.0  ;;  %v975_v51 = vmax.f32 %v4991_v40, 0.0 }
 0x29b   : > { %v980_v50 = vmax.f32 %v877_v48, 0.0 }
 0x29c   : > { %3885 = vmatprep.mubr.msk.f32.mxu0 %vm994_vm2, %v962_v33  ;;  %v3841_v39 = vpop.f32.mrb[18].mxu1 }
 0x29d   : > { %3886 = vmatmul.mubr.msk.f32.gmra.mrb[42].mxu0 %vm994_vm2, %v963_v26  ;;  %v887_v53 = vpop.f32.mrb[19].mxu1  ;;  %v983_v35 = vmax.f32 %v3841_v39, 0.0 }
 0x29e   : > { %3888 = vmatprep.mubr.msk.f32.mxu0 %vm994_vm2, %v964_v34 }
 0x2a0   : > { %v3844_v37 = vpop.f32.mrb[20].mxu1 }
 0x2a1   : > { %3889 = vmatmul.mubr.msk.f32.gmra.mrb[44].mxu0 %vm994_vm2, %v965_v55  ;;  %v897_v30 = vpop.f32.mrb[21].mxu1 }
 0x2a2   : > { %3891 = vmatprep.mubr.msk.f32.mxu0 %vm994_vm2, %v966_v32  ;;  %v984_v40 = vmax.f32 %v897_v30, 0.0 }
 0x2a4   : > { %v3847_v43 = vpop.f32.mrb[22].mxu1 }
 0x2a5   : > { %3892 = vmatmul.mubr.msk.f32.gmra.mrb[46].mxu0 %vm994_vm2, %v967_v29  ;;  %v907_v26 = vpop.f32.mrb[23].mxu1  ;;  %v987_v48 = vmax.f32 %v3847_v43, 0.0  ;;  %v1507_v43 = vld [vmem:[%s6176_s6 + $0x8] sm:$0xff] }
 0x2a6   : > { %3894 = vmatprep.mubr.msk.f32.mxu0 %vm994_vm2, %v968_v27 }
 0x2a8   : > { %v3850_v33 = vpop.f32.mrb[24].mxu1 }
 0x2a9   : > { %3895 = vmatmul.mubr.msk.f32.gmra.mrb[48].mxu0 %vm994_vm2, %v969_v41  ;;  %v917_v34 = vpop.f32.mrb[25].mxu1  ;;  %v977_v41 = vmax.f32 %v4997_v28, 0.0  ;;  %v986_v28 = vmax.f32 %v907_v26, 0.0 }
 0x2aa   : > { %3897 = vmatprep.mubr.msk.f32.mxu0 %vm994_vm2, %v970_v49  ;;  %v976_v49 = vmax.f32 %v857_v38, 0.0  ;;  %v982_v38 = vmax.f32 %v887_v53, 0.0  ;;  %v988_v31 = vmax.f32 %v917_v34, 0.0  ;;  %v989_v53 = vmax.f32 %v3850_v33, 0.0  ;;  %v3533_v34 = vld [vmem:[%s6177_s7] ss:$0 sm:$0xff] }
 0x2ab   : > { %1645 = vrot.lane.b32.xlu1 %v3533_v34, %s4568_s19 }
 0x2ac   : > { %v3853_v32 = vpop.f32.mrb[26].mxu1 }
 0x2ad   : > { %3898 = vmatmul.mubr.msk.f32.gmra.mrb[50].mxu0 %vm994_vm2, %v971_v47  ;;  %v927_v55 = vpop.f32.mrb[27].mxu1  ;;  %v985_v47 = vmax.f32 %v3844_v37, 0.0  ;;  %v991_v30 = vmax.f32 %v3853_v32, 0.0  ;;  %v1506_v37 = vld [vmem:[%s6176_s6] sm:$0xff] }
 0x2ae   : > { %3900 = vmatprep.mubr.msk.f32.mxu0 %vm994_vm2, %v972_v54  ;;  %v981_v54 = vmax.f32 %v3838_v45, 0.0  ;;  %v990_v45 = vmax.f32 %v927_v55, 0.0  ;;  %v4089_v26 = vpack.c.bf16 %v1507_v43, %v1506_v37 }
 0x2b0   : > { %v3856_v27 = vpop.f32.mrb[28].mxu1  ;;  %4090 = vmatprep.subr.bf16.mxu0 %v4089_v26 }
 0x2b1   : > { %3901 = vmatmul.mubr.msk.f32.gmra.mrb[52].mxu0 %vm994_vm2, %v973_v52  ;;  %v937_v29 = vpop.f32.mrb[29].mxu1  ;;  %v993_v33 = vmax.f32 %v3856_v27, 0.0 }
 0x2b2   : > { %3903 = vmatprep.mubr.msk.f32.mxu0 %vm994_vm2, %v974_v46  ;;  %v992_v39 = vmax.f32 %v937_v29, 0.0  ;;  %4092 = vmatpush3.bf16.msra.mxu0 %v4089_v26 }
 0x2b5   : > { %3904 = vmatmul.mubr.msk.f32.gmra.mrb[54].mxu0 %vm994_vm2, %v975_v51 }
 0x2b6   : > { %3906 = vmatprep.mubr.msk.f32.mxu0 %vm994_vm2, %v976_v49 }
 0x2b9   : > { %3907 = vmatmul.mubr.msk.f32.gmra.mrb[56].mxu0 %vm994_vm2, %v977_v41 }
 0x2ba   : > { %3909 = vmatprep.mubr.msk.f32.mxu0 %vm994_vm2, %v978_v44 }
 0x2bd   : > { %3910 = vmatmul.mubr.msk.f32.gmra.mrb[58].mxu0 %vm994_vm2, %v979_v42 }
 0x2be   : > { %3912 = vmatprep.mubr.msk.f32.mxu0 %vm994_vm2, %v980_v50 }
 0x2c1   : > { %3913 = vmatmul.mubr.msk.f32.gmra.mrb[60].mxu0 %vm994_vm2, %v981_v54 }
 0x2c2   : > { %3915 = vmatprep.mubr.msk.f32.mxu0 %vm994_vm2, %v982_v38 }
 0x2c5   : > { %3916 = vmatmul.mubr.msk.f32.gmra.mrb[62].mxu0 %vm994_vm2, %v983_v35 }
 0x2c6   : > { %3918 = vmatprep.mubr.msk.f32.mxu0 %vm994_vm2, %v984_v40 }
 0x2c9   : > { %3919 = vmatmul.mubr.msk.f32.gmra.mrb[64].mxu0 %vm994_vm2, %v985_v47 }
 0x2ca   : > { %3921 = vmatprep.mubr.msk.f32.mxu0 %vm994_vm2, %v986_v28 }
 0x2cd   : > { %3922 = vmatmul.mubr.msk.f32.gmra.mrb[66].mxu0 %vm994_vm2, %v987_v48 }
 0x2ce   : > { %3924 = vmatprep.mubr.msk.f32.mxu0 %vm994_vm2, %v988_v31 }
 0x2d1   : > { %3925 = vmatmul.mubr.msk.f32.gmra.mrb[68].mxu0 %vm994_vm2, %v989_v53 }
 0x2d2   : > { %3927 = vmatprep.mubr.msk.f32.mxu0 %vm994_vm2, %v990_v45 }
 0x2d5   : > { %3928 = vmatmul.mubr.msk.f32.gmra.mrb[70].mxu0 %vm994_vm2, %v991_v30 }
 0x2d6   : > { %3930 = vmatprep.mubr.msk.f32.mxu0 %vm994_vm2, %v992_v39 }
 0x2d9   : > { %3931 = vmatmul.mubr.msk.f32.gmra.mrb[72].mxu0 %vm994_vm2, %v993_v33 }
 0x350   : > { %v3863_v32 = vpop.f32.mrb[26].mxu0 }
 0x351   : > { %v1205_v55 = vpop.f32.mrb[27].mxu0 }
 0x354   : > { %v3866_v46 = vpop.f32.mrb[28].mxu0 }
 0x355   : > { %v1215_v52 = vpop.f32.mrb[29].mxu0 }
 0x358   : > { %v3869_v29 = vpop.f32.mrb[30].mxu0 }
 0x359   : > { %v1225_v49 = vpop.f32.mrb[31].mxu0 }
 0x35c   : > { %v3872_v51 = vpop.f32.mrb[32].mxu0 }
 0x35d   : > { %v1235_v44 = vpop.f32.mrb[33].mxu0 }
 0x360   : > { %v3875_v41 = vpop.f32.mrb[34].mxu0 }
 0x361   : > { %v1445_v27 = vmax.f32 %v3863_v32, %v3875_v41  ;;  %v1245_v50 = vpop.f32.mrb[35].mxu0 }
 0x362   : > { %v1444_v42 = vmax.f32 %v1205_v55, %v1245_v50 }
 0x364   : > { %v3878_v38 = vpop.f32.mrb[36].mxu0 }
 0x365   : > { %v1447_v54 = vmax.f32 %v3866_v46, %v3878_v38  ;;  %v1255_v40 = vpop.f32.mrb[37].mxu0 }
 0x366   : > { %v1446_v35 = vmax.f32 %v1215_v52, %v1255_v40 }
 0x368   : > { %v3881_v28 = vpop.f32.mrb[38].mxu0 }
 0x369   : > { %v1449_v47 = vmax.f32 %v3869_v29, %v3881_v28  ;;  %v1265_v31 = vpop.f32.mrb[39].mxu0 }
 0x36a   : > { %v1448_v48 = vmax.f32 %v1225_v49, %v1265_v31 }
 0x36c   : > { %v3884_v45 = vpop.f32.mrb[40].mxu0 }
 0x36d   : > { %v1451_v53 = vmax.f32 %v3872_v51, %v3884_v45  ;;  %v1275_v39 = vpop.f32.mrb[41].mxu0 }
 0x36e   : > { %v1450_v30 = vmax.f32 %v1235_v44, %v1275_v39 }
 0x370   : > { %v3887_v37 = vpop.f32.mrb[42].mxu0 }
 0x371   : > { %v1453_v43 = vmax.f32 %v1445_v27, %v3887_v37  ;;  %v1285_v26 = vpop.f32.mrb[43].mxu0 }
 0x372   : > { %v1452_v33 = vmax.f32 %v1444_v42, %v1285_v26 }
 0x374   : > { %v3890_v34 = vpop.f32.mrb[44].mxu0 }
 0x375   : > { %v1455_v32 = vmax.f32 %v1447_v54, %v3890_v34  ;;  %v1295_v41 = vpop.f32.mrb[45].mxu0 }
 0x376   : > { %v1454_v55 = vmax.f32 %v1446_v35, %v1295_v41 }
 0x378   : > { %v3893_v50 = vpop.f32.mrb[46].mxu0 }
 0x379   : > { %v1457_v46 = vmax.f32 %v1449_v47, %v3893_v50  ;;  %v1305_v38 = vpop.f32.mrb[47].mxu0 }
 0x37a   : > { %v1456_v52 = vmax.f32 %v1448_v48, %v1305_v38 }
 0x37c   : > { %v3896_v40 = vpop.f32.mrb[48].mxu0 }
 0x37d   : > { %v1459_v29 = vmax.f32 %v1451_v53, %v3896_v40  ;;  %v1315_v28 = vpop.f32.mrb[49].mxu0 }
 0x37e   : > { %v1458_v49 = vmax.f32 %v1450_v30, %v1315_v28 }
 0x380   : > { %v3899_v31 = vpop.f32.mrb[50].mxu0 }
 0x381   : > { %v1461_v51 = vmax.f32 %v1453_v43, %v3899_v31  ;;  %v1325_v45 = vpop.f32.mrb[51].mxu0 }
 0x382   : > { %v1460_v44 = vmax.f32 %v1452_v33, %v1325_v45 }
 0x384   : > { %v3902_v39 = vpop.f32.mrb[52].mxu0 }
 0x385   : > { %v1463_v27 = vmax.f32 %v1455_v32, %v3902_v39  ;;  %v1335_v37 = vpop.f32.mrb[53].mxu0 }
 0x386   : > { %v1462_v42 = vmax.f32 %v1454_v55, %v1335_v37 }
 0x388   : > { %v3905_v26 = vpop.f32.mrb[54].mxu0 }
 0x389   : > { %v1465_v54 = vmax.f32 %v1457_v46, %v3905_v26  ;;  %v1345_v34 = vpop.f32.mrb[55].mxu0 }
 0x38a   : > { %v1464_v35 = vmax.f32 %v1456_v52, %v1345_v34 }
 0x38c   : > { %v3908_v41 = vpop.f32.mrb[56].mxu0 }
 0x38d   : > { %v1467_v47 = vmax.f32 %v1459_v29, %v3908_v41  ;;  %v1355_v50 = vpop.f32.mrb[57].mxu0  ;;  %v3524_v29 = vld [vmem:[%s6175_s5] ss:$0 sm:$0xff] }
 0x38e   : > { %v1466_v48 = vmax.f32 %v1458_v49, %v1355_v50 }
 0x390   : > { %v3911_v38 = vpop.f32.mrb[58].mxu0 }
 0x391   : > { %v1469_v53 = vmax.f32 %v1461_v51, %v3911_v38  ;;  %v1365_v40 = vpop.f32.mrb[59].mxu0 }
 0x392   : > { %v1468_v30 = vmax.f32 %v1460_v44, %v1365_v40 }
 0x394   : > { %v3914_v28 = vpop.f32.mrb[60].mxu0 }
 0x395   : > { %v1471_v43 = vmax.f32 %v1463_v27, %v3914_v28  ;;  %v1375_v31 = vpop.f32.mrb[61].mxu0 }
 0x396   : > { %v1470_v33 = vmax.f32 %v1462_v42, %v1375_v31 }
 0x398   : > { %v3917_v45 = vpop.f32.mrb[62].mxu0 }
 0x399   : > { %v1473_v32 = vmax.f32 %v1465_v54, %v3917_v45  ;;  %v1385_v39 = vpop.f32.mrb[63].mxu0 }
 0x39a   : > { %v1472_v55 = vmax.f32 %v1464_v35, %v1385_v39 }
 0x39c   : > { %v3920_v37 = vpop.f32.mrb[64].mxu0 }
 0x39d   : > { %v1475_v46 = vmax.f32 %v1467_v47, %v3920_v37  ;;  %v1395_v26 = vpop.f32.mrb[65].mxu0 }
 0x39e   : > { %v1474_v52 = vmax.f32 %v1466_v48, %v1395_v26 }
 0x3a0   : > { %v3923_v49 = vpop.f32.mrb[66].mxu0 }
 0x3a1   : > { %v1477_v51 = vmax.f32 %v1469_v53, %v3923_v49  ;;  %v1405_v34 = vpop.f32.mrb[67].mxu0 }
 0x3a2   : > { %v1476_v44 = vmax.f32 %v1468_v30, %v1405_v34 }
 0x3a3   : > { %v1491_v41 = vadd.f32 %v3524_v29, %v1477_v51 }
 0x3a4   : > { %v1490_v27 = vadd.f32 %v3524_v29, %v1476_v44  ;;  %v3926_v50 = vpop.f32.mrb[68].mxu0 }
 0x3a5   : > { %v1479_v42 = vmax.f32 %v1471_v43, %v3926_v50  ;;  %v1415_v38 = vpop.f32.mrb[69].mxu0  ;;  %v1499_v35 = vmax.f32 %v1491_v41, 0.0  ;;  %v1646_v50 = vpop.permute.xlu1 %1645 }
 0x3a6   : > { %v1498_v54 = vmax.f32 %v1490_v27, 0.0  ;;  %v1478_v40 = vmax.f32 %v1470_v33, %v1415_v38 }
 0x3a7   : > { %v1493_v28 = vadd.f32 %v3524_v29, %v1479_v42 }
 0x3a8   : > { %v1492_v47 = vadd.f32 %v3524_v29, %v1478_v40  ;;  %v3929_v31 = vpop.f32.mrb[70].mxu0  ;;  %3937 = vmatprep.mubr.msk.f32.mxu0 %vm994_vm2, %v1498_v54 }
 0x3a9   : > { %v1481_v48 = vmax.f32 %v1473_v32, %v3929_v31  ;;  %v1425_v45 = vpop.f32.mrb[71].mxu0  ;;  %3938 = vmatmul.mubr.msk.f32.vlgmr.msra.gmra.mrb[74].mxu0 %vm994_vm2, %v1499_v35  ;;  %v1501_v30 = vmax.f32 %v1493_v28, 0.0 }
 0x3aa   : > { %v1500_v53 = vmax.f32 %v1492_v47, 0.0  ;;  %v1480_v39 = vmax.f32 %v1472_v55, %v1425_v45 }
 0x3ab   : > { %v1495_v37 = vadd.f32 %v3524_v29, %v1481_v48 }
 0x3ac   : > { %v1494_v26 = vadd.f32 %v3524_v29, %v1480_v39  ;;  %v3932_v49 = vpop.f32.mrb[72].mxu0  ;;  %3940 = vmatprep.mubr.msk.f32.mxu0 %vm994_vm2, %v1500_v53 }
 0x3ad   : > { %v1483_v43 = vmax.f32 %v1475_v46, %v3932_v49  ;;  %v1435_v33 = vpop.f32.mrb[73].mxu0  ;;  %3941 = vmatmul.mubr.msk.f32.gmra.mrb[76].mxu0 %vm994_vm2, %v1501_v30  ;;  %v1503_v44 = vmax.f32 %v1495_v37, 0.0 }
 0x3ae   : > { %v1502_v51 = vmax.f32 %v1494_v26, 0.0  ;;  %v1482_v34 = vmax.f32 %v1474_v52, %v1435_v33 }
 0x3af   : > { %v1497_v41 = vadd.f32 %v3524_v29, %v1483_v43 }
 0x3b0   : > { %v1496_v32 = vadd.f32 %v3524_v29, %v1482_v34  ;;  %3943 = vmatprep.mubr.msk.f32.mxu0 %vm994_vm2, %v1502_v51 }
 0x3b1   : > { %3944 = vmatmul.mubr.msk.f32.gmra.mrb[78].mxu0 %vm994_vm2, %v1503_v44  ;;  %v1505_v27 = vmax.f32 %v1497_v41, 0.0 }
 0x3b2   : > { %v1504_v55 = vmax.f32 %v1496_v32, 0.0 }
 0x3b4   : > { %3946 = vmatprep.mubr.msk.f32.mxu0 %vm994_vm2, %v1504_v55 }
 0x3b5   : > { %3947 = vmatmul.mubr.msk.f32.gmra.mrb[80].mxu0 %vm994_vm2, %v1505_v27 }
 0x47c   : > { %v3939_v46 = vpop.f32.mrb[74].mxu0 }
 0x47d   : > { %v1649_v42 = vadd.f32 %v3939_v46, %v1646_v50  ;;  %v1601_v38 = vpop.f32.mrb[75].mxu0 }
 0x47e   : > { %v1648_v54 = vadd.f32 %v1646_v50, %v1601_v38  ;;  %v4093_v40 = vpack.c.bf16 %v3939_v46, %v1601_v38 }
 0x480   : > { %v4222_v52 = vpack.i.bf16 %v1649_v42, %v1648_v54  ;;  %v3942_v35 = vpop.f32.mrb[76].mxu0  ;;  %4094 = vmatprep.subr.bf16.mxu1 %v4093_v40 }
 0x481   : > { %v1651_v29 = vadd.f32 %v3942_v35, %v1646_v50  ;;  %v1611_v28 = vpop.f32.mrb[77].mxu0  ;;  %4096 = vmatpush3.bf16.msra.mxu1 %v4093_v40 }
 0x482   : > { %v1650_v47 = vadd.f32 %v1646_v50, %v1611_v28  ;;  %v4097_v31 = vpack.c.bf16 %v3942_v35, %v1611_v28  ;;  %4223 = vrot.lane.b32.xlu0 %v4222_v52, %s4569_s30 }
 0x484   : > { %v4227_v48 = vpack.i.bf16 %v1651_v29, %v1650_v47  ;;  %v3945_v45 = vpop.f32.mrb[78].mxu0  ;;  %4098 = vmatprep.subr.bf16.mxu1 %v4097_v31 }
 0x485   : > { %v1653_v53 = vadd.f32 %v3945_v45, %v1646_v50  ;;  %v1621_v39 = vpop.f32.mrb[79].mxu0  ;;  %4100 = vmatpush3.bf16.msra.mxu1 %v4097_v31 }
 0x486   : > { %v1652_v30 = vadd.f32 %v1646_v50, %v1621_v39  ;;  %v4101_v37 = vpack.c.bf16 %v3945_v45, %v1621_v39  ;;  %4228 = vrot.lane.b32.xlu1 %v4227_v48, %s4569_s30 }
 0x488   : > { %v4232_v26 = vpack.i.bf16 %v1653_v53, %v1652_v30  ;;  %v3948_v49 = vpop.f32.mrb[80].mxu0  ;;  %4102 = vmatprep.subr.bf16.mxu1 %v4101_v37 }
 0x489   : > { %v1655_v43 = vadd.f32 %v3948_v49, %v1646_v50  ;;  %v1631_v33 = vpop.f32.mrb[81].mxu0  ;;  %4104 = vmatpush3.bf16.msra.mxu1 %v4101_v37 }
 0x48a   : > { %v1654_v51 = vadd.f32 %v1646_v50, %v1631_v33  ;;  %v4105_v34 = vpack.c.bf16 %v3948_v49, %v1631_v33  ;;  %4233 = vrot.lane.b32.xlu0 %v4232_v26, %s4569_s30 }
 0x48c   : > { %v4237_v44 = vpack.i.bf16 %v1655_v43, %v1654_v51  ;;  %4106 = vmatprep.subr.bf16.mxu1 %v4105_v34 }
 0x48d   : > { %4108 = vmatpush3.bf16.msra.mxu1 %v4105_v34 }
 0x48e   : > { %4238 = vrot.lane.b32.xlu1 %v4237_v44, %s4569_s30  ;;  %s4574_s30 = smov [#allocation5]  }
 0x48f   : > { %s4499_s11 = sshll.u32 %s4574_s30, 4  ;;  %s4500_s11 = int_to_ptr.vmem [resolvable:$false] %s4499_s11 }
 0x490   : > { %s4501_s12 = scalar_lea.vmem %s4500_s11, 2048  ;;  %p4502_p10 = scmp.lt.s32.totalorder %s6124_s15, %s4500_s11 }
 0x491   : > { %p4503_p0 = scmp.lt.s32.totalorder %s4501_s12, %s4495_s29 }
 0x493   : > { %p4504_p2 = por %p4503_p0, %p4502_p10 }
 0x495   : > { %p4505_p4 = pnand %p4504_p2, %p4498_p8 }
 0x4f4   : > { %v4224_v41 = vpop.permute.xlu0 %4223 }
 0x4f5   : > { %v4226_v32 = vunpack.i.h.bf16 %v4224_v41  ;;  %v4225_v55 = vunpack.i.l.bf16 %v4224_v41 }
 0x4f7   : > { %v4109_v27 = vpack.c.bf16 %v4226_v32, %v4225_v55 }
 0x4f8   : > { %v4229_v46 = vpop.permute.xlu1 %4228 }
 0x4f9   : > { %v4231_v42 = vunpack.i.h.bf16 %v4229_v46  ;;  %v4230_v38 = vunpack.i.l.bf16 %v4229_v46  ;;  %4110 = vmatprep.subr.bf16.mxu1 %v4109_v27 }
 0x4fa   : > { %4112 = vmatpush3.bf16.msra.mxu1 %v4109_v27 }
 0x4fb   : > { %v4113_v54 = vpack.c.bf16 %v4231_v42, %v4230_v38 }
 0x4fc   : > { %v4234_v40 = vpop.permute.xlu0 %4233 }
 0x4fd   : > { %v4236_v52 = vunpack.i.h.bf16 %v4234_v40  ;;  %v4235_v35 = vunpack.i.l.bf16 %v4234_v40  ;;  %4114 = vmatprep.subr.bf16.mxu1 %v4113_v54 }
 0x4fe   : > { %4116 = vmatpush3.bf16.msra.mxu1 %v4113_v54 }
 0x4ff   : > { %v4117_v50 = vpack.c.bf16 %v4236_v52, %v4235_v35 }
 0x500   : > { %v4239_v29 = vpop.permute.xlu1 %4238 }
 0x501   : > { %v4241_v28 = vunpack.i.h.bf16 %v4239_v29  ;;  %v4240_v47 = vunpack.i.l.bf16 %v4239_v29  ;;  %4118 = vmatprep.subr.bf16.mxu1 %v4117_v50 }
 0x502   : > { %4120 = vmatpush3.bf16.msra.mxu1 %v4117_v50 }
 0x503   : > { %v4121_v31 = vpack.c.bf16 %v4241_v28, %v4240_v47 }
 0x505   : > { %4122 = vmatprep.subr.bf16.mxu1 %v4121_v31 }
 0x506   : > { %4124 = vmatpush3.bf16.msra.mxu1 %v4121_v31 }
 0x509   : > { %3982 = vmatmul.mubr.f32.vlgmr.msra.gmra.mrb[30].mxu1 %v4778_v56  ;;  %v6225_v56 = vld [vmem:[#allocation12_spill] sm:$0xff] }
 0x50a   : > { %3984 = vmatprep.mubr.f32.mxu1 %v4784_v58  ;;  %v6227_v58 = vld [vmem:[#allocation14_spill] sm:$0xff] }
 0x50d   : > { %3985 = vmatmul.mubr.f32.gmra.mrb[32].mxu1 %v4793_v60  ;;  %v6229_v60 = vld [vmem:[#allocation16_spill] sm:$0xff] }
 0x50e   : > { %3987 = vmatprep.mubr.f32.mxu1 %v4800_v62  ;;  %v6231_v62 = vld [vmem:[#allocation18_spill] sm:$0xff] }
 0x511   : > { %3988 = vmatmul.mubr.f32.gmra.mrb[34].mxu1 %v4809_v0  ;;  %v6203_v0 = vmov 0  }
 0x512   : > { %3990 = vmatprep.mubr.f32.mxu1 %v4816_v2  ;;  %4242 = vset.pattern.permute.xlu1 %v6203_v0  ;;  %v6233_v2 = vld [vmem:[#allocation20_spill] sm:$0xff] }
 0x515   : > { %3991 = vmatmul.mubr.f32.gmra.mrb[36].mxu1 %v4825_v4  ;;  %v6235_v4 = vld [vmem:[#allocation22_spill] sm:$0xff] }
 0x516   : > { %3993 = vmatprep.mubr.f32.mxu1 %v4832_v6 }
 0x519   : > { %3994 = vmatmul.mubr.f32.gmra.mrb[38].mxu1 %v4841_v8 }
 0x51a   : > { %3996 = vmatprep.mubr.f32.mxu1 %v4848_v10 }
 0x51d   : > { %3997 = vmatmul.mubr.f32.gmra.mrb[40].mxu1 %v4857_v12 }
 0x51e   : > { %3999 = vmatprep.mubr.f32.mxu1 %v4864_v14  ;;  %v6199_v14 = vmov 3  }
 0x521   : > { %4000 = vmatmul.mubr.f32.gmra.mrb[42].mxu1 %v4873_v16 }
 0x522   : > { %4002 = vmatprep.mubr.f32.mxu1 %v4880_v18 }
 0x525   : > { %4003 = vmatmul.mubr.f32.gmra.mrb[44].mxu1 %v4889_v20 }
 0x526   : > { %4005 = vmatprep.mubr.f32.mxu1 %v4896_v22 }
 0x529   : > { %4006 = vmatmul.mubr.f32.gmra.mrb[46].mxu1 %v4905_v24 }
 0x52a   : > { %4008 = vmatprep.mubr.f32.mxu1 %v4768_v36  ;;  %v6224_v36 = vld [vmem:[#allocation11_spill] sm:$0xff] }
 0x52d   : > { %4009 = vmatmul.mubr.f32.gmra.mrb[48].mxu1 %v4781_v57  ;;  %v6226_v57 = vld [vmem:[#allocation13_spill] sm:$0xff] }
 0x52e   : > { %4011 = vmatprep.mubr.f32.mxu1 %v4787_v59  ;;  %v6228_v59 = vld [vmem:[#allocation15_spill] sm:$0xff] }
 0x531   : > { %4012 = vmatmul.mubr.f32.gmra.mrb[50].mxu1 %v4797_v61  ;;  %v6230_v61 = vld [vmem:[#allocation17_spill] sm:$0xff] }
 0x532   : > { %4014 = vmatprep.mubr.f32.mxu1 %v4803_v63  ;;  %v6201_v63 = vmov 1  }
 0x533   : > { %4243 = vset.pattern.permute.xlu0 %v6201_v63 }
 0x535   : > { %4015 = vmatmul.mubr.f32.gmra.mrb[52].mxu1 %v4813_v1  ;;  %v6232_v1 = vld [vmem:[#allocation19_spill] sm:$0xff] }
 0x536   : > { %4017 = vmatprep.mubr.f32.mxu1 %v4819_v3  ;;  %v6234_v3 = vld [vmem:[#allocation21_spill] sm:$0xff] }
 0x539   : > { %4018 = vmatmul.mubr.f32.gmra.mrb[54].mxu1 %v4829_v5 }
 0x53a   : > { %4020 = vmatprep.mubr.f32.mxu1 %v4835_v7 }
 0x53d   : > { %4021 = vmatmul.mubr.f32.gmra.mrb[56].mxu1 %v4845_v9 }
 0x53e   : > { %4023 = vmatprep.mubr.f32.mxu1 %v4851_v11  ;;  %v6197_v11 = vmov 2  }
 0x541   : > { %4024 = vmatmul.mubr.f32.gmra.mrb[58].mxu1 %v4861_v13 }
 0x542   : > { %4026 = vmatprep.mubr.f32.mxu1 %v4867_v15 }
 0x545   : > { %4027 = vmatmul.mubr.f32.gmra.mrb[60].mxu1 %v4877_v17 }
 0x546   : > { %4029 = vmatprep.mubr.f32.mxu1 %v4883_v19 }
 0x549   : > { %4030 = vmatmul.mubr.f32.gmra.mrb[62].mxu1 %v4893_v21 }
 0x54a   : > { %4032 = vmatprep.mubr.f32.mxu1 %v4899_v23 }
 0x54d   : > { %4033 = vmatmul.mubr.f32.gmra.mrb[64].mxu1 %v4909_v25 }
 0x54e   : > { %4035 = vmatprep.mubr.f32.mxu1 %v6224_v36 }
 0x551   : > { %4036 = vmatmul.mubr.f32.gmra.mrb[66].mxu1 %v6225_v56 }
 0x552   : > { %4038 = vmatprep.mubr.f32.mxu1 %v6226_v57 }
 0x555   : > { %4039 = vmatmul.mubr.f32.gmra.mrb[68].mxu1 %v6227_v58 }
 0x556   : > { %4041 = vmatprep.mubr.f32.mxu1 %v6228_v59 }
 0x559   : > { %4042 = vmatmul.mubr.f32.gmra.mrb[70].mxu1 %v6229_v60 }
 0x55a   : > { %4044 = vmatprep.mubr.f32.mxu1 %v6230_v61 }
 0x55d   : > { %4045 = vmatmul.mubr.f32.gmra.mrb[72].mxu1 %v6231_v62 }
 0x55e   : > { %4047 = vmatprep.mubr.f32.mxu1 %v6232_v1 }
 0x561   : > { %4048 = vmatmul.mubr.f32.gmra.mrb[74].mxu1 %v6233_v2 }
 0x562   : > { %4050 = vmatprep.mubr.f32.mxu1 %v6234_v3 }
 0x565   : > { %4051 = vmatmul.mubr.f32.gmra.mrb[76].mxu1 %v6235_v4 }
 0x5dc   : > { %v3983_v5 = vpop.f32.mrb[30].mxu1 }
 0x5dd   : > { %v1994_v6 = vmax.f32 %v3983_v5, 0.0  ;;  %v1754_v7 = vpop.f32.mrb[31].mxu1 }
 0x5de   : > { %v1993_v10 = vmax.f32 %v1754_v7, 0.0 }
 0x5df   : > { %2338 = vperm.xlu0 %4243, %v1994_v6   ;;  %2048 = vperm.xlu1 %4242, %v1994_v6  }
 0x5e0   : > { %v3986_v8 = vpop.f32.mrb[32].mxu1 }
 0x5e1   : > { %v1764_v9 = vpop.f32.mrb[33].mxu1  ;;  %v1996_v19 = vmax.f32 %v3986_v8, 0.0 }
 0x5e2   : > { %v1995_v23 = vmax.f32 %v1764_v9, 0.0 }
 0x5e3   : > { %4246 = vset.pattern.permute.xlu0 %v6203_v0  ;;  %4244 = vset.pattern.permute.xlu1 %v6197_v11 }
 0x5e4   : > { %2630 = vperm.xlu1 %4244, %v1994_v6   ;;  %2043 = vperm.xlu0 %4246, %v1993_v10   ;;  %v3989_v12 = vpop.f32.mrb[34].mxu1 }
 0x5e5   : > { %v1774_v13 = vpop.f32.mrb[35].mxu1  ;;  %v1998_v53 = vmax.f32 %v3989_v12, 0.0 }
 0x5e6   : > { %v1997_v37 = vmax.f32 %v1774_v13, 0.0 }
 0x5e8   : > { %4245 = vset.pattern.permute.xlu1 %v6199_v14  ;;  %4248 = vset.pattern.permute.xlu0 %v6197_v11  ;;  %v3992_v15 = vpop.f32.mrb[36].mxu1 }
 0x5e9   : > { %2922 = vperm.xlu1 %4245, %v1994_v6   ;;  %2626 = vperm.xlu0 %4248, %v1993_v10   ;;  %v1784_v16 = vpop.f32.mrb[37].mxu1  ;;  %v2000_v26 = vmax.f32 %v3992_v15, 0.0 }
 0x5ea   : > { %v1999_v33 = vmax.f32 %v1784_v16, 0.0 }
 0x5ec   : > { %v5122_v17 = vpop.f32.mrb[38].mxu1 }
 0x5ed   : > { %4247 = vset.pattern.permute.xlu1 %v6201_v63  ;;  %4249 = vset.pattern.permute.xlu0 %v6199_v14  ;;  %v5126_v18 = vpop.f32.mrb[39].mxu1  ;;  %v2002_v51 = vmax.f32 %v5122_v17, 0.0 }
 0x5ee   : > { %2334 = vperm.xlu1 %4247, %v1993_v10   ;;  %2918 = vperm.xlu0 %4249, %v1993_v10   ;;  %v2001_v41 = vmax.f32 %v5126_v18, 0.0 }
 0x5f0   : > { %v5128_v20 = vpop.f32.mrb[40].mxu1 }
 0x5f1   : > { %v5130_v21 = vpop.f32.mrb[41].mxu1  ;;  %v2004_v32 = vmax.f32 %v5128_v20, 0.0 }
 0x5f2   : > { %2346 = vperm.xlu1 %4247, %v1996_v19   ;;  %4250 = vset.pattern.permute.xlu0 %v6203_v0  ;;  %v2003_v46 = vmax.f32 %v5130_v21, 0.0 }
 0x5f3   : > { %2058 = vperm.xlu0 %4250, %v1996_v19  }
 0x5f4   : > { %v5133_v22 = vpop.f32.mrb[42].mxu1 }
 0x5f5   : > { %v5135_v24 = vpop.f32.mrb[43].mxu1  ;;  %v2006_v42 = vmax.f32 %v5133_v22, 0.0 }
 0x5f6   : > { %4253 = vset.pattern.permute.xlu1 %v6203_v0  ;;  %v2005_v40 = vmax.f32 %v5135_v24, 0.0 }
 0x5f7   : > { %2053 = vperm.xlu1 %4253, %v1995_v23   ;;  %4251 = vset.pattern.permute.xlu0 %v6197_v11 }
 0x5f8   : > { %2638 = vperm.xlu0 %4251, %v1996_v19   ;;  %v5139_v25 = vpop.f32.mrb[44].mxu1 }
 0x5f9   : > { %v5141_v48 = vpop.f32.mrb[45].mxu1  ;;  %v2008_v50 = vmax.f32 %v5139_v25, 0.0 }
 0x5fa   : > { %v2007_v60 = vmax.f32 %v5141_v48, 0.0 }
 0x5fb   : > { %4254 = vset.pattern.permute.xlu1 %v6201_v63 }
 0x5fc   : > { %2342 = vperm.xlu1 %4254, %v1995_v23   ;;  %4252 = vset.pattern.permute.xlu0 %v6199_v14  ;;  %v5145_v45 = vpop.f32.mrb[46].mxu1 }
 0x5fd   : > { %2930 = vperm.xlu0 %4252, %v1996_v19   ;;  %v5148_v39 = vpop.f32.mrb[47].mxu1  ;;  %v2010_v1 = vmax.f32 %v5145_v45, 0.0 }
 0x5fe   : > { %v2009_v10 = vmax.f32 %v5148_v39, 0.0 }
 0x600   : > { %4255 = vset.pattern.permute.xlu1 %v6197_v11  ;;  %v5155_v30 = vpop.f32.mrb[48].mxu1 }
 0x601   : > { %2634 = vperm.xlu1 %4255, %v1995_v23   ;;  %4257 = vset.pattern.permute.xlu0 %v6203_v0  ;;  %v5160_v49 = vpop.f32.mrb[49].mxu1  ;;  %v2012_v15 = vmax.f32 %v5155_v30, 0.0 }
 0x602   : > { %2068 = vperm.xlu0 %4257, %v1998_v53   ;;  %v2011_v24 = vmax.f32 %v5160_v49, 0.0 }
 0x604   : > { %v5167_v43 = vpop.f32.mrb[50].mxu1 }
 0x605   : > { %4256 = vset.pattern.permute.xlu1 %v6199_v14  ;;  %v5173_v34 = vpop.f32.mrb[51].mxu1  ;;  %v2014_v45 = vmax.f32 %v5167_v43, 0.0 }
 0x606   : > { %2926 = vperm.xlu1 %4256, %v1995_v23   ;;  %4259 = vset.pattern.permute.xlu0 %v6197_v11 }
 0x607   : > { %2646 = vperm.xlu0 %4259, %v1998_v53  }
 0x608   : > { %v5180_v44 = vpop.f32.mrb[52].mxu1 }
 0x609   : > { %v5187_v55 = vpop.f32.mrb[53].mxu1 }
 0x60a   : > { %4258 = vset.pattern.permute.xlu1 %v6201_v63 }
 0x60b   : > { %2354 = vperm.xlu1 %4258, %v1998_v53   ;;  %4260 = vset.pattern.permute.xlu0 %v6199_v14 }
 0x60c   : > { %2938 = vperm.xlu0 %4260, %v1998_v53   ;;  %v5194_v27 = vpop.f32.mrb[54].mxu1 }
 0x60d   : > { %v5201_v38 = vpop.f32.mrb[55].mxu1 }
 0x60f   : > { %4261 = vset.pattern.permute.xlu1 %v6203_v0 }
 0x610   : > { %2063 = vperm.xlu1 %4261, %v1997_v37   ;;  %4262 = vset.pattern.permute.xlu0 %v6201_v63  ;;  %v5208_v54 = vpop.f32.mrb[56].mxu1 }
 0x611   : > { %2350 = vperm.xlu0 %4262, %v1997_v37   ;;  %v5223_v47 = vpop.f32.mrb[57].mxu1 }
 0x614   : > { %4263 = vset.pattern.permute.xlu1 %v6197_v11  ;;  %v5238_v58 = vpop.f32.mrb[58].mxu1 }
 0x615   : > { %2642 = vperm.xlu1 %4263, %v1997_v37   ;;  %4265 = vset.pattern.permute.xlu0 %v6203_v0  ;;  %v5253_v3 = vpop.f32.mrb[59].mxu1 }
 0x616   : > { %2078 = vperm.xlu0 %4265, %v2000_v26  }
 0x618   : > { %v5268_v8 = vpop.f32.mrb[60].mxu1 }
 0x619   : > { %4264 = vset.pattern.permute.xlu1 %v6199_v14  ;;  %v5283_v17 = vpop.f32.mrb[61].mxu1 }
 0x61a   : > { %2934 = vperm.xlu1 %4264, %v1997_v37   ;;  %4267 = vset.pattern.permute.xlu0 %v6197_v11 }
 0x61b   : > { %2654 = vperm.xlu0 %4267, %v2000_v26  }
 0x61c   : > { %v5298_v22 = vpop.f32.mrb[62].mxu1 }
 0x61d   : > { %v5313_v39 = vpop.f32.mrb[63].mxu1 }
 0x61e   : > { %4266 = vset.pattern.permute.xlu1 %v6201_v63 }
 0x61f   : > { %2362 = vperm.xlu1 %4266, %v2000_v26   ;;  %4268 = vset.pattern.permute.xlu0 %v6199_v14 }
 0x620   : > { %2946 = vperm.xlu0 %4268, %v2000_v26   ;;  %v5328_v43 = vpop.f32.mrb[64].mxu1 }
 0x623   : > { %4269 = vset.pattern.permute.xlu1 %v6203_v0 }
 0x624   : > { %2073 = vperm.xlu1 %4269, %v1999_v33   ;;  %4270 = vset.pattern.permute.xlu0 %v6201_v63 }
 0x625   : > { %2358 = vperm.xlu0 %4270, %v1999_v33  }
 0x628   : > { %4271 = vset.pattern.permute.xlu1 %v6197_v11 }
 0x629   : > { %2650 = vperm.xlu1 %4271, %v1999_v33   ;;  %4273 = vset.pattern.permute.xlu0 %v6203_v0 }
 0x62a   : > { %2088 = vperm.xlu0 %4273, %v2002_v51  }
 0x62d   : > { %4272 = vset.pattern.permute.xlu1 %v6199_v14 }
 0x62e   : > { %2942 = vperm.xlu1 %4272, %v1999_v33   ;;  %4275 = vset.pattern.permute.xlu0 %v6197_v11 }
 0x62f   : > { %2662 = vperm.xlu0 %4275, %v2002_v51  }
 0x632   : > { %4274 = vset.pattern.permute.xlu1 %v6201_v63 }
 0x633   : > { %2370 = vperm.xlu1 %4274, %v2002_v51   ;;  %4276 = vset.pattern.permute.xlu0 %v6199_v14 }
 0x634   : > { %2954 = vperm.xlu0 %4276, %v2002_v51   ;;  %v2013_v51 = vmax.f32 %v5173_v34, 0.0 }
 0x637   : > { %4277 = vset.pattern.permute.xlu1 %v6203_v0 }
 0x638   : > { %2083 = vperm.xlu1 %4277, %v2001_v41   ;;  %4278 = vset.pattern.permute.xlu0 %v6201_v63 }
 0x639   : > { %2366 = vperm.xlu0 %4278, %v2001_v41  }
 0x63c   : > { %4279 = vset.pattern.permute.xlu1 %v6197_v11 }
 0x63d   : > { %2658 = vperm.xlu1 %4279, %v2001_v41   ;;  %4281 = vset.pattern.permute.xlu0 %v6203_v0 }
 0x63e   : > { %2098 = vperm.xlu0 %4281, %v2004_v32  }
 0x641   : > { %4280 = vset.pattern.permute.xlu1 %v6199_v14 }
 0x642   : > { %2950 = vperm.xlu1 %4280, %v2001_v41   ;;  %4283 = vset.pattern.permute.xlu0 %v6197_v11 }
 0x643   : > { %2670 = vperm.xlu0 %4283, %v2004_v32  }
 0x646   : > { %4282 = vset.pattern.permute.xlu1 %v6201_v63 }
 0x647   : > { %2378 = vperm.xlu1 %4282, %v2004_v32   ;;  %4284 = vset.pattern.permute.xlu0 %v6199_v14 }
 0x648   : > { %2962 = vperm.xlu0 %4284, %v2004_v32  }
 0x64b   : > { %4285 = vset.pattern.permute.xlu1 %v6203_v0 }
 0x64c   : > { %2093 = vperm.xlu1 %4285, %v2003_v46   ;;  %4286 = vset.pattern.permute.xlu0 %v6201_v63 }
 0x64d   : > { %2374 = vperm.xlu0 %4286, %v2003_v46  }
 0x650   : > { %4287 = vset.pattern.permute.xlu1 %v6197_v11 }
 0x651   : > { %2666 = vperm.xlu1 %4287, %v2003_v46   ;;  %4289 = vset.pattern.permute.xlu0 %v6203_v0 }
 0x652   : > { %2108 = vperm.xlu0 %4289, %v2006_v42  }
 0x655   : > { %4288 = vset.pattern.permute.xlu1 %v6199_v14 }
 0x656   : > { %2958 = vperm.xlu1 %4288, %v2003_v46   ;;  %4291 = vset.pattern.permute.xlu0 %v6197_v11  ;;  %v2016_v46 = vmax.f32 %v5180_v44, 0.0 }
 0x657   : > { %2678 = vperm.xlu0 %4291, %v2006_v42  }
 0x65a   : > { %4290 = vset.pattern.permute.xlu1 %v6201_v63 }
 0x65b   : > { %2386 = vperm.xlu1 %4290, %v2006_v42   ;;  %4292 = vset.pattern.permute.xlu0 %v6199_v14 }
 0x65c   : > { %2970 = vperm.xlu0 %4292, %v2006_v42  }
 0x65e   : > { %v5211_v52 = vpop.permute.xlu0 %2338  ;;  %v5213_v35 = vpop.permute.xlu1 %2048 }
 0x65f   : > { %6236 = vst [vmem:[#allocation11_spill] sm:$0xff] %v5211_v52  ;;  %6237 = vst [vmem:[#allocation12_spill] sm:$0xff] %v5213_v35  ;;  %4293 = vset.pattern.permute.xlu1 %v6203_v0 }
 0x660   : > { %2103 = vperm.xlu1 %4293, %v2005_v40   ;;  %4294 = vset.pattern.permute.xlu0 %v6201_v63 }
 0x661   : > { %2382 = vperm.xlu0 %4294, %v2005_v40  }
 0x663   : > { %v5218_v29 = vpop.permute.xlu1 %2630  ;;  %v5220_v28 = vpop.permute.xlu0 %2043 }
 0x664   : > { %6238 = vst [vmem:[#allocation13_spill] sm:$0xff] %v5218_v29  ;;  %6239 = vst [vmem:[#allocation14_spill] sm:$0xff] %v5220_v28  ;;  %4295 = vset.pattern.permute.xlu1 %v6197_v11 }
 0x665   : > { %2674 = vperm.xlu1 %4295, %v2005_v40   ;;  %4297 = vset.pattern.permute.xlu0 %v6203_v0 }
 0x666   : > { %2118 = vperm.xlu0 %4297, %v2008_v50  }
 0x668   : > { %v5226_v31 = vpop.permute.xlu1 %2922  ;;  %v5228_v36 = vpop.permute.xlu0 %2626 }
 0x669   : > { %6240 = vst [vmem:[#allocation15_spill] sm:$0xff] %v5226_v31  ;;  %6241 = vst [vmem:[#allocation16_spill] sm:$0xff] %v5228_v36  ;;  %4296 = vset.pattern.permute.xlu1 %v6199_v14  ;;  %v6269_v36 = vmov 1  }
 0x66a   : > { %2966 = vperm.xlu1 %4296, %v2005_v40   ;;  %4299 = vset.pattern.permute.xlu0 %v6197_v11  ;;  %v5343_v40 = vpop.f32.mrb[65].mxu1 }
 0x66b   : > { %2686 = vperm.xlu0 %4299, %v2008_v50  }
 0x66d   : > { %v5232_v56 = vpop.permute.xlu1 %2334  ;;  %v5234_v57 = vpop.permute.xlu0 %2918 }
 0x66e   : > { %6242 = vst [vmem:[#allocation17_spill] sm:$0xff] %v5232_v56  ;;  %6243 = vst [vmem:[#allocation18_spill] sm:$0xff] %v5234_v57  ;;  %4298 = vset.pattern.permute.xlu1 %v6201_v63  ;;  %v6268_v57 = vmov 3  }
 0x66f   : > { %2394 = vperm.xlu1 %4298, %v2008_v50   ;;  %4300 = vset.pattern.permute.xlu0 %v6199_v14 }
 0x670   : > { %2978 = vperm.xlu0 %4300, %v2008_v50  }
 0x671   : > { %v5240_v59 = vpop.permute.xlu1 %2346 }
 0x672   : > { %v5243_v61 = vpop.permute.xlu0 %2058 }
 0x673   : > { %4301 = vset.pattern.permute.xlu1 %v6203_v0 }
 0x674   : > { %2113 = vperm.xlu1 %4301, %v2007_v60   ;;  %4302 = vset.pattern.permute.xlu0 %v6201_v63 }
 0x675   : > { %2390 = vperm.xlu0 %4302, %v2007_v60  }
 0x676   : > { %v5247_v62 = vpop.permute.xlu1 %2053 }
 0x677   : > { %v5250_v2 = vpop.permute.xlu0 %2638 }
 0x678   : > { %4303 = vset.pattern.permute.xlu1 %v6197_v11 }
 0x679   : > { %2682 = vperm.xlu1 %4303, %v2007_v60   ;;  %4305 = vset.pattern.permute.xlu0 %v6203_v0 }
 0x67a   : > { %2128 = vperm.xlu0 %4305, %v2010_v1  }
 0x67b   : > { %v5256_v4 = vpop.permute.xlu1 %2342 }
 0x67c   : > { %v5259_v5 = vpop.permute.xlu0 %2930 }
 0x67d   : > { %4304 = vset.pattern.permute.xlu1 %v6199_v14 }
 0x67e   : > { %2974 = vperm.xlu1 %4304, %v2007_v60   ;;  %4307 = vset.pattern.permute.xlu0 %v6197_v11 }
 0x67f   : > { %2694 = vperm.xlu0 %4307, %v2010_v1  }
 0x680   : > { %v5262_v6 = vpop.permute.xlu1 %2634 }
 0x681   : > { %v5264_v7 = vpop.permute.xlu0 %2068 }
 0x682   : > { %4306 = vset.pattern.permute.xlu1 %v6201_v63 }
 0x683   : > { %2402 = vperm.xlu1 %4306, %v2010_v1   ;;  %4308 = vset.pattern.permute.xlu0 %v6199_v14 }
 0x684   : > { %2986 = vperm.xlu0 %4308, %v2010_v1   ;;  %v5357_v1 = vpop.f32.mrb[66].mxu1 }
 0x685   : > { %v5270_v9 = vpop.permute.xlu1 %2926 }
 0x686   : > { %v5273_v12 = vpop.permute.xlu0 %2646 }
 0x687   : > { %6244 = vst [vmem:[#allocation19_spill] sm:$0xff] %v5273_v12  ;;  %4309 = vset.pattern.permute.xlu1 %v6203_v0 }
 0x688   : > { %2123 = vperm.xlu1 %4309, %v2009_v10   ;;  %4310 = vset.pattern.permute.xlu0 %v6201_v63 }
 0x689   : > { %2398 = vperm.xlu0 %4310, %v2009_v10  }
 0x68a   : > { %v5277_v13 = vpop.permute.xlu1 %2354 }
 0x68b   : > { %6245 = vst [vmem:[#allocation20_spill] sm:$0xff] %v5277_v13  ;;  %v5280_v16 = vpop.permute.xlu0 %2938 }
 0x68c   : > { %6246 = vst [vmem:[#allocation21_spill] sm:$0xff] %v5280_v16  ;;  %4311 = vset.pattern.permute.xlu1 %v6197_v11 }
 0x68d   : > { %2690 = vperm.xlu1 %4311, %v2009_v10   ;;  %4313 = vset.pattern.permute.xlu0 %v6203_v0 }
 0x68e   : > { %2138 = vperm.xlu0 %4313, %v2012_v15  }
 0x68f   : > { %v5286_v18 = vpop.permute.xlu1 %2063 }
 0x690   : > { %6247 = vst [vmem:[#allocation22_spill] sm:$0xff] %v5286_v18  ;;  %v5289_v19 = vpop.permute.xlu0 %2350 }
 0x691   : > { %4312 = vset.pattern.permute.xlu1 %v6199_v14  ;;  %6248 = vst [vmem:[#allocation23_spill] sm:$0xff] %v5289_v19 }
 0x692   : > { %2982 = vperm.xlu1 %4312, %v2009_v10   ;;  %4315 = vset.pattern.permute.xlu0 %v6197_v11 }
 0x693   : > { %2702 = vperm.xlu0 %4315, %v2012_v15  }
 0x694   : > { %v5292_v20 = vpop.permute.xlu1 %2642 }
 0x695   : > { %6249 = vst [vmem:[#allocation24_spill] sm:$0xff] %v5292_v20  ;;  %v5294_v21 = vpop.permute.xlu0 %2078  ;;  %v2027_v20 = vmax.f32 %v5343_v40, 0.0 }
 0x696   : > { %6250 = vst [vmem:[#allocation25_spill] sm:$0xff] %v5294_v21  ;;  %4314 = vset.pattern.permute.xlu1 %v6201_v63 }
 0x697   : > { %2410 = vperm.xlu1 %4314, %v2012_v15   ;;  %4316 = vset.pattern.permute.xlu0 %v6199_v14 }
 0x698   : > { %2994 = vperm.xlu0 %4316, %v2012_v15   ;;  %v2015_v15 = vmax.f32 %v5187_v55, 0.0 }
 0x699   : > { %v5300_v23 = vpop.permute.xlu1 %2934 }
 0x69a   : > { %6251 = vst [vmem:[#allocation26_spill] sm:$0xff] %v5300_v23  ;;  %v5303_v25 = vpop.permute.xlu0 %2654 }
 0x69b   : > { %6252 = vst [vmem:[#allocation27_spill] sm:$0xff] %v5303_v25  ;;  %4317 = vset.pattern.permute.xlu1 %v6203_v0 }
 0x69c   : > { %2133 = vperm.xlu1 %4317, %v2011_v24   ;;  %4318 = vset.pattern.permute.xlu0 %v6201_v63 }
 0x69d   : > { %2406 = vperm.xlu0 %4318, %v2011_v24  }
 0x69e   : > { %v5307_v48 = vpop.permute.xlu1 %2362 }
 0x69f   : > { %6253 = vst [vmem:[#allocation28_spill] sm:$0xff] %v5307_v48  ;;  %v5310_v53 = vpop.permute.xlu0 %2946  ;;  %v2025_v48 = vmax.f32 %v5313_v39, 0.0 }
 0x6a0   : > { %6254 = vst [vmem:[#allocation29_spill] sm:$0xff] %v5310_v53  ;;  %4319 = vset.pattern.permute.xlu1 %v6197_v11 }
 0x6a1   : > { %2698 = vperm.xlu1 %4319, %v2011_v24   ;;  %4321 = vset.pattern.permute.xlu0 %v6203_v0 }
 0x6a2   : > { %2148 = vperm.xlu0 %4321, %v2014_v45  }
 0x6a3   : > { %v5316_v30 = vpop.permute.xlu1 %2073 }
 0x6a4   : > { %6255 = vst [vmem:[#allocation30_spill] sm:$0xff] %v5316_v30  ;;  %v5319_v37 = vpop.permute.xlu0 %2358 }
 0x6a5   : > { %4320 = vset.pattern.permute.xlu1 %v6199_v14  ;;  %6256 = vst [vmem:[#allocation31_spill] sm:$0xff] %v5319_v37 }
 0x6a6   : > { %2990 = vperm.xlu1 %4320, %v2011_v24   ;;  %4323 = vset.pattern.permute.xlu0 %v6197_v11 }
 0x6a7   : > { %2710 = vperm.xlu0 %4323, %v2014_v45  }
 0x6a8   : > { %v5322_v26 = vpop.permute.xlu1 %2650 }
 0x6a9   : > { %6257 = vst [vmem:[#allocation32_spill] sm:$0xff] %v5322_v26  ;;  %v5324_v49 = vpop.permute.xlu0 %2088  ;;  %v2022_v26 = vmax.f32 %v5238_v58, 0.0 }
 0x6aa   : > { %6258 = vst [vmem:[#allocation33_spill] sm:$0xff] %v5324_v49  ;;  %4322 = vset.pattern.permute.xlu1 %v6201_v63 }
 0x6ab   : > { %2418 = vperm.xlu1 %4322, %v2014_v45   ;;  %4324 = vset.pattern.permute.xlu0 %v6199_v14 }
 0x6ac   : > { %3002 = vperm.xlu0 %4324, %v2014_v45  }
 0x6ad   : > { %v5330_v33 = vpop.permute.xlu1 %2942 }
 0x6ae   : > { %6259 = vst [vmem:[#allocation34_spill] sm:$0xff] %v5330_v33  ;;  %v5333_v41 = vpop.permute.xlu0 %2662 }
 0x6af   : > { %6260 = vst [vmem:[#allocation35_spill] sm:$0xff] %v5333_v41  ;;  %4325 = vset.pattern.permute.xlu1 %v6203_v0 }
 0x6b0   : > { %2143 = vperm.xlu1 %4325, %v2013_v51   ;;  %4326 = vset.pattern.permute.xlu0 %v6201_v63 }
 0x6b1   : > { %2414 = vperm.xlu0 %4326, %v2013_v51  }
 0x6b2   : > { %v5337_v32 = vpop.permute.xlu1 %2370 }
 0x6b3   : > { %6261 = vst [vmem:[#allocation36_spill] sm:$0xff] %v5337_v32  ;;  %v5340_v42 = vpop.permute.xlu0 %2954  ;;  %v2019_v32 = vmax.f32 %v5223_v47, 0.0 }
 0x6b4   : > { %6262 = vst [vmem:[#allocation37_spill] sm:$0xff] %v5340_v42  ;;  %4327 = vset.pattern.permute.xlu1 %v6197_v11  ;;  %v2020_v42 = vmax.f32 %v5208_v54, 0.0 }
 0x6b5   : > { %2706 = vperm.xlu1 %4327, %v2013_v51   ;;  %4329 = vset.pattern.permute.xlu0 %v6203_v0 }
 0x6b6   : > { %2158 = vperm.xlu0 %4329, %v2016_v46  }
 0x6b7   : > { %v5346_v34 = vpop.permute.xlu1 %2083 }
 0x6b8   : > { %6263 = vst [vmem:[#allocation38_spill] sm:$0xff] %v5346_v34  ;;  %v5349_v50 = vpop.permute.xlu0 %2366  ;;  %v6271_v34 = vmov 0  }
 0x6b9   : > { %4328 = vset.pattern.permute.xlu1 %v6199_v14  ;;  %6264 = vst [vmem:[#allocation39_spill] sm:$0xff] %v5349_v50  ;;  %v2017_v50 = vmax.f32 %v5201_v38, 0.0 }
 0x6ba   : > { %2998 = vperm.xlu1 %4328, %v2013_v51   ;;  %4331 = vset.pattern.permute.xlu0 %v6197_v11  ;;  %v2018_v51 = vmax.f32 %v5194_v27, 0.0 }
 0x6bb   : > { %2718 = vperm.xlu0 %4331, %v2016_v46  }
 0x6bc   : > { %v5352_v44 = vpop.permute.xlu1 %2658 }
 0x6bd   : > { %6265 = vst [vmem:[#allocation40_spill] sm:$0xff] %v5352_v44  ;;  %v5354_v60 = vpop.permute.xlu0 %2098 }
 0x6be   : > { %4330 = vset.pattern.permute.xlu1 %v6201_v63 }
 0x6bf   : > { %2426 = vperm.xlu1 %4330, %v2016_v46   ;;  %4332 = vset.pattern.permute.xlu0 %v6199_v14  ;;  %v6267_v14 = vmov 2  }
 0x6c0   : > { %3010 = vperm.xlu0 %4332, %v2016_v46   ;;  %v5373_v46 = vpop.f32.mrb[67].mxu1 }
 0x6c1   : > { %v5360_v10 = vpop.permute.xlu1 %2950  ;;  %v5387_v44 = vpop.f32.mrb[68].mxu1 }
 0x6c2   : > { %6266 = vst [vmem:[#allocation41_spill] sm:$0xff] %v5360_v10  ;;  %v5363_v24 = vpop.permute.xlu0 %2670 }
 0x6c3   : > { %4333 = vset.pattern.permute.xlu1 %v6203_v0 }
 0x6c4   : > { %2153 = vperm.xlu1 %4333, %v2015_v15   ;;  %4334 = vset.pattern.permute.xlu0 %v6201_v63 }
 0x6c5   : > { %2422 = vperm.xlu0 %4334, %v2015_v15  }
 0x6c6   : > { %v5367_v45 = vpop.permute.xlu1 %2378 }
 0x6c7   : > { %v5370_v11 = vpop.permute.xlu0 %2962 }
 0x6c8   : > { %4335 = vset.pattern.permute.xlu1 %v6267_v14 }
 0x6c9   : > { %2714 = vperm.xlu1 %4335, %v2015_v15   ;;  %4337 = vset.pattern.permute.xlu0 %v6203_v0 }
 0x6ca   : > { %2168 = vperm.xlu0 %4337, %v2018_v51  }
 0x6cb   : > { %v5376_v55 = vpop.permute.xlu1 %2093 }
 0x6cc   : > { %v5379_v63 = vpop.permute.xlu0 %2374 }
 0x6cd   : > { %4336 = vset.pattern.permute.xlu1 %v6268_v57 }
 0x6ce   : > { %3006 = vperm.xlu1 %4336, %v2015_v15   ;;  %4339 = vset.pattern.permute.xlu0 %v6267_v14 }
 0x6cf   : > { %2726 = vperm.xlu0 %4339, %v2018_v51  }
 0x6d0   : > { %v5382_v27 = vpop.permute.xlu1 %2666 }
 0x6d1   : > { %v5384_v10 = vpop.permute.xlu0 %2108 }
 0x6d2   : > { %4338 = vset.pattern.permute.xlu1 %v6269_v36 }
 0x6d3   : > { %2434 = vperm.xlu1 %4338, %v2018_v51   ;;  %4340 = vset.pattern.permute.xlu0 %v6268_v57 }
 0x6d4   : > { %3018 = vperm.xlu0 %4340, %v2018_v51   ;;  %v5403_v51 = vpop.f32.mrb[69].mxu1 }
 0x6d5   : > { %v5390_v0 = vpop.permute.xlu1 %2958  ;;  %v5417_v41 = vpop.f32.mrb[70].mxu1 }
 0x6d6   : > { %v5393_v15 = vpop.permute.xlu0 %2678 }
 0x6d7   : > { %6270 = vst [vmem:[#allocation42_spill] sm:$0xff] %v5393_v15  ;;  %4341 = vset.pattern.permute.xlu1 %v6271_v34 }
 0x6d8   : > { %2163 = vperm.xlu1 %4341, %v2017_v50   ;;  %4342 = vset.pattern.permute.xlu0 %v6269_v36 }
 0x6d9   : > { %2430 = vperm.xlu0 %4342, %v2017_v50  }
 0x6da   : > { %v5397_v28 = vpop.permute.xlu1 %2386 }
 0x6db   : > { %v5400_v56 = vpop.permute.xlu0 %2970 }
 0x6dc   : > { %6272 = vst [vmem:[#allocation43_spill] sm:$0xff] %v5400_v56  ;;  %4343 = vset.pattern.permute.xlu1 %v6267_v14 }
 0x6dd   : > { %2722 = vperm.xlu1 %4343, %v2017_v50   ;;  %4345 = vset.pattern.permute.xlu0 %v6271_v34 }
 0x6de   : > { %2178 = vperm.xlu0 %4345, %v2020_v42  }
 0x6df   : > { %v5406_v38 = vpop.permute.xlu1 %2103 }
 0x6e0   : > { %6273 = vst [vmem:[#allocation44_spill] sm:$0xff] %v5406_v38  ;;  %v5409_v31 = vpop.permute.xlu0 %2382 }
 0x6e1   : > { %4344 = vset.pattern.permute.xlu1 %v6268_v57  ;;  %6274 = vst [vmem:[#allocation45_spill] sm:$0xff] %v5409_v31 }
 0x6e2   : > { %3014 = vperm.xlu1 %4344, %v2017_v50   ;;  %4347 = vset.pattern.permute.xlu0 %v6267_v14 }
 0x6e3   : > { %2734 = vperm.xlu0 %4347, %v2020_v42  }
 0x6e4   : > { %v5412_v54 = vpop.permute.xlu1 %2674 }
 0x6e5   : > { %6275 = vst [vmem:[#allocation46_spill] sm:$0xff] %v5412_v54  ;;  %v5414_v29 = vpop.permute.xlu0 %2118 }
 0x6e6   : > { %6276 = vst [vmem:[#allocation47_spill] sm:$0xff] %v5414_v29  ;;  %4346 = vset.pattern.permute.xlu1 %v6269_v36  ;;  %v2028_v29 = vmax.f32 %v5328_v43, 0.0 }
 0x6e7   : > { %2442 = vperm.xlu1 %4346, %v2020_v42   ;;  %4348 = vset.pattern.permute.xlu0 %v6268_v57 }
 0x6e8   : > { %3026 = vperm.xlu0 %4348, %v2020_v42   ;;  %v5433_v42 = vpop.f32.mrb[71].mxu1 }
 0x6e9   : > { %v5420_v33 = vpop.permute.xlu1 %2966 }
 0x6ea   : > { %6277 = vst [vmem:[#allocation48_spill] sm:$0xff] %v5420_v33  ;;  %v5423_v50 = vpop.permute.xlu0 %2686 }
 0x6eb   : > { %6278 = vst [vmem:[#allocation49_spill] sm:$0xff] %v5423_v50  ;;  %4349 = vset.pattern.permute.xlu1 %v6271_v34 }
 0x6ec   : > { %2173 = vperm.xlu1 %4349, %v2019_v32   ;;  %4350 = vset.pattern.permute.xlu0 %v6269_v36 }
 0x6ed   : > { %2438 = vperm.xlu0 %4350, %v2019_v32  }
 0x6ee   : > { %v5427_v49 = vpop.permute.xlu1 %2394 }
 0x6ef   : > { %6279 = vst [vmem:[#allocation50_spill] sm:$0xff] %v5427_v49  ;;  %v5430_v35 = vpop.permute.xlu0 %2978 }
 0x6f0   : > { %6280 = vst [vmem:[#allocation51_spill] sm:$0xff] %v5430_v35  ;;  %4351 = vset.pattern.permute.xlu1 %v6267_v14 }
 0x6f1   : > { %2730 = vperm.xlu1 %4351, %v2019_v32   ;;  %4353 = vset.pattern.permute.xlu0 %v6271_v34 }
 0x6f2   : > { %2188 = vperm.xlu0 %4353, %v2022_v26  }
 0x6f3   : > { %v5436_v47 = vpop.permute.xlu1 %2113 }
 0x6f4   : > { %6281 = vst [vmem:[#allocation52_spill] sm:$0xff] %v5436_v47  ;;  %v5439_v52 = vpop.permute.xlu0 %2390  ;;  %v2021_v47 = vmax.f32 %v5253_v3, 0.0 }
 0x6f5   : > { %4352 = vset.pattern.permute.xlu1 %v6268_v57  ;;  %6282 = vst [vmem:[#allocation53_spill] sm:$0xff] %v5439_v52 }
 0x6f6   : > { %3022 = vperm.xlu1 %4352, %v2019_v32   ;;  %4355 = vset.pattern.permute.xlu0 %v6267_v14  ;;  %v5454_v32 = vpop.f32.mrb[72].mxu1 }
 0x6f7   : > { %2742 = vperm.xlu0 %4355, %v2022_v26  }
 0x6f8   : > { %v5442_v58 = vpop.permute.xlu1 %2682 }
 0x6f9   : > { %6283 = vst [vmem:[#allocation54_spill] sm:$0xff] %v5442_v58  ;;  %v5444_v37 = vpop.permute.xlu0 %2128  ;;  %v2024_v58 = vmax.f32 %v5268_v8, 0.0 }
 0x6fa   : > { %6284 = vst [vmem:[#allocation55_spill] sm:$0xff] %v5444_v37  ;;  %4354 = vset.pattern.permute.xlu1 %v6269_v36 }
 0x6fb   : > { %2450 = vperm.xlu1 %4354, %v2022_v26   ;;  %4356 = vset.pattern.permute.xlu0 %v6268_v57 }
 0x6fc   : > { %3034 = vperm.xlu0 %4356, %v2022_v26   ;;  %v5463_v26 = vpop.f32.mrb[73].mxu1 }
 0x6fd   : > { %v5448_v30 = vpop.permute.xlu1 %2974 }
 0x6fe   : > { %6285 = vst [vmem:[#allocation56_spill] sm:$0xff] %v5448_v30  ;;  %v5451_v53 = vpop.permute.xlu0 %2694 }
 0x6ff   : > { %6286 = vst [vmem:[#allocation57_spill] sm:$0xff] %v5451_v53  ;;  %4357 = vset.pattern.permute.xlu1 %v6271_v34 }
 0x700   : > { %2183 = vperm.xlu1 %4357, %v2021_v47   ;;  %4358 = vset.pattern.permute.xlu0 %v6269_v36 }
 0x701   : > { %2446 = vperm.xlu0 %4358, %v2021_v47  }
 0x702   : > { %v5457_v37 = vpop.permute.xlu1 %2402 }
 0x703   : > { %6287 = vst [vmem:[#allocation58_spill] sm:$0xff] %v5457_v37  ;;  %v5460_v52 = vpop.permute.xlu0 %2986 }
 0x704   : > { %6288 = vst [vmem:[#allocation59_spill] sm:$0xff] %v5460_v52  ;;  %4359 = vset.pattern.permute.xlu1 %v6267_v14 }
 0x705   : > { %2738 = vperm.xlu1 %4359, %v2021_v47   ;;  %4361 = vset.pattern.permute.xlu0 %v6271_v34 }
 0x706   : > { %2198 = vperm.xlu0 %4361, %v2024_v58  }
 0x707   : > { %v5466_v3 = vpop.permute.xlu1 %2123 }
 0x708   : > { %6289 = vst [vmem:[#allocation60_spill] sm:$0xff] %v5466_v3  ;;  %v5469_v53 = vpop.permute.xlu0 %2398  ;;  %v2023_v3 = vmax.f32 %v5283_v17, 0.0 }
 0x709   : > { %4360 = vset.pattern.permute.xlu1 %v6268_v57  ;;  %6290 = vst [vmem:[#allocation61_spill] sm:$0xff] %v5469_v53  ;;  %v2026_v53 = vmax.f32 %v5298_v22, 0.0 }
 0x70a   : > { %3030 = vperm.xlu1 %4360, %v2021_v47   ;;  %4363 = vset.pattern.permute.xlu0 %v6267_v14  ;;  %v5484_v47 = vpop.f32.mrb[74].mxu1 }
 0x70b   : > { %2750 = vperm.xlu0 %4363, %v2024_v58  }
 0x70c   : > { %v5472_v8 = vpop.permute.xlu1 %2690 }
 0x70d   : > { %6291 = vst [vmem:[#allocation62_spill] sm:$0xff] %v5472_v8  ;;  %v5474_v52 = vpop.permute.xlu0 %2138 }
 0x70e   : > { %4362 = vset.pattern.permute.xlu1 %v6269_v36 }
 0x70f   : > { %2458 = vperm.xlu1 %4362, %v2024_v58   ;;  %4364 = vset.pattern.permute.xlu0 %v6268_v57 }
 0x710   : > { %3042 = vperm.xlu0 %4364, %v2024_v58   ;;  %v5493_v58 = vpop.f32.mrb[75].mxu1 }
 0x711   : > { %v5478_v37 = vpop.permute.xlu1 %2982 }
 0x712   : > { %6292 = vst [vmem:[#allocation63_spill] sm:$0xff] %v5478_v37  ;;  %v5481_v30 = vpop.permute.xlu0 %2702 }
 0x713   : > { %4365 = vset.pattern.permute.xlu1 %v6271_v34 }
 0x714   : > { %2193 = vperm.xlu1 %4365, %v2023_v3   ;;  %4366 = vset.pattern.permute.xlu0 %v6269_v36 }
 0x715   : > { %2454 = vperm.xlu0 %4366, %v2023_v3  }
 0x716   : > { %v5487_v8 = vpop.permute.xlu1 %2410 }
 0x717   : > { %v5490_v35 = vpop.permute.xlu0 %2994 }
 0x718   : > { %4367 = vset.pattern.permute.xlu1 %v6267_v14 }
 0x719   : > { %2746 = vperm.xlu1 %4367, %v2023_v3   ;;  %4369 = vset.pattern.permute.xlu0 %v6271_v34 }
 0x71a   : > { %2208 = vperm.xlu0 %4369, %v2026_v53  }
 0x71b   : > { %v5496_v17 = vpop.permute.xlu1 %2133 }
 0x71c   : > { %v5499_v37 = vpop.permute.xlu0 %2406 }
 0x71d   : > { %4368 = vset.pattern.permute.xlu1 %v6268_v57 }
 0x71e   : > { %3038 = vperm.xlu1 %4368, %v2023_v3   ;;  %4371 = vset.pattern.permute.xlu0 %v6267_v14  ;;  %v5514_v3 = vpop.f32.mrb[76].mxu1 }
 0x71f   : > { %2758 = vperm.xlu0 %4371, %v2026_v53   ;;  %v5529_v21 = vpop.f32.mrb[77].mxu1 }
 0x720   : > { %v5502_v22 = vpop.permute.xlu1 %2698 }
 0x721   : > { %v5504_v25 = vpop.permute.xlu0 %2148 }
 0x722   : > { %6293 = vst [vmem:[#allocation64_spill] sm:$0xff] %v5504_v25  ;;  %4370 = vset.pattern.permute.xlu1 %v6269_v36 }
 0x723   : > { %2466 = vperm.xlu1 %4370, %v2026_v53   ;;  %4372 = vset.pattern.permute.xlu0 %v6268_v57 }
 0x724   : > { %3050 = vperm.xlu0 %4372, %v2026_v53  }
 0x725   : > { %v5508_v50 = vpop.permute.xlu1 %2990 }
 0x726   : > { %v5511_v23 = vpop.permute.xlu0 %2710 }
 0x727   : > { %6294 = vst [vmem:[#allocation65_spill] sm:$0xff] %v5511_v23  ;;  %4373 = vset.pattern.permute.xlu1 %v6271_v34 }
 0x728   : > { %2203 = vperm.xlu1 %4373, %v2025_v48   ;;  %4374 = vset.pattern.permute.xlu0 %v6269_v36 }
 0x729   : > { %2462 = vperm.xlu0 %4374, %v2025_v48  }
 0x72a   : > { %v5517_v49 = vpop.permute.xlu1 %2418 }
 0x72b   : > { %6295 = vst [vmem:[#allocation66_spill] sm:$0xff] %v5517_v49  ;;  %v5520_v33 = vpop.permute.xlu0 %3002 }
 0x72c   : > { %6296 = vst [vmem:[#allocation67_spill] sm:$0xff] %v5520_v33  ;;  %4375 = vset.pattern.permute.xlu1 %v6267_v14 }
 0x72d   : > { %2754 = vperm.xlu1 %4375, %v2025_v48   ;;  %4377 = vset.pattern.permute.xlu0 %v6271_v34 }
 0x72e   : > { %2218 = vperm.xlu0 %4377, %v2028_v29  }
 0x72f   : > { %v5524_v53 = vpop.permute.xlu1 %2143 }
 0x730   : > { %6297 = vst [vmem:[#allocation68_spill] sm:$0xff] %v5524_v53  ;;  %v5527_v39 = vpop.permute.xlu0 %2414 }
 0x731   : > { %4376 = vset.pattern.permute.xlu1 %v6268_v57  ;;  %6298 = vst [vmem:[#allocation69_spill] sm:$0xff] %v5527_v39  ;;  %v2030_v39 = vmax.f32 %v5357_v1, 0.0  ;;  %v2029_v1 = vmax.f32 %v5373_v46, 0.0  ;;  %v2032_v46 = vmax.f32 %v5387_v44, 0.0  ;;  %v2031_v44 = vmax.f32 %v5403_v51, 0.0 }
 0x732   : > { %3046 = vperm.xlu1 %4376, %v2025_v48   ;;  %4379 = vset.pattern.permute.xlu0 %v6267_v14  ;;  %v2034_v51 = vmax.f32 %v5417_v41, 0.0 }
 0x733   : > { %2766 = vperm.xlu0 %4379, %v2028_v29  }
 0x734   : > { %v5532_v43 = vpop.permute.xlu1 %2706 }
 0x735   : > { %6299 = vst [vmem:[#allocation70_spill] sm:$0xff] %v5532_v43  ;;  %v5535_v54 = vpop.permute.xlu0 %2158 }
 0x736   : > { %6300 = vst [vmem:[#allocation71_spill] sm:$0xff] %v5535_v54  ;;  %4378 = vset.pattern.permute.xlu1 %v6269_v36 }
 0x737   : > { %2474 = vperm.xlu1 %4378, %v2028_v29   ;;  %4382 = vset.pattern.permute.xlu0 %v6269_v36 }
 0x738   : > { %2470 = vperm.xlu0 %4382, %v2027_v20  }
 0x739   : > { %v5539_v53 = vpop.permute.xlu1 %2998 }
 0x73a   : > { %6301 = vst [vmem:[#allocation72_spill] sm:$0xff] %v5539_v53  ;;  %v5542_v48 = vpop.permute.xlu0 %2718 }
 0x73b   : > { %6302 = vst [vmem:[#allocation73_spill] sm:$0xff] %v5542_v48  ;;  %4380 = vset.pattern.permute.xlu1 %v6268_v57 }
 0x73c   : > { %3058 = vperm.xlu1 %4380, %v2028_v29   ;;  %4385 = vset.pattern.permute.xlu0 %v6271_v34 }
 0x73d   : > { %2228 = vperm.xlu0 %4385, %v2030_v39  }
 0x73e   : > { %v5546_v40 = vpop.permute.xlu1 %2426 }
 0x73f   : > { %6303 = vst [vmem:[#allocation74_spill] sm:$0xff] %v5546_v40  ;;  %v5548_v54 = vpop.permute.xlu0 %3010 }
 0x740   : > { %6304 = vst [vmem:[#allocation75_spill] sm:$0xff] %v5548_v54  ;;  %4381 = vset.pattern.permute.xlu1 %v6271_v34 }
 0x741   : > { %2213 = vperm.xlu1 %4381, %v2027_v20   ;;  %4387 = vset.pattern.permute.xlu0 %v6267_v14 }
 0x742   : > { %2774 = vperm.xlu0 %4387, %v2030_v39  }
 0x743   : > { %v5552_v53 = vpop.permute.xlu1 %2153 }
 0x744   : > { %6305 = vst [vmem:[#allocation76_spill] sm:$0xff] %v5552_v53  ;;  %v5556_v29 = vpop.permute.xlu0 %2422 }
 0x745   : > { %4383 = vset.pattern.permute.xlu1 %v6267_v14  ;;  %6306 = vst [vmem:[#allocation77_spill] sm:$0xff] %v5556_v29 }
 0x746   : > { %2762 = vperm.xlu1 %4383, %v2027_v20   ;;  %4390 = vset.pattern.permute.xlu0 %v6269_v36 }
 0x747   : > { %2478 = vperm.xlu0 %4390, %v2029_v1  }
 0x748   : > { %v5559_v48 = vpop.permute.xlu1 %2714 }
 0x749   : > { %6307 = vst [vmem:[#allocation78_spill] sm:$0xff] %v5559_v48  ;;  %v5561_v54 = vpop.permute.xlu0 %2168 }
 0x74a   : > { %6308 = vst [vmem:[#allocation79_spill] sm:$0xff] %v5561_v54  ;;  %4384 = vset.pattern.permute.xlu1 %v6268_v57 }
 0x74b   : > { %3054 = vperm.xlu1 %4384, %v2027_v20   ;;  %4392 = vset.pattern.permute.xlu0 %v6268_v57 }
 0x74c   : > { %3062 = vperm.xlu0 %4392, %v2029_v1  }
 0x74d   : > { %v5565_v53 = vpop.permute.xlu1 %3006 }
 0x74e   : > { %6309 = vst [vmem:[#allocation80_spill] sm:$0xff] %v5565_v53  ;;  %v5568_v40 = vpop.permute.xlu0 %2726 }
 0x74f   : > { %6310 = vst [vmem:[#allocation81_spill] sm:$0xff] %v5568_v40  ;;  %4386 = vset.pattern.permute.xlu1 %v6269_v36 }
 0x750   : > { %2482 = vperm.xlu1 %4386, %v2030_v39   ;;  %4393 = vset.pattern.permute.xlu0 %v6271_v34 }
 0x751   : > { %2238 = vperm.xlu0 %4393, %v2032_v46  }
 0x752   : > { %v5572_v48 = vpop.permute.xlu1 %2434 }
 0x753   : > { %6311 = vst [vmem:[#allocation82_spill] sm:$0xff] %v5572_v48  ;;  %v5574_v54 = vpop.permute.xlu0 %3018 }
 0x754   : > { %6312 = vst [vmem:[#allocation83_spill] sm:$0xff] %v5574_v54  ;;  %4388 = vset.pattern.permute.xlu1 %v6268_v57 }
 0x755   : > { %3066 = vperm.xlu1 %4388, %v2030_v39   ;;  %4395 = vset.pattern.permute.xlu0 %v6267_v14 }
 0x756   : > { %2782 = vperm.xlu0 %4395, %v2032_v46  }
 0x757   : > { %v5578_v20 = vpop.permute.xlu1 %2163 }
 0x758   : > { %6313 = vst [vmem:[#allocation84_spill] sm:$0xff] %v5578_v20  ;;  %v5582_v40 = vpop.permute.xlu0 %2430 }
 0x759   : > { %4389 = vset.pattern.permute.xlu1 %v6271_v34  ;;  %6314 = vst [vmem:[#allocation85_spill] sm:$0xff] %v5582_v40 }
 0x75a   : > { %2223 = vperm.xlu1 %4389, %v2029_v1   ;;  %4398 = vset.pattern.permute.xlu0 %v6269_v36 }
 0x75b   : > { %2486 = vperm.xlu0 %4398, %v2031_v44  }
 0x75c   : > { %v5585_v48 = vpop.permute.xlu1 %2722 }
 0x75d   : > { %6315 = vst [vmem:[#allocation86_spill] sm:$0xff] %v5585_v48  ;;  %v5587_v54 = vpop.permute.xlu0 %2178 }
 0x75e   : > { %4391 = vset.pattern.permute.xlu1 %v6267_v14 }
 0x75f   : > { %2770 = vperm.xlu1 %4391, %v2029_v1   ;;  %4400 = vset.pattern.permute.xlu0 %v6268_v57  ;;  %v2281_v1 = vlaneseq }
 0x760   : > { %3070 = vperm.xlu0 %4400, %v2031_v44  }
 0x761   : > { %v5591_v39 = vpop.permute.xlu1 %3014  ;;  %v2282_v29 = vshrl.u32 %v2281_v1, 7  ;;  %v5621_v1 = vmax.f32 %v5454_v32, 0.0  ;;  %v5632_v32 = vmax.f32 %v5463_v26, 0.0 }
 0x762   : > { %6316 = vst [vmem:[#allocation87_spill] sm:$0xff] %v5591_v39  ;;  %v5594_v20 = vpop.permute.xlu0 %2734  ;;  %v2033_v39 = vmax.f32 %v5433_v42, 0.0  ;;  %v1509_v42 = vld [vmem:[%s6178_s8] sm:$0xf] }
 0x763   : > { %4394 = vset.pattern.permute.xlu1 %v6269_v36  ;;  %v2283_v31 = vsub.s32 0, %v2282_v29  ;;  %v2527_v38 = vsub.s32 1, %v2282_v29  ;;  %v2819_v16 = vsub.s32 2, %v2282_v29  ;;  %v3111_v56 = vsub.s32 3, %v2282_v29 }
 0x764   : > { %2490 = vperm.xlu1 %4394, %v2032_v46   ;;  %4401 = vset.pattern.permute.xlu0 %v6271_v34 }
 0x765   : > { %2248 = vperm.xlu0 %4401, %v2034_v51   ;;  %v5623_v33 = vrot.slane %v1509_v42, %v2283_v31  ;;  %v5634_v15 = vrot.slane %v1509_v42, %v2819_v16  ;;  %v5638_v49 = vrot.slane %v1509_v42, %v3111_v56 }
 0x766   : > { %v5598_v48 = vpop.permute.xlu1 %2442 }
 0x767   : > { %v5600_v40 = vpop.permute.xlu0 %3026 }
 0x768   : > { %4396 = vset.pattern.permute.xlu1 %v6268_v57 }
 0x769   : > { %3074 = vperm.xlu1 %4396, %v2032_v46   ;;  %4403 = vset.pattern.permute.xlu0 %v6267_v14 }
 0x76a   : > { %2790 = vperm.xlu0 %4403, %v2034_v51  }
 0x76b   : > { %v5604_v41 = vpop.permute.xlu1 %2173 }
 0x76c   : > { %v5608_v53 = vpop.permute.xlu0 %2438 }
 0x76d   : > { %4397 = vset.pattern.permute.xlu1 %v6271_v34 }
 0x76e   : > { %2233 = vperm.xlu1 %4397, %v2031_v44   ;;  %4406 = vset.pattern.permute.xlu0 %v6269_v36 }
 0x76f   : > { %2494 = vperm.xlu0 %4406, %v2033_v39  }
 0x770   : > { %v5611_v43 = vpop.permute.xlu1 %2730 }
 0x771   : > { %v2189_v46 = vpop.permute.xlu0 %2188 }
 0x772   : > { %4399 = vset.pattern.permute.xlu1 %v6267_v14  ;;  %v2314_v23 = vmul.f32 %v5623_v33, %v2189_v46 }
 0x773   : > { %2778 = vperm.xlu1 %4399, %v2031_v44   ;;  %4408 = vset.pattern.permute.xlu0 %v6268_v57  ;;  %v5627_v44 = vrot.slane %v1509_v42, %v2527_v38 }
 0x774   : > { %3078 = vperm.xlu0 %4408, %v2033_v39  }
 0x775   : > { %v5618_v19 = vpop.permute.xlu1 %3022 }
 0x776   : > { %6317 = vst [vmem:[#allocation88_spill] sm:$0xff] %v5618_v19  ;;  %v2743_v18 = vpop.permute.xlu0 %2742 }
 0x777   : > { %4402 = vset.pattern.permute.xlu1 %v6269_v36  ;;  %v2850_v29 = vmul.f32 %v5634_v15, %v2743_v18 }
 0x778   : > { %2498 = vperm.xlu1 %4402, %v2034_v51   ;;  %4409 = vset.pattern.permute.xlu0 %v6271_v34 }
 0x779   : > { %2258 = vperm.xlu0 %4409, %v5621_v1  }
 0x77a   : > { %v2451_v12 = vpop.permute.xlu1 %2450 }
 0x77b   : > { %v2558_v31 = vmul.f32 %v5627_v44, %v2451_v12  ;;  %v3035_v19 = vpop.permute.xlu0 %3034 }
 0x77c   : > { %4404 = vset.pattern.permute.xlu1 %v6268_v57  ;;  %v3142_v26 = vmul.f32 %v5638_v49, %v3035_v19 }
 0x77d   : > { %v2606_v38 = vadd.f32 %v2558_v31, %v2314_v23  ;;  %3082 = vperm.xlu1 %4404, %v2034_v51   ;;  %4414 = vset.pattern.permute.xlu0 %v6269_v36  ;;  %v5652_v51 = vmax.f32 %v5484_v47, 0.0 }
 0x77e   : > { %2502 = vperm.xlu0 %4414, %v5632_v32  }
 0x77f   : > { %v2898_v46 = vadd.f32 %v2850_v29, %v2606_v38  ;;  %v2184_v16 = vpop.permute.xlu1 %2183 }
 0x780   : > { %v2313_v25 = vmul.f32 %v5623_v33, %v2184_v16  ;;  %v2447_v12 = vpop.permute.xlu0 %2446 }
 0x781   : > { %v5645_v13 = vadd.f32 %v3142_v26, %v2898_v46  ;;  %4405 = vset.pattern.permute.xlu1 %v6271_v34  ;;  %v2557_v56 = vmul.f32 %v5627_v44, %v2447_v12 }
 0x782   : > { %2243 = vperm.xlu1 %4405, %v2033_v39   ;;  %4416 = vset.pattern.permute.xlu0 %v6268_v57 }
 0x783   : > { %v2605_v18 = vadd.f32 %v2557_v56, %v2313_v25  ;;  %3086 = vperm.xlu0 %4416, %v5632_v32   ;;  %v5659_v25 = vmax.f32 %v5493_v58, 0.0 }
 0x784   : > { %v2739_v23 = vpop.permute.xlu1 %2738 }
 0x785   : > { %v2849_v19 = vmul.f32 %v5634_v15, %v2739_v23  ;;  %v2199_v42 = vpop.permute.xlu0 %2198 }
 0x786   : > { %4407 = vset.pattern.permute.xlu1 %v6267_v14 }
 0x787   : > { %v2897_v31 = vadd.f32 %v2849_v19, %v2605_v18  ;;  %2786 = vperm.xlu1 %4407, %v2033_v39   ;;  %4417 = vset.pattern.permute.xlu0 %v6271_v34  ;;  %v2316_v39 = vmul.f32 %v5623_v33, %v2199_v42 }
 0x788   : > { %2268 = vperm.xlu0 %4417, %v5652_v51  }
 0x789   : > { %v3031_v38 = vpop.permute.xlu1 %3030 }
 0x78a   : > { %v3141_v29 = vmul.f32 %v5638_v49, %v3031_v38  ;;  %v2751_v46 = vpop.permute.xlu0 %2750 }
 0x78b   : > { %4410 = vset.pattern.permute.xlu1 %v6269_v36  ;;  %v2852_v56 = vmul.f32 %v5634_v15, %v2751_v46 }
 0x78c   : > { %v5663_v47 = vadd.f32 %v3141_v29, %v2897_v31  ;;  %2506 = vperm.xlu1 %4410, %v5621_v1   ;;  %4422 = vset.pattern.permute.xlu0 %v6269_v36 }
 0x78d   : > { %2510 = vperm.xlu0 %4422, %v5659_v25  }
 0x78e   : > { %v2459_v26 = vpop.permute.xlu1 %2458 }
 0x78f   : > { %v2560_v16 = vmul.f32 %v5627_v44, %v2459_v26  ;;  %v3043_v58 = vpop.permute.xlu0 %3042  ;;  %v5685_v26 = vmax.f32 %v5514_v3, 0.0 }
 0x790   : > { %4411 = vset.pattern.permute.xlu1 %v6267_v14  ;;  %v3144_v23 = vmul.f32 %v5638_v49, %v3043_v58 }
 0x791   : > { %v2608_v12 = vadd.f32 %v2560_v16, %v2316_v39  ;;  %2798 = vperm.xlu1 %4411, %v5621_v1   ;;  %4423 = vset.pattern.permute.xlu0 %v6267_v14 }
 0x792   : > { %2802 = vperm.xlu0 %4423, %v5659_v25  }
 0x793   : > { %v2900_v18 = vadd.f32 %v2852_v56, %v2608_v12  ;;  %v2194_v19 = vpop.permute.xlu1 %2193 }
 0x794   : > { %v2315_v42 = vmul.f32 %v5623_v33, %v2194_v19  ;;  %v2455_v31 = vpop.permute.xlu0 %2454  ;;  %v5706_v19 = vmax.f32 %v5529_v21, 0.0  ;;  %v2296_v21 = vmul.f32 %v5623_v33, %v5354_v60 }
 0x795   : > { %v5677_v38 = vadd.f32 %v3144_v23, %v2900_v18  ;;  %4412 = vset.pattern.permute.xlu1 %v6268_v57  ;;  %v2559_v29 = vmul.f32 %v5627_v44, %v2455_v31 }
 0x796   : > { %3090 = vperm.xlu1 %4412, %v5621_v1   ;;  %4424 = vset.pattern.permute.xlu0 %v6268_v57 }
 0x797   : > { %v2607_v46 = vadd.f32 %v2559_v29, %v2315_v42  ;;  %3094 = vperm.xlu0 %4424, %v5659_v25  }
 0x798   : > { %v2747_v39 = vpop.permute.xlu1 %2746 }
 0x799   : > { %v2851_v16 = vmul.f32 %v5634_v15, %v2747_v39  ;;  %v5688_v58 = vpop.permute.xlu0 %2208  ;;  %v2540_v39 = vmul.f32 %v5627_v44, %v5367_v45  ;;  %v2312_v45 = vmul.f32 %v5623_v33, %v5587_v54  ;;  %v2824_v54 = vmul.f32 %v5634_v15, %v5250_v2 }
 0x79a   : > { %4413 = vset.pattern.permute.xlu1 %v6271_v34  ;;  %v2848_v2 = vmul.f32 %v5634_v15, %v5594_v20  ;;  %v3140_v20 = vmul.f32 %v5638_v49, %v5600_v40  ;;  %v2295_v40 = vmul.f32 %v5623_v33, %v5376_v55  ;;  %v2823_v55 = vmul.f32 %v5634_v15, %v5262_v6 }
 0x79b   : > { %v2899_v12 = vadd.f32 %v2851_v16, %v2607_v46  ;;  %2253 = vperm.xlu1 %4413, %v5632_v32   ;;  %4425 = vset.pattern.permute.xlu0 %v6271_v34  ;;  %v2304_v16 = vmul.f32 %v5623_v33, %v5474_v52  ;;  %v2588_v60 = vadd.f32 %v2540_v39, %v2296_v21 }
 0x79c   : > { %2278 = vperm.xlu0 %4425, %v5685_v26   ;;  %v2288_v52 = vmul.f32 %v5623_v33, %v5243_v61  ;;  %v2840_v39 = vmul.f32 %v5634_v15, %v5481_v30  ;;  %v2311_v6 = vmul.f32 %v5623_v33, %v5604_v41 }
 0x79d   : > { %v3039_v1 = vpop.permute.xlu1 %3038 }
 0x79e   : > { %v3143_v56 = vmul.f32 %v5638_v49, %v3039_v1  ;;  %v5695_v18 = vpop.permute.xlu0 %2758 }
 0x79f   : > { %4415 = vset.pattern.permute.xlu1 %v6267_v14 }
 0x7a0   : > { %v5698_v3 = vadd.f32 %v3143_v56, %v2899_v12  ;;  %2794 = vperm.xlu1 %4415, %v5632_v32   ;;  %4427 = vset.pattern.permute.xlu0 %v6267_v14  ;;  %v2548_v12 = vmul.f32 %v5627_v44, %v5487_v8 }
 0x7a1   : > { %2814 = vperm.xlu0 %4427, %v5685_v26  }
 0x7a2   : > { %6318 = vst [vmem:[#allocation89_spill] sm:$0xff] %v5698_v3  ;;  %v5703_v23 = vpop.permute.xlu1 %2466 }
 0x7a3   : > { %v5708_v42 = vpop.permute.xlu0 %3050 }
 0x7a4   : > { %6319 = vst [vmem:[#allocation90_spill] sm:$0xff] %v5708_v42  ;;  %4418 = vset.pattern.permute.xlu1 %v6269_v36  ;;  %v2532_v42 = vmul.f32 %v5627_v44, %v5240_v59 }
 0x7a5   : > { %2514 = vperm.xlu1 %4418, %v5652_v51   ;;  %4429 = vset.pattern.permute.xlu0 %v6269_v36 }
 0x7a6   : > { %2518 = vperm.xlu0 %4429, %v5706_v19   ;;  %v2580_v61 = vadd.f32 %v2532_v42, %v2288_v52 }
 0x7a7   : > { %v2204_v32 = vpop.permute.xlu1 %2203 }
 0x7a8   : > { %v2463_v31 = vpop.permute.xlu0 %2462  ;;  %v2317_v29 = vmul.f32 %v5623_v33, %v2204_v32 }
 0x7a9   : > { %4419 = vset.pattern.permute.xlu1 %v6267_v14  ;;  %v2561_v46 = vmul.f32 %v5627_v44, %v2463_v31  ;;  %v2556_v31 = vmul.f32 %v5627_v44, %v5598_v48 }
 0x7aa   : > { %2806 = vperm.xlu1 %4419, %v5652_v51   ;;  %4431 = vset.pattern.permute.xlu0 %v6268_v57 }
 0x7ab   : > { %3102 = vperm.xlu0 %4431, %v5706_v19   ;;  %v2609_v56 = vadd.f32 %v2561_v46, %v2317_v29  ;;  %v2832_v29 = vmul.f32 %v5634_v15, %v5363_v24  ;;  %v2596_v46 = vadd.f32 %v2548_v12, %v2304_v16  ;;  %v3124_v24 = vmul.f32 %v5638_v49, %v5370_v11 }
 0x7ac   : > { %v2755_v1 = vpop.permute.xlu1 %2754 }
 0x7ad   : > { %v2853_v32 = vmul.f32 %v5634_v15, %v2755_v1  ;;  %v2880_v48 = vadd.f32 %v2832_v29, %v2588_v60  ;;  %v2604_v1 = vadd.f32 %v2556_v31, %v2312_v45  ;;  %v2219_v3 = vpop.permute.xlu0 %2218  ;;  %v2888_v16 = vadd.f32 %v2840_v39, %v2596_v46 }
 0x7ae   : > { %4420 = vset.pattern.permute.xlu1 %v6268_v57  ;;  %v2320_v30 = vmul.f32 %v5623_v33, %v2219_v3  ;;  %v2287_v46 = vmul.f32 %v5623_v33, %v5247_v62 }
 0x7af   : > { %v2901_v8 = vadd.f32 %v2853_v32, %v2609_v56  ;;  %3098 = vperm.xlu1 %4420, %v5652_v51   ;;  %v3116_v51 = vmul.f32 %v5638_v49, %v5259_v5  ;;  %v2872_v56 = vadd.f32 %v2824_v54, %v2580_v61  ;;  %v3172_v42 = vadd.f32 %v3124_v24, %v2880_v48 }
 0x7b0   : > { %v3132_v5 = vmul.f32 %v5638_v49, %v5490_v35  ;;  %v2896_v32 = vadd.f32 %v2848_v2, %v2604_v1  ;;  %v2531_v35 = vmul.f32 %v5627_v44, %v5256_v4  ;;  %v2831_v4 = vmul.f32 %v5634_v15, %v5382_v27 }
 0x7b1   : > { %v3047_v21 = vpop.permute.xlu1 %3046  ;;  %v3164_v11 = vadd.f32 %v3116_v51, %v2872_v56  ;;  %v2303_v51 = vmul.f32 %v5623_v33, %v5496_v17  ;;  %v3123_v27 = vmul.f32 %v5638_v49, %v5390_v0  ;;  %v3115_v56 = vmul.f32 %v5638_v49, %v5270_v9 }
 0x7b2   : > { %v3145_v59 = vmul.f32 %v5638_v49, %v3047_v21  ;;  %v3180_v31 = vadd.f32 %v3132_v5, %v2888_v16  ;;  %v2767_v52 = vpop.permute.xlu0 %2766  ;;  %v3188_v29 = vadd.f32 %v3140_v20, %v2896_v32  ;;  %v2579_v1 = vadd.f32 %v2531_v35, %v2287_v46 }
 0x7b3   : > { %4421 = vset.pattern.permute.xlu1 %v6271_v34  ;;  %v2856_v3 = vmul.f32 %v5634_v15, %v2767_v52  ;;  %v2839_v16 = vmul.f32 %v5634_v15, %v5502_v22  ;;  %v2298_v22 = vmul.f32 %v5623_v33, %v5384_v10  ;;  %v2847_v5 = vmul.f32 %v5634_v15, %v5611_v43 }
 0x7b4   : > { %v5753_v12 = vadd.f32 %v3145_v59, %v2901_v8  ;;  %2263 = vperm.xlu1 %4421, %v5659_v25   ;;  %v3212_v8 = vmax.f32 %v3164_v11, %v3172_v42  ;;  %v2542_v42 = vmul.f32 %v5627_v44, %v5397_v28  ;;  %v2871_v9 = vadd.f32 %v2823_v55, %v2579_v1  ;;  %v6321_v11 = vld [vmem:[#allocation64_spill] sm:$0xff] }
 0x7b5   : > { %v2306_v28 = vmul.f32 %v5623_v33, %v6321_v11  ;;  %v6332_v11 = vld [vmem:[#allocation44_spill] sm:$0xff] }
 0x7b6   : > { %v2475_v60 = vpop.permute.xlu1 %2474  ;;  %v3220_v48 = vmax.f32 %v3212_v8, %v3180_v31  ;;  %v2590_v35 = vadd.f32 %v2542_v42, %v2298_v22 }
 0x7b7   : > { %v2564_v45 = vmul.f32 %v5627_v44, %v2475_v60  ;;  %v2471_v62 = vpop.permute.xlu0 %2470  ;;  %v6320_v60 = vld [vmem:[#allocation20_spill] sm:$0xff] }
 0x7b8   : > { %4426 = vset.pattern.permute.xlu1 %v6269_v36  ;;  %v2539_v36 = vmul.f32 %v5627_v44, %v5379_v63  ;;  %v3228_v59 = vmax.f32 %v3220_v48, %v3188_v29  ;;  %v2290_v63 = vmul.f32 %v5623_v33, %v5264_v7  ;;  %v2555_v7 = vmul.f32 %v5627_v44, %v5608_v53 }
 0x7b9   : > { %v2612_v25 = vadd.f32 %v2564_v45, %v2320_v30  ;;  %2522 = vperm.xlu1 %4426, %v5685_v26   ;;  %v3131_v53 = vmul.f32 %v5638_v49, %v5508_v50  ;;  %v2534_v45 = vmul.f32 %v5627_v44, %v6320_v60  ;;  %v6323_v50 = vld [vmem:[#allocation88_spill] sm:$0xff]  ;;  %v6331_v60 = vld [vmem:[#allocation23_spill] sm:$0xff] }
 0x7ba   : > { %v2587_v24 = vadd.f32 %v2539_v36, %v2295_v40  ;;  %v2603_v52 = vadd.f32 %v2555_v7, %v2311_v6  ;;  %v6324_v36 = vld [vmem:[#allocation42_spill] sm:$0xff] }
 0x7bb   : > { %v2904_v54 = vadd.f32 %v2856_v3, %v2612_v25  ;;  %v3059_v21 = vpop.permute.xlu1 %3058  ;;  %v3139_v25 = vmul.f32 %v5638_v49, %v6323_v50  ;;  %v2834_v48 = vmul.f32 %v5634_v15, %v6324_v36 }
 0x7bc   : > { %v3148_v39 = vmul.f32 %v5638_v49, %v3059_v21  ;;  %v2879_v0 = vadd.f32 %v2831_v4, %v2587_v24  ;;  %v2895_v29 = vadd.f32 %v2847_v5, %v2603_v52  ;;  %v2229_v46 = vpop.permute.xlu0 %2228  ;;  %v6325_v4 = vld [vmem:[#allocation19_spill] sm:$0xff] }
 0x7bd   : > { %4428 = vset.pattern.permute.xlu1 %v6271_v34  ;;  %v2547_v34 = vmul.f32 %v5627_v44, %v5499_v37  ;;  %v2563_v37 = vmul.f32 %v5627_v44, %v2471_v62  ;;  %v2882_v62 = vadd.f32 %v2834_v48, %v2590_v35  ;;  %v6327_v24 = vld [vmem:[#allocation43_spill] sm:$0xff]  ;;  %v2322_v7 = vmul.f32 %v5623_v33, %v2229_v46 }
 0x7be   : > { %v3196_v61 = vadd.f32 %v3148_v39, %v2904_v54  ;;  %2273 = vperm.xlu1 %4428, %v5706_v19   ;;  %v3171_v10 = vadd.f32 %v3123_v27, %v2879_v0  ;;  %v2582_v54 = vadd.f32 %v2534_v45, %v2290_v63  ;;  %v3187_v1 = vadd.f32 %v3139_v25, %v2895_v29  ;;  %v6329_v0 = vld [vmem:[#allocation67_spill] sm:$0xff] }
 0x7bf   : > { %v2595_v41 = vadd.f32 %v2547_v34, %v2303_v51  ;;  %v6326_v51 = vld [vmem:[#allocation65_spill] sm:$0xff]  ;;  %v3134_v22 = vmul.f32 %v5638_v49, %v6329_v0  ;;  %v2533_v45 = vmul.f32 %v5627_v44, %v6331_v60 }
 0x7c0   : > { %v5790_v2 = vmax.f32 %v3228_v59, %v3196_v61  ;;  %v2214_v30 = vpop.permute.xlu1 %2213  ;;  %v2826_v59 = vmul.f32 %v5634_v15, %v6325_v4 }
 0x7c1   : > { %v2319_v17 = vmul.f32 %v5623_v33, %v2214_v30  ;;  %v2887_v31 = vadd.f32 %v2839_v16, %v2595_v41  ;;  %v2775_v6 = vpop.permute.xlu0 %2774 }
 0x7c2   : > { %4430 = vset.pattern.permute.xlu1 %v6267_v14  ;;  %v6322_v14 = vld [vmem:[#allocation66_spill] sm:$0xff]  ;;  %v2874_v34 = vadd.f32 %v2826_v59, %v2582_v54  ;;  %v2858_v52 = vmul.f32 %v5634_v15, %v2775_v6  ;;  %v6344_v6 = vld [vmem:[#allocation28_spill] sm:$0xff] }
 0x7c3   : > { %v2611_v32 = vadd.f32 %v2563_v37, %v2319_v17  ;;  %2810 = vperm.xlu1 %4430, %v5706_v19   ;;  %v2550_v20 = vmul.f32 %v5627_v44, %v6322_v14  ;;  %v3163_v19 = vadd.f32 %v3115_v56, %v2871_v9  ;;  %v3179_v8 = vadd.f32 %v3131_v53, %v2887_v31  ;;  %v6328_v17 = vld [vmem:[#allocation21_spill] sm:$0xff] }
 0x7c4   : > { %v3118_v37 = vmul.f32 %v5638_v49, %v6328_v17  ;;  %v6333_v31 = vld [vmem:[#allocation45_spill] sm:$0xff] }
 0x7c5   : > { %v2763_v43 = vpop.permute.xlu1 %2762  ;;  %v3211_v40 = vmax.f32 %v3163_v19, %v3171_v10  ;;  %v2598_v39 = vadd.f32 %v2550_v20, %v2306_v28  ;;  %v2297_v28 = vmul.f32 %v5623_v33, %v6332_v11  ;;  %v2541_v14 = vmul.f32 %v5627_v44, %v6333_v31  ;;  %v6335_v19 = vld [vmem:[#allocation68_spill] sm:$0xff] }
 0x7c6   : > { %v2855_v3 = vmul.f32 %v5634_v15, %v2763_v43  ;;  %v3166_v5 = vadd.f32 %v3118_v37, %v2874_v34  ;;  %v2479_v25 = vpop.permute.xlu0 %2478  ;;  %v6334_v43 = vld [vmem:[#allocation46_spill] sm:$0xff]  ;;  %v2305_v35 = vmul.f32 %v5623_v33, %v6335_v19 }
 0x7c7   : > { %4432 = vset.pattern.permute.xlu1 %v6268_v57  ;;  %v3219_v55 = vmax.f32 %v3211_v40, %v3179_v8  ;;  %v2842_v57 = vmul.f32 %v5634_v15, %v6326_v51  ;;  %v6336_v8 = vld [vmem:[#allocation69_spill] sm:$0xff]  ;;  %v6337_v40 = vld [vmem:[#allocation24_spill] sm:$0xff]  ;;  %v2589_v59 = vadd.f32 %v2541_v14, %v2297_v28  ;;  %v6342_v34 = vld [vmem:[#allocation70_spill] sm:$0xff]  ;;  %v2565_v60 = vmul.f32 %v5627_v44, %v2479_v25 }
 0x7c8   : > { %v2903_v21 = vadd.f32 %v2855_v3, %v2611_v32  ;;  %3106 = vperm.xlu1 %4432, %v5685_v26   ;;  %v3126_v26 = vmul.f32 %v5638_v49, %v6327_v24  ;;  %v6330_v32 = vld [vmem:[#allocation22_spill] sm:$0xff]  ;;  %v2833_v3 = vmul.f32 %v5634_v15, %v6334_v43  ;;  %v2549_v29 = vmul.f32 %v5627_v44, %v6336_v8  ;;  %v6349_v8 = vld [vmem:[#allocation27_spill] sm:$0xff] }
 0x7c9   : > { %v2890_v27 = vadd.f32 %v2842_v57, %v2598_v39  ;;  %v3227_v16 = vmax.f32 %v3219_v55, %v3187_v1  ;;  %v2289_v9 = vmul.f32 %v5623_v33, %v6330_v32  ;;  %v2825_v36 = vmul.f32 %v5634_v15, %v6337_v40  ;;  %v6338_v1 = vld [vmem:[#allocation25_spill] sm:$0xff]  ;;  %v6340_v55 = vld [vmem:[#allocation47_spill] sm:$0xff]  ;;  %v6341_v57 = vld [vmem:[#allocation50_spill] sm:$0xff] }
 0x7ca   : > { %v3055_v61 = vpop.permute.xlu1 %3054  ;;  %v3174_v56 = vadd.f32 %v3126_v26, %v2882_v62  ;;  %v2292_v4 = vmul.f32 %v5623_v33, %v6338_v1  ;;  %v2300_v51 = vmul.f32 %v5623_v33, %v6340_v55  ;;  %v2841_v24 = vmul.f32 %v5634_v15, %v6342_v34  ;;  %v6350_v40 = vld [vmem:[#allocation73_spill] sm:$0xff]  ;;  %v6354_v34 = vld [vmem:[#allocation31_spill] sm:$0xff] }
 0x7cb   : > { %v3147_v63 = vmul.f32 %v5638_v49, %v3055_v61  ;;  %v3182_v10 = vadd.f32 %v3134_v22, %v2890_v27  ;;  %v6339_v61 = vld [vmem:[#allocation48_spill] sm:$0xff]  ;;  %v2881_v17 = vadd.f32 %v2833_v3, %v2589_v59  ;;  %v2597_v37 = vadd.f32 %v2549_v29, %v2305_v35  ;;  %v6346_v22 = vld [vmem:[#allocation71_spill] sm:$0xff]  ;;  %v6352_v55 = vld [vmem:[#allocation29_spill] sm:$0xff] }
 0x7cc   : > { %v3214_v50 = vmax.f32 %v3166_v5, %v3174_v56  ;;  %v3125_v62 = vmul.f32 %v5638_v49, %v6339_v61  ;;  %v6345_v56 = vld [vmem:[#allocation72_spill] sm:$0xff]  ;;  %v2828_v29 = vmul.f32 %v5634_v15, %v6349_v8 }
 0x7cd   : > { %v3195_v30 = vadd.f32 %v3147_v63, %v2903_v21  ;;  %v2581_v21 = vadd.f32 %v2533_v45, %v2289_v9  ;;  %v2544_v63 = vmul.f32 %v5627_v44, %v6341_v57  ;;  %v3133_v0 = vmul.f32 %v5638_v49, %v6345_v56  ;;  %v3063_v9 = vpop.permute.xlu0 %3062  ;;  %v6353_v57 = vld [vmem:[#allocation30_spill] sm:$0xff]  ;;  %v6356_v56 = vld [vmem:[#allocation11_spill] sm:$0xff] }
 0x7ce   : > { %v3222_v48 = vmax.f32 %v3214_v50, %v3182_v10  ;;  %v3173_v11 = vadd.f32 %v3125_v62, %v2881_v17  ;;  %v2889_v31 = vadd.f32 %v2841_v24, %v2597_v37  ;;  %v6348_v50 = vld [vmem:[#allocation49_spill] sm:$0xff]  ;;  %v3149_v61 = vmul.f32 %v5638_v49, %v3063_v9 }
 0x7cf   : > { %v5835_v42 = vmax.f32 %v3227_v16, %v3195_v30  ;;  %v2483_v41 = vpop.permute.xlu1 %2482  ;;  %v6343_v16 = vld [vmem:[#allocation26_spill] sm:$0xff]  ;;  %v2873_v10 = vadd.f32 %v2825_v36, %v2581_v21  ;;  %v2592_v28 = vadd.f32 %v2544_v63, %v2300_v51  ;;  %v2836_v43 = vmul.f32 %v5634_v15, %v6348_v50 }
 0x7d0   : > { %v2566_v53 = vmul.f32 %v5627_v44, %v2483_v41  ;;  %v3230_v26 = vmax.f32 %v3222_v48, %v5645_v13  ;;  %v3117_v30 = vmul.f32 %v5638_v49, %v6343_v16  ;;  %v2308_v41 = vmul.f32 %v5623_v33, %v6346_v22  ;;  %v6355_v16 = vld [vmem:[#allocation75_spill] sm:$0xff] }
 0x7d1   : > { %v3181_v3 = vadd.f32 %v3133_v0, %v2889_v31  ;;  %v2239_v35 = vpop.permute.xlu0 %2238  ;;  %v2844_v21 = vmul.f32 %v5634_v15, %v6350_v40  ;;  %v3120_v51 = vmul.f32 %v5638_v49, %v6352_v55  ;;  %v2291_v63 = vmul.f32 %v5623_v33, %v6353_v57 }
 0x7d2   : > { %v2614_v20 = vadd.f32 %v2566_v53, %v2322_v7  ;;  %v2536_v7 = vmul.f32 %v5627_v44, %v6344_v6  ;;  %v6347_v53 = vld [vmem:[#allocation74_spill] sm:$0xff]  ;;  %v2535_v24 = vmul.f32 %v5627_v44, %v6354_v34  ;;  %v2530_v0 = vmul.f32 %v5627_v44, %v6356_v56  ;;  %v6372_v56 = vld [vmem:[#allocation80_spill] sm:$0xff] }
 0x7d3   : > { %v2552_v5 = vmul.f32 %v5627_v44, %v6347_v53  ;;  %v6357_v53 = vld [vmem:[#allocation52_spill] sm:$0xff] }
 0x7d4   : > { %v2906_v46 = vadd.f32 %v2858_v52, %v2614_v20  ;;  %v3067_v54 = vpop.permute.xlu1 %3066  ;;  %v2584_v14 = vadd.f32 %v2536_v7, %v2292_v4  ;;  %v3165_v52 = vadd.f32 %v3117_v30, %v2873_v10  ;;  %v3136_v30 = vmul.f32 %v5638_v49, %v6355_v16  ;;  %v6359_v10 = vld [vmem:[#allocation12_spill] sm:$0xff] }
 0x7d5   : > { %v3150_v39 = vmul.f32 %v5638_v49, %v3067_v54  ;;  %v2600_v19 = vadd.f32 %v2552_v5, %v2308_v41  ;;  %v2884_v54 = vadd.f32 %v2836_v43, %v2592_v28  ;;  %v2783_v37 = vpop.permute.xlu0 %2782  ;;  %v2299_v5 = vmul.f32 %v5623_v33, %v6357_v53  ;;  %v6373_v53 = vld [vmem:[#allocation79_spill] sm:$0xff] }
 0x7d6   : > { %v3213_v25 = vmax.f32 %v3165_v52, %v3173_v11  ;;  %v2876_v48 = vadd.f32 %v2828_v29, %v2584_v14  ;;  %v6360_v11 = vld [vmem:[#allocation32_spill] sm:$0xff]  ;;  %v2860_v14 = vmul.f32 %v5634_v15, %v2783_v37  ;;  %v6361_v52 = vld [vmem:[#allocation33_spill] sm:$0xff] }
 0x7d7   : > { %v3198_v27 = vadd.f32 %v3150_v39, %v2906_v46  ;;  %v6351_v39 = vld [vmem:[#allocation51_spill] sm:$0xff]  ;;  %v2892_v59 = vadd.f32 %v2844_v21, %v2600_v19  ;;  %v2827_v28 = vmul.f32 %v5634_v15, %v6360_v11  ;;  %v2294_v50 = vmul.f32 %v5623_v33, %v6361_v52  ;;  %v6364_v29 = vld [vmem:[#allocation76_spill] sm:$0xff] }
 0x7d8   : > { %v3128_v1 = vmul.f32 %v5638_v49, %v6351_v39  ;;  %v3221_v4 = vmax.f32 %v3213_v25, %v3181_v3  ;;  %v3168_v22 = vadd.f32 %v3120_v51, %v2876_v48  ;;  %v6362_v3 = vld [vmem:[#allocation54_spill] sm:$0xff]  ;;  %v6365_v25 = vld [vmem:[#allocation77_spill] sm:$0xff]  ;;  %v6366_v48 = vld [vmem:[#allocation56_spill] sm:$0xff] }
 0x7d9   : > { %v5877_v32 = vmax.f32 %v3230_v26, %v3198_v27  ;;  %v2224_v13 = vpop.permute.xlu1 %2223  ;;  %v2324_v26 = vmul.f32 %v5623_v33, %v2239_v35  ;;  %v2835_v19 = vmul.f32 %v5634_v15, %v6362_v3  ;;  %v6363_v35 = vld [vmem:[#allocation36_spill] sm:$0xff]  ;;  %v3127_v39 = vmul.f32 %v5638_v49, %v6366_v48  ;;  %v6368_v51 = vld [vmem:[#allocation58_spill] sm:$0xff] }
 0x7da   : > { %v2321_v45 = vmul.f32 %v5623_v33, %v2224_v13  ;;  %v3176_v27 = vadd.f32 %v3128_v1, %v2884_v54  ;;  %v3229_v6 = vmax.f32 %v3221_v4, %v5663_v47  ;;  %v6358_v13 = vld [vmem:[#allocation53_spill] sm:$0xff]  ;;  %v2286_v47 = vmul.f32 %v5623_v33, %v6359_v10 }
 0x7db   : > { %v2543_v9 = vmul.f32 %v5627_v44, %v6358_v13  ;;  %v2538_v8 = vmul.f32 %v5627_v44, %v6363_v35  ;;  %v2551_v54 = vmul.f32 %v5627_v44, %v6365_v25  ;;  %v2546_v57 = vmul.f32 %v5627_v44, %v6368_v51  ;;  %v6374_v13 = vld [vmem:[#allocation82_spill] sm:$0xff]  ;;  %v6376_v35 = vld [vmem:[#allocation57_spill] sm:$0xff] }
 0x7dc   : > { %v2613_v20 = vadd.f32 %v2565_v60, %v2321_v45  ;;  %v3184_v60 = vadd.f32 %v3136_v30, %v2892_v59  ;;  %v3216_v43 = vmax.f32 %v3168_v22, %v3176_v27  ;;  %v2487_v59 = vpop.permute.xlu0 %2486  ;;  %v3135_v22 = vmul.f32 %v5638_v49, %v6372_v56 }
 0x7dd   : > { %v2578_v25 = vadd.f32 %v2530_v0, %v2286_v47 }
 0x7de   : > { %v2771_v46 = vpop.permute.xlu1 %2770  ;;  %v3224_v1 = vmax.f32 %v3216_v43, %v3184_v60  ;;  %v2562_v43 = vmul.f32 %v5627_v44, %v5703_v23 }
 0x7df   : > { %v2857_v36 = vmul.f32 %v5634_v15, %v2771_v46  ;;  %v2307_v46 = vmul.f32 %v5623_v33, %v6364_v29 }
 0x7e0   : > { %v3232_v16 = vmax.f32 %v3224_v1, %v5677_v38  ;;  %v3071_v3 = vpop.permute.xlu0 %3070 }
 0x7e1   : > { %v2905_v62 = vadd.f32 %v2857_v36, %v2613_v20  ;;  %v2583_v20 = vadd.f32 %v2535_v24, %v2291_v63  ;;  %v2591_v36 = vadd.f32 %v2543_v9, %v2299_v5  ;;  %v6369_v63 = vld [vmem:[#allocation78_spill] sm:$0xff]  ;;  %v2599_v37 = vadd.f32 %v2551_v54, %v2307_v46  ;;  %v6377_v54 = vld [vmem:[#allocation15_spill] sm:$0xff] }
 0x7e2   : > { %v2843_v34 = vmul.f32 %v5634_v15, %v6369_v63  ;;  %v6370_v24 = vld [vmem:[#allocation34_spill] sm:$0xff]  ;;  %v2310_v5 = vmul.f32 %v5623_v33, %v6373_v53  ;;  %v2554_v9 = vmul.f32 %v5627_v44, %v6374_v13  ;;  %v6384_v53 = vld [vmem:[#allocation89_spill] sm:$0xff] }
 0x7e3   : > { %v3197_v7 = vadd.f32 %v3149_v61, %v2905_v62  ;;  %v2491_v17 = vpop.permute.xlu1 %2490  ;;  %v2875_v61 = vadd.f32 %v2827_v28, %v2583_v20  ;;  %v6367_v62 = vld [vmem:[#allocation55_spill] sm:$0xff]  ;;  %v2883_v27 = vadd.f32 %v2835_v19, %v2591_v36  ;;  %v2567_v28 = vmul.f32 %v5627_v44, %v2487_v59  ;;  %v6378_v36 = vld [vmem:[#allocation17_spill] sm:$0xff]  ;;  %v6380_v59 = vld [vmem:[#allocation14_spill] sm:$0xff] }
 0x7e4   : > { %v2568_v41 = vmul.f32 %v5627_v44, %v2491_v17  ;;  %v2302_v55 = vmul.f32 %v5623_v33, %v6367_v62  ;;  %v2891_v11 = vadd.f32 %v2843_v34, %v2599_v37  ;;  %v2529_v48 = vmul.f32 %v5627_v44, %v6378_v36  ;;  %v6381_v62 = vld [vmem:[#allocation81_spill] sm:$0xff]  ;;  %v2249_v51 = vpop.permute.xlu0 %2248  ;;  %v6382_v34 = vld [vmem:[#allocation59_spill] sm:$0xff] }
 0x7e5   : > { %v5908_v45 = vmax.f32 %v3229_v6, %v3197_v7  ;;  %v2586_v6 = vadd.f32 %v2538_v8, %v2294_v50  ;;  %v6371_v7 = vld [vmem:[#allocation35_spill] sm:$0xff]  ;;  %v2318_v50 = vmul.f32 %v5623_v33, %v5688_v58  ;;  %v2838_v8 = vmul.f32 %v5634_v15, %v6376_v35 }
 0x7e6   : > { %v2616_v31 = vadd.f32 %v2568_v41, %v2324_v26  ;;  %v3119_v26 = vmul.f32 %v5638_v49, %v6370_v24  ;;  %v2830_v17 = vmul.f32 %v5634_v15, %v6371_v7  ;;  %v3175_v41 = vadd.f32 %v3127_v39, %v2883_v27  ;;  %v6379_v39 = vld [vmem:[#allocation37_spill] sm:$0xff] }
 0x7e7   : > { %v2594_v38 = vadd.f32 %v2546_v57, %v2302_v55  ;;  %v3183_v29 = vadd.f32 %v3135_v22, %v2891_v11  ;;  %v3122_v58 = vmul.f32 %v5638_v49, %v6379_v39  ;;  %v2846_v55 = vmul.f32 %v5634_v15, %v6381_v62  ;;  %v6383_v22 = vld [vmem:[#allocation83_spill] sm:$0xff]  ;;  %v6385_v11 = vld [vmem:[#allocation38_spill] sm:$0xff] }
 0x7e8   : > { %v2908_v40 = vadd.f32 %v2860_v14, %v2616_v31  ;;  %v3075_v21 = vpop.permute.xlu1 %3074  ;;  %v6375_v14 = vld [vmem:[#allocation13_spill] sm:$0xff]  ;;  %v3167_v52 = vadd.f32 %v3119_v26, %v2875_v61  ;;  %v2878_v19 = vadd.f32 %v2830_v17, %v2586_v6  ;;  %v2285_v61 = vmul.f32 %v5623_v33, %v6380_v59 }
 0x7e9   : > { %v3152_v4 = vmul.f32 %v5638_v49, %v3075_v21  ;;  %v2822_v20 = vmul.f32 %v5634_v15, %v6375_v14  ;;  %v2602_v21 = vadd.f32 %v2554_v9, %v2310_v5  ;;  %v2886_v23 = vadd.f32 %v2838_v8, %v2594_v38  ;;  %v6389_v8 = vld [vmem:[#allocation60_spill] sm:$0xff] }
 0x7ea   : > { %v3215_v1 = vmax.f32 %v3167_v52, %v3175_v41  ;;  %v2610_v0 = vadd.f32 %v2562_v43, %v2318_v50  ;;  %v3170_v63 = vadd.f32 %v3122_v58, %v2878_v19  ;;  %v3130_v24 = vmul.f32 %v5638_v49, %v6382_v34  ;;  %v6388_v43 = vld [vmem:[#allocation90_spill] sm:$0xff]  ;;  %v2791_v19 = vpop.permute.xlu0 %2790 }
 0x7eb   : > { %v3200_v30 = vadd.f32 %v3152_v4, %v2908_v40  ;;  %v3114_v40 = vmul.f32 %v5638_v49, %v6377_v54  ;;  %v2870_v57 = vadd.f32 %v2822_v20, %v2578_v25  ;;  %v2894_v27 = vadd.f32 %v2846_v55, %v2602_v21  ;;  %v6387_v20 = vld [vmem:[#allocation40_spill] sm:$0xff] }
 0x7ec   : > { %v3223_v26 = vmax.f32 %v3215_v1, %v3183_v29  ;;  %v2577_v17 = vadd.f32 %v2529_v48, %v2285_v61  ;;  %v3178_v37 = vadd.f32 %v3130_v24, %v2886_v23  ;;  %v2326_v56 = vmul.f32 %v5623_v33, %v2249_v51  ;;  %v6391_v21 = vld [vmem:[#allocation16_spill] sm:$0xff]  ;;  %v6392_v1 = vld [vmem:[#allocation41_spill] sm:$0xff] }
 0x7ed   : > { %v5945_v60 = vmax.f32 %v3232_v16, %v3200_v30  ;;  %v2234_v10 = vpop.permute.xlu1 %2233  ;;  %v2854_v16 = vmul.f32 %v5634_v15, %v5695_v18  ;;  %v3151_v30 = vmul.f32 %v5638_v49, %v3071_v3  ;;  %v3162_v7 = vadd.f32 %v3114_v40, %v2870_v57  ;;  %v6395_v51 = vld [vmem:[#allocation85_spill] sm:$0xff] }
 0x7ee   : > { %v2323_v31 = vmul.f32 %v5623_v33, %v2234_v10  ;;  %v3138_v41 = vmul.f32 %v5638_v49, %v6383_v22  ;;  %v3231_v5 = vmax.f32 %v3223_v26, %v6384_v53  ;;  %v2293_v18 = vmul.f32 %v5623_v33, %v6385_v11  ;;  %v2495_v53 = vpop.permute.xlu0 %2494 }
 0x7ef   : > { %v2902_v13 = vadd.f32 %v2854_v16, %v2610_v0  ;;  %v3210_v38 = vmax.f32 %v3162_v7, %v3170_v63  ;;  %v2829_v52 = vmul.f32 %v5634_v15, %v6387_v20  ;;  %v3146_v3 = vmul.f32 %v5638_v49, %v6388_v43  ;;  %v6394_v0 = vld [vmem:[#allocation84_spill] sm:$0xff] }
 0x7f0   : > { %v2615_v46 = vadd.f32 %v2567_v28, %v2323_v31  ;;  %v6386_v28 = vld [vmem:[#allocation39_spill] sm:$0xff]  ;;  %v3186_v50 = vadd.f32 %v3138_v41, %v2894_v27  ;;  %v2301_v29 = vmul.f32 %v5623_v33, %v6389_v8  ;;  %v2862_v40 = vmul.f32 %v5634_v15, %v2791_v19 }
 0x7f1   : > { %v2537_v31 = vmul.f32 %v5627_v44, %v6386_v28  ;;  %v2821_v36 = vmul.f32 %v5634_v15, %v6391_v21  ;;  %v3218_v48 = vmax.f32 %v3210_v38, %v3178_v37  ;;  %v3194_v39 = vadd.f32 %v3146_v3, %v2902_v13  ;;  %v6396_v27 = vld [vmem:[#allocation63_spill] sm:$0xff] }
 0x7f2   : > { %v2779_v4 = vpop.permute.xlu1 %2778  ;;  %v3121_v23 = vmul.f32 %v5638_v49, %v6392_v1  ;;  %v2553_v57 = vmul.f32 %v5627_v44, %v6395_v51  ;;  %v3129_v16 = vmul.f32 %v5638_v49, %v6396_v27  ;;  %v2569_v43 = vmul.f32 %v5627_v44, %v2495_v53 }
 0x7f3   : > { %v2859_v47 = vmul.f32 %v5634_v15, %v2779_v4  ;;  %v2585_v58 = vadd.f32 %v2537_v31, %v2293_v18  ;;  %v6393_v4 = vld [vmem:[#allocation62_spill] sm:$0xff]  ;;  %v3226_v55 = vmax.f32 %v3218_v48, %v3186_v50  ;;  %v2869_v34 = vadd.f32 %v2821_v36, %v2577_v17  ;;  %v3079_v3 = vpop.permute.xlu0 %3078 }
 0x7f4   : > { %v2837_v59 = vmul.f32 %v5634_v15, %v6393_v4 }
 0x7f5   : > { %v2907_v6 = vadd.f32 %v2859_v47, %v2615_v46  ;;  %v6390_v46 = vld [vmem:[#allocation61_spill] sm:$0xff]  ;;  %v2309_v47 = vmul.f32 %v5623_v33, %v6394_v0  ;;  %v2877_v24 = vadd.f32 %v2829_v52, %v2585_v58  ;;  %v3234_v7 = vmax.f32 %v3226_v55, %v3194_v39 }
 0x7f6   : > { %v2545_v25 = vmul.f32 %v5627_v44, %v6390_v46 }
 0x7f7   : > { %v3199_v9 = vadd.f32 %v3151_v30, %v2907_v6  ;;  %v2499_v10 = vpop.permute.xlu1 %2498  ;;  %v6397_v30 = vld [vmem:[#allocation86_spill] sm:$0xff]  ;;  %v3169_v41 = vadd.f32 %v3121_v23, %v2877_v24  ;;  %v2601_v13 = vadd.f32 %v2553_v57, %v2309_v47 }
 0x7f8   : > { %v2570_v14 = vmul.f32 %v5627_v44, %v2499_v10  ;;  %v2593_v26 = vadd.f32 %v2545_v25, %v2301_v29  ;;  %v2845_v6 = vmul.f32 %v5634_v15, %v6397_v30  ;;  %v2259_v21 = vpop.permute.xlu0 %2258 }
 0x7f9   : > { %v5986_v35 = vmax.f32 %v3231_v5, %v3199_v9  ;;  %v6013_v5 = vld [vmem:[%s6179_s9] ss:$0 sm:$0xff] }
 0x7fa   : > { %v2618_v54 = vadd.f32 %v2570_v14, %v2326_v56  ;;  %v6398_v56 = vld [vmem:[#allocation18_spill] sm:$0xff]  ;;  %v2885_v17 = vadd.f32 %v2837_v59, %v2593_v26  ;;  %v6399_v9 = vld [vmem:[#allocation87_spill] sm:$0xff]  ;;  %v2893_v31 = vadd.f32 %v2845_v6, %v2601_v13  ;;  %v2328_v59 = vmul.f32 %v5623_v33, %v2259_v21 }
 0x7fb   : > { %v3113_v22 = vmul.f32 %v5638_v49, %v6398_v56  ;;  %v3137_v10 = vmul.f32 %v5638_v49, %v6399_v9 }
 0x7fc   : > { %v2910_v61 = vadd.f32 %v2862_v40, %v2618_v54  ;;  %v3083_v62 = vpop.permute.xlu1 %3082  ;;  %v3177_v28 = vadd.f32 %v3129_v16, %v2885_v17  ;;  %v3153_v54 = vmul.f32 %v5638_v49, %v3079_v3 }
 0x7fd   : > { %v3154_v63 = vmul.f32 %v5638_v49, %v3083_v62  ;;  %v3161_v18 = vadd.f32 %v3113_v22, %v2869_v34  ;;  %v3185_v50 = vadd.f32 %v3137_v10, %v2893_v31 }
 0x7ff   : > { %v3202_v37 = vadd.f32 %v3154_v63, %v2910_v61  ;;  %v3209_v52 = vmax.f32 %v3161_v18, %v3169_v41  ;;  %v2503_v61 = vpop.permute.xlu0 %2502 }
 0x800   : > { %v2571_v16 = vmul.f32 %v5627_v44, %v2503_v61 }
 0x801   : > { %v3242_v38 = vmax.f32 %v3234_v7, %v3202_v37  ;;  %v2244_v11 = vpop.permute.xlu1 %2243  ;;  %v3217_v8 = vmax.f32 %v3209_v52, %v3177_v28 }
 0x802   : > { %v2325_v14 = vmul.f32 %v5623_v33, %v2244_v11 }
 0x803   : > { %v6019_v20 = vadd.f32 %v6013_v5, %v3242_v38  ;;  %v3225_v25 = vmax.f32 %v3217_v8, %v3185_v50  ;;  %v3087_v51 = vpop.permute.xlu0 %3086 }
 0x804   : > { %v2617_v29 = vadd.f32 %v2569_v43, %v2325_v14  ;;  %v3155_v56 = vmul.f32 %v5638_v49, %v3087_v51 }
 0x805   : > { %3265 = vmax.xlane.f32.xlu1 %v6019_v20  ;;  %v3233_v36 = vmax.f32 %v3225_v25, %v5753_v12 }
 0x806   : > { %v2787_v19 = vpop.permute.xlu1 %2786 }
 0x807   : > { %v2861_v46 = vmul.f32 %v5634_v15, %v2787_v19  ;;  %v2269_v24 = vpop.permute.xlu0 %2268 }
 0x808   : > { %v2330_v10 = vmul.f32 %v5623_v33, %v2269_v24 }
 0x809   : > { %v2909_v40 = vadd.f32 %v2861_v46, %v2617_v29 }
 0x80b   : > { %v3201_v48 = vadd.f32 %v3153_v54, %v2909_v40  ;;  %v2507_v39 = vpop.permute.xlu1 %2506 }
 0x80c   : > { %v2572_v23 = vmul.f32 %v5627_v44, %v2507_v39  ;;  %v2511_v37 = vpop.permute.xlu0 %2510 }
 0x80d   : > { %v3241_v58 = vmax.f32 %v3233_v36, %v3201_v48  ;;  %v2573_v19 = vmul.f32 %v5627_v44, %v2511_v37 }
 0x80e   : > { %v2620_v55 = vadd.f32 %v2572_v23, %v2328_v59 }
 0x80f   : > { %v6027_v1 = vadd.f32 %v6013_v5, %v3241_v58 }
 0x810   : > { %v2799_v4 = vpop.permute.xlu1 %2798 }
 0x811   : > { %3263 = vmax.xlane.f32.xlu0 %v6027_v1  ;;  %v2864_v62 = vmul.f32 %v5634_v15, %v2799_v4  ;;  %v2803_v17 = vpop.permute.xlu0 %2802 }
 0x812   : > { %v2865_v46 = vmul.f32 %v5634_v15, %v2803_v17 }
 0x813   : > { %v2912_v47 = vadd.f32 %v2864_v62, %v2620_v55 }
 0x815   : > { %v3091_v0 = vpop.permute.xlu1 %3090 }
 0x816   : > { %v3156_v12 = vmul.f32 %v5638_v49, %v3091_v0  ;;  %v3095_v18 = vpop.permute.xlu0 %3094 }
 0x817   : > { %v3157_v40 = vmul.f32 %v5638_v49, %v3095_v18 }
 0x818   : > { %v3204_v57 = vadd.f32 %v3156_v12, %v2912_v47 }
 0x81a   : > { %v3244_v63 = vmax.f32 %v5790_v2, %v3204_v57  ;;  %v2254_v34 = vpop.permute.xlu1 %2253 }
 0x81b   : > { %v2327_v26 = vmul.f32 %v5623_v33, %v2254_v34 }
 0x81c   : > { %v6037_v27 = vadd.f32 %v6013_v5, %v3244_v63 }
 0x81d   : > { %v2619_v6 = vadd.f32 %v2571_v16, %v2327_v26 }
 0x81e   : > { %3269 = vmax.xlane.f32.xlu0 %v6037_v27 }
 0x81f   : > { %v2795_v30 = vpop.permute.xlu1 %2794 }
 0x820   : > { %v2863_v7 = vmul.f32 %v5634_v15, %v2795_v30 }
 0x822   : > { %v2911_v22 = vadd.f32 %v2863_v7, %v2619_v6 }
 0x824   : > { %v3203_v2 = vadd.f32 %v3155_v56, %v2911_v22  ;;  %v2515_v41 = vpop.permute.xlu1 %2514 }
 0x825   : > { %v2574_v9 = vmul.f32 %v5627_v44, %v2515_v41 }
 0x826   : > { %v3243_v53 = vmax.f32 %v5835_v42, %v3203_v2  ;;  %v2279_v42 = vpop.permute.xlu0 %2278 }
 0x827   : > { %v2622_v28 = vadd.f32 %v2574_v9, %v2330_v10  ;;  %v2332_v59 = vmul.f32 %v5623_v33, %v2279_v42 }
 0x828   : > { %v6045_v13 = vadd.f32 %v6013_v5, %v3243_v53 }
 0x829   : > { %v2807_v38 = vpop.permute.xlu1 %2806 }
 0x82a   : > { %3267 = vmax.xlane.f32.xlu0 %v6045_v13  ;;  %v2866_v11 = vmul.f32 %v5634_v15, %v2807_v38  ;;  %v2815_v54 = vpop.permute.xlu0 %2814 }
 0x82b   : > { %v2868_v63 = vmul.f32 %v5634_v15, %v2815_v54 }
 0x82c   : > { %v2914_v14 = vadd.f32 %v2866_v11, %v2622_v28 }
 0x82e   : > { %v3099_v31 = vpop.permute.xlu1 %3098 }
 0x82f   : > { %v3158_v52 = vmul.f32 %v5638_v49, %v3099_v31 }
 0x831   : > { %v3206_v50 = vadd.f32 %v3158_v52, %v2914_v14 }
 0x833   : > { %v3246_v43 = vmax.f32 %v5877_v32, %v3206_v50  ;;  %v2264_v3 = vpop.permute.xlu1 %2263  ;;  %v2519_v32 = vpop.permute.xlu0 %2518 }
 0x834   : > { %v2329_v8 = vmul.f32 %v5623_v33, %v2264_v3  ;;  %v2575_v62 = vmul.f32 %v5627_v44, %v2519_v32 }
 0x835   : > { %v6056_v29 = vadd.f32 %v6013_v5, %v3246_v43 }
 0x836   : > { %v2621_v25 = vadd.f32 %v2573_v19, %v2329_v8 }
 0x837   : > { %3273 = vmax.xlane.f32.xlu0 %v6056_v29  ;;  %v3103_v0 = vpop.permute.xlu0 %3102 }
 0x838   : > { %v2913_v21 = vadd.f32 %v2865_v46, %v2621_v25  ;;  %v2523_v36 = vpop.permute.xlu1 %2522  ;;  %v3159_v57 = vmul.f32 %v5638_v49, %v3103_v0 }
 0x839   : > { %v2576_v61 = vmul.f32 %v5627_v44, %v2523_v36 }
 0x83a   : > { %v3205_v48 = vadd.f32 %v3157_v40, %v2913_v21 }
 0x83c   : > { %v3245_v39 = vmax.f32 %v5908_v45, %v3205_v48  ;;  %v2624_v45 = vadd.f32 %v2576_v61, %v2332_v59 }
 0x83d   : > { %v2274_v58 = vpop.permute.xlu1 %2273 }
 0x83e   : > { %v6063_v23 = vadd.f32 %v6013_v5, %v3245_v39  ;;  %v2331_v4 = vmul.f32 %v5623_v33, %v2274_v58  ;;  %v2916_v33 = vadd.f32 %v2868_v63, %v2624_v45 }
 0x840   : > { %3271 = vmax.xlane.f32.xlu1 %v6063_v23  ;;  %v2623_v47 = vadd.f32 %v2575_v62, %v2331_v4 }
 0x842   : > { %v2811_v55 = vpop.permute.xlu1 %2810 }
 0x843   : > { %v2867_v12 = vmul.f32 %v5634_v15, %v2811_v55 }
 0x845   : > { %v2915_v51 = vadd.f32 %v2867_v12, %v2623_v47 }
 0x847   : > { %v3207_v34 = vadd.f32 %v3159_v57, %v2915_v51  ;;  %v3107_v24 = vpop.permute.xlu1 %3106 }
 0x848   : > { %v3160_v26 = vmul.f32 %v5638_v49, %v3107_v24 }
 0x849   : > { %v3247_v16 = vmax.f32 %v5986_v35, %v3207_v34 }
 0x84a   : > { %v3208_v30 = vadd.f32 %v3160_v26, %v2916_v33 }
 0x84b   : > { %v6076_v44 = vadd.f32 %v6013_v5, %v3247_v16 }
 0x84c   : > { %v3248_v6 = vmax.f32 %v5945_v60, %v3208_v30 }
 0x84d   : > { %3275 = vmax.xlane.f32.xlu1 %v6076_v44 }
 0x84e   : > { %v6081_v7 = vadd.f32 %v6013_v5, %v3248_v6 }
 0x850   : > { %3277 = vmax.xlane.f32.xlu0 %v6081_v7 }
 0x892   : > { %v3266_v15 = vpop.xlane.xlu1 %3265 }
 0x893   : > { %v3280_v37 = vsub.f32 %v6019_v20, %v3266_v15 }
 0x895   : > { %v3289_v56 = vmul.f32 1.442695, %v3280_v37 }
 0x897   : > { %4433 = vpow2.f32 %v3289_v56 }
 0x89e   : > { %v3264_v49 = vpop.xlane.xlu0 %3263 }
 0x89f   : > { %v3279_v35 = vsub.f32 %v6027_v1, %v3264_v49 }
 0x8a1   : > { %v4434_v22 = vpop.eup %4433  ;;  %v3287_v2 = vmul.f32 1.442695, %v3279_v35 }
 0x8a2   : > { %3305 = vadd.xlane.f32.xlu0 %v4434_v22 }
 0x8a3   : > { %4435 = vpow2.f32 %v3287_v2 }
 0x8ab   : > { %v3270_v60 = vpop.xlane.xlu0 %3269 }
 0x8ac   : > { %v3282_v41 = vsub.f32 %v6037_v27, %v3270_v60 }
 0x8ad   : > { %v4436_v53 = vpop.eup %4435 }
 0x8ae   : > { %v3293_v5 = vmul.f32 1.442695, %v3282_v41  ;;  %3303 = vadd.xlane.f32.xlu1 %v4436_v53 }
 0x8b0   : > { %4437 = vpow2.f32 %v3293_v5 }
 0x8b7   : > { %v3268_v17 = vpop.xlane.xlu0 %3267 }
 0x8b8   : > { %v3281_v9 = vsub.f32 %v6045_v13, %v3268_v17 }
 0x8ba   : > { %v4438_v10 = vpop.eup %4437  ;;  %v3291_v38 = vmul.f32 1.442695, %v3281_v9 }
 0x8bb   : > { %3309 = vadd.xlane.f32.xlu0 %v4438_v10 }
 0x8bc   : > { %4439 = vpow2.f32 %v3291_v38 }
 0x8c4   : > { %v3274_v11 = vpop.xlane.xlu0 %3273 }
 0x8c5   : > { %v3284_v18 = vsub.f32 %v6056_v29, %v3274_v11 }
 0x8c6   : > { %v4440_v28 = vpop.eup %4439 }
 0x8c7   : > { %v3297_v31 = vmul.f32 1.442695, %v3284_v18  ;;  %3307 = vadd.xlane.f32.xlu1 %v4440_v28 }
 0x8c9   : > { %4441 = vpow2.f32 %v3297_v31 }
 0x8cd   : > { %v3272_v14 = vpop.xlane.xlu1 %3271 }
 0x8ce   : > { %v3283_v52 = vsub.f32 %v6063_v23, %v3272_v14 }
 0x8d0   : > { %v3295_v42 = vmul.f32 1.442695, %v3283_v52 }
 0x8d2   : > { %4443 = vpow2.f32 %v3295_v42 }
 0x8d3   : > { %v4442_v50 = vpop.eup %4441 }
 0x8d4   : > { %3313 = vadd.xlane.f32.xlu0 %v4442_v50 }
 0x8da   : > { %v6090_v43 = vpop.xlane.xlu1 %3275 }
 0x8db   : > { %v3285_v3 = vsub.f32 %v6076_v44, %v6090_v43 }
 0x8dc   : > { %v4444_v19 = vpop.eup %4443 }
 0x8dd   : > { %v3299_v8 = vmul.f32 1.442695, %v3285_v3  ;;  %v6094_v46 = vpop.xlane.xlu0 %3277  ;;  %3311 = vadd.xlane.f32.xlu1 %v4444_v19 }
 0x8de   : > { %v3286_v25 = vsub.f32 %v6081_v7, %v6094_v46 }
 0x8df   : > { %4445 = vpow2.f32 %v3299_v8 }
 0x8e0   : > { %v3301_v54 = vmul.f32 1.442695, %v3286_v25 }
 0x8e2   : > { %4447 = vpow2.f32 %v3301_v54 }
 0x8e9   : > { %v4446_v40 = vpop.eup %4445 }
 0x8ea   : > { %3315 = vadd.xlane.f32.xlu1 %v4446_v40 }
 0x8ec   : > { %v4448_v21 = vpop.eup %4447 }
 0x8ed   : > { %3317 = vadd.xlane.f32.xlu0 %v4448_v21 }
 0x92f   : > { %v3306_v36 = vpop.xlane.xlu0 %3305 }
 0x930   : > { %4449 = vlog2.f32 %v3306_v36 }
 0x93a   : > { %v4450_v48 = vpop.eup %4449 }
 0x93b   : > { %v3322_v32 = vmul.f32 0.6931472, %v4450_v48  ;;  %v3304_v39 = vpop.xlane.xlu1 %3303 }
 0x93c   : > { %4451 = vlog2.f32 %v3304_v39 }
 0x93d   : > { %v3336_v58 = vadd.f32 %v3322_v32, %v3266_v15 }
 0x93f   : > { %v3344_v4 = vsub.f32 %v6019_v20, %v3336_v58 }
 0x941   : > { %3352 = vst [vmem:[%s6100_s28 + $0x8] sm:$0xff] %v3344_v4 }
 0x946   : > { %v4452_v59 = vpop.eup %4451 }
 0x947   : > { %v3320_v61 = vmul.f32 0.6931472, %v4452_v59 }
 0x948   : > { %v3310_v62 = vpop.xlane.xlu0 %3309 }
 0x949   : > { %v3335_v55 = vadd.f32 %v3320_v61, %v3264_v49  ;;  %4453 = vlog2.f32 %v3310_v62 }
 0x94b   : > { %v3343_v0 = vsub.f32 %v6027_v1, %v3335_v55 }
 0x94d   : > { %3351 = vst [vmem:[%s6100_s28] sm:$0xff] %v3343_v0 }
 0x953   : > { %v4454_v47 = vpop.eup %4453 }
 0x954   : > { %v3326_v12 = vmul.f32 0.6931472, %v4454_v47  ;;  %v3308_v45 = vpop.xlane.xlu1 %3307 }
 0x955   : > { %4455 = vlog2.f32 %v3308_v45 }
 0x956   : > { %v3338_v20 = vadd.f32 %v3326_v12, %v3270_v60 }
 0x958   : > { %v3346_v51 = vsub.f32 %v6037_v27, %v3338_v20 }
 0x95a   : > { %3354 = vst [vmem:[%s6100_s28 + $0x18] sm:$0xff] %v3346_v51 }
 0x95f   : > { %v4456_v57 = vpop.eup %4455 }
 0x960   : > { %v3324_v63 = vmul.f32 0.6931472, %v4456_v57 }
 0x961   : > { %v3314_v34 = vpop.xlane.xlu0 %3313 }
 0x962   : > { %v3337_v24 = vadd.f32 %v3324_v63, %v3268_v17  ;;  %4457 = vlog2.f32 %v3314_v34 }
 0x964   : > { %v3345_v33 = vsub.f32 %v6045_v13, %v3337_v24 }
 0x966   : > { %3353 = vst [vmem:[%s6100_s28 + $0x10] sm:$0xff] %v3345_v33 }
 0x96a   : > { %v3312_v1 = vpop.xlane.xlu1 %3311 }
 0x96b   : > { %4459 = vlog2.f32 %v3312_v1 }
 0x96c   : > { %v4458_v26 = vpop.eup %4457 }
 0x96d   : > { %v3330_v16 = vmul.f32 0.6931472, %v4458_v26 }
 0x96f   : > { %v3340_v30 = vadd.f32 %v3330_v16, %v3274_v11 }
 0x971   : > { %v3348_v6 = vsub.f32 %v6056_v29, %v3340_v30 }
 0x973   : > { %3356 = vst [vmem:[%s6100_s28 + $0x28] sm:$0xff] %v3348_v6 }
 0x975   : > { %v4460_v27 = vpop.eup %4459 }
 0x976   : > { %v3328_v15 = vmul.f32 0.6931472, %v4460_v27 }
 0x977   : > { %v3316_v37 = vpop.xlane.xlu1 %3315 }
 0x978   : > { %v3339_v56 = vadd.f32 %v3328_v15, %v3272_v14  ;;  %4461 = vlog2.f32 %v3316_v37 }
 0x97a   : > { %v3347_v13 = vsub.f32 %v6063_v23, %v3339_v56  ;;  %v3318_v49 = vpop.xlane.xlu0 %3317 }
 0x97b   : > { %4463 = vlog2.f32 %v3318_v49 }
 0x97c   : > { %3355 = vst [vmem:[%s6100_s28 + $0x20] sm:$0xff] %v3347_v13 }
 0x982   : > { %v4462_v35 = vpop.eup %4461 }
 0x983   : > { %v3332_v22 = vmul.f32 0.6931472, %v4462_v35 }
 0x985   : > { %v4464_v29 = vpop.eup %4463  ;;  %v3341_v2 = vadd.f32 %v3332_v22, %v6090_v43 }
 0x986   : > { %v3334_v60 = vmul.f32 0.6931472, %v4464_v29 }
 0x987   : > { %v3349_v41 = vsub.f32 %v6076_v44, %v3341_v2 }
 0x988   : > { %v3342_v53 = vadd.f32 %v3334_v60, %v6094_v46 }
 0x989   : > { %3357 = vst [vmem:[%s6100_s28 + $0x30] sm:$0xff] %v3349_v41 }
 0x98a   : > { %v3350_v23 = vsub.f32 %v6081_v7, %v3342_v53 }
 0x98c   : > { %3358 = vst [vmem:[%s6100_s28 + $0x38] sm:$0xff] %v3350_v23 }
 0x98d   : > { %4508 = shalt.err (!%p4505_p4)
}
 0x98e   : > { %s4509_s20 = scalar_lea.hbm %s6122_s22, 1024  ;;  %s4513_s28 = scalar_lea.hbm %s6180_s10, 2048 }
 0x98f   : > { %p4510_p5 = scmp.ne.s32.totalorder %s6122_s22, %s4509_s20  ;;  %p4514_p1 = scmp.lt.u32.totalorder %s6122_s22, %s6180_s10 }
 0x990   : > { %p4515_p3 = scmp.lt.u32.totalorder %s4513_s28, %s4509_s20  ;;  %p4517_p6 = scmp.lt.u32.totalorder %s4509_s20, %s6122_s22 }
 0x991   : > { %p4511_p7 = pnand %p4510_p5, %p6400_p12 }
 0x992   : > { %p4516_p11 = por %p4515_p3, %p4514_p1 }
 0x993   : > { %p4512_p9 = pneg %p4511_p7 }
 0x994   : > { %p4518_p13 = por %p4517_p6, %p4516_p11 }
 0x996   : > { %p4519_p8 = pnand %p4518_p13, %p4512_p9 }
 0x998   : > { %4522 = shalt.err (!%p4519_p8)
}
 0x999   : > { %s4575_s19 = smov 128   ;;  %s4576_s29 = smov 8  }
 0x99a   : > { %4146 = dma.vmem_to_hbm [thread:$0]  (%p6400_p12), %s6124_s15, 1024, %s6122_s22, %s3360_s17, %s4575_s19, %s4575_s19, %s4576_s29  }
 0x99b PF: > { %s3388_s30 = sand.u32 1, %s4549_s13   ;;  %p6401_p10 = scmp.ne.s32.totalorder %s6210_s25, 0 }
 0x99c   : > { %p6402_p0 = scmp.ge.s32.totalorder %s4561_s16, 2  ;;  %s3389_s11 = scalar_lea.sflag [#allocation4], %s3388_s30 }
 0x99e   : > { %p4153_p2 = pnand %p6402_p0, %p6401_p10 }
 0x9a0   : > { %4544 = dma.done.wait (!%p4153_p2), %s3389_s11, 1024  }
 0x9a1   : > { %4546 = vsyncadd (!%p4153_p2), %s3389_s11, 4294966272  ;;  %s6403_s16 = sld [smem:[#allocation9_spill]]  ;;  %s6404_s12 = sld [smem:[#allocation8_spill]] }
 0x9a2   : > { %s6405_s15 = sld [smem:[#allocation10_spill]]  ;;  %s6406_s13 = smov %s4553_s14 }
 0x9a7   : > { %p23_p4 = scmp.ge.s32.totalorder %s6403_s16, 4   ;;  %s6407_s14 = smov %s6404_s12 }
 0x9a9   :  { %25 = sbr.rel (!%p23_p4) target bundleno = 5 (0x5), region = 108 }
 0x9b0   :  { %3394 = vsyncpa [#allocation3], 1 }
 0x9b1   :  { %3396 = vsyncpa [#allocation3 + $0x1], 1 }
 0x9b2   :  { %3397 = vsyncpa [#allocation4], 1 }
 0x9b3   :  { %3399 = vsyncpa [#allocation4 + $0x1], 1 }

</bundles_post_ra>
